<compile_context>
chip_gen: v6e
topology: v6e:2x2x1
jax: 0.10.0
libtpu: 0.0.40
codegen_flags: <defaults>
</compile_context>

<pallas_src>
import functools

import jax
import jax.numpy as jnp
from jax.experimental import pallas as pl
from jax.experimental.pallas import tpu as pltpu


# ----------------------------------------------------------------------------
# Per-chip tiling / VMEM budget.
# ----------------------------------------------------------------------------
def _tpu_vmem_capacity_bytes():
    try:
        return int(pltpu.get_tpu_info().vmem_capacity_bytes)
    except Exception:
        return 64 << 20            # conservative fallback: v7x per-TC VMEM


_VMEM_CAP = _tpu_vmem_capacity_bytes()
# ~15% headroom for Mosaic internal scratch / semaphores; never >~100 MiB.
_VMEM_CEIL = min(int(_VMEM_CAP * 0.85), 100 << 20)
# Bigger row tiles on 128 MiB parts (v5e/v6e); smaller on v7x (64 MiB / TC).
_TM = 512 if _VMEM_CAP >= (100 << 20) else 256
_TK_MAX = 2048                     # column (contraction) tile of A_hat


def _vmem_limit_bytes(needed):
    return int(min(max(int(needed) + (4 << 20), 16 << 20), _VMEM_CEIL))


def _pad_sizes(n):
    """Padded node count (multiple of both TM and TK) and the K tile size."""
    n_pad = ((n + _TM - 1) // _TM) * _TM
    if n_pad <= _TK_MAX:
        tk = n_pad                 # single K step; already a multiple of 128
    else:
        n_pad = ((n_pad + _TK_MAX - 1) // _TK_MAX) * _TK_MAX
        tk = _TK_MAX               # TM (256/512) divides TK_MAX
    return n_pad, tk


# ----------------------------------------------------------------------------
# Kernel 1: one GCNConv layer, tiled over (row tiles of A_hat) x (K tiles).
# ----------------------------------------------------------------------------
def _gcn_conv_kernel(a_ref, h_ref, w_ref, b_ref, out_ref, acc_ref, *, relu):
    # a_ref  : [TM, TK]    bf16 tile of A_hat (streamed / double-buffered)
    # h_ref  : [TK, Cin]   bf16 activation tile (streamed along K)
    # w_ref  : [Cin, Cout] bf16 weights (resident)
    # b_ref  : [1, Cout]   f32 bias (resident)
    # out_ref: [TM, Cout]  (resident across K; written at the last K step)
    # acc_ref: [TM, Cin]   f32 aggregation accumulator (VMEM scratch)
    k = pl.program_id(1)

    @pl.when(k == 0)
    def _():
        acc_ref[...] = jnp.zeros_like(acc_ref)

    # Aggregate: bf16 MXU operands, f32 accumulation.
    acc_ref[...] += jnp.dot(a_ref[...], h_ref[...],
                            preferred_element_type=jnp.float32)

    @pl.when(k == pl.num_programs(1) - 1)
    def _():
        # Transform: bf16 MXU operands (avoids f32xf32 multi-pass), f32 acc.
        h = jnp.dot(acc_ref[...].astype(jnp.bfloat16), w_ref[...],
                    preferred_element_type=jnp.float32) + b_ref[...]
        if relu:
            h = jnp.maximum(h, 0.0)        # elementwise stays f32
        out_ref[...] = h.astype(out_ref.dtype)


def _gcn_conv(a_hat, h, w, b, *, relu, out_dtype, tm, tk):
    n_pad = a_hat.shape[0]
    cin, cout = w.shape
    grid = (n_pad // tm, n_pad // tk)
    kernel = functools.partial(_gcn_conv_kernel, relu=relu)

    out_isize = jnp.dtype(out_dtype).itemsize
    flops = 2 * n_pad * n_pad * cin + 2 * n_pad * cin * cout
    bytes_accessed = (a_hat.size * a_hat.dtype.itemsize
                      + (n_pad // tm) * n_pad * cin * h.dtype.itemsize
                      + w.size * w.dtype.itemsize + b.size * b.dtype.itemsize
                      + n_pad * cout * out_isize)
    vmem_need = (2 * tm * tk * 2           # A tiles (bf16, double-buffered)
                 + 2 * tk * cin * 2        # H tiles
                 + 2 * cin * cout * 2      # W resident
                 + 2 * cout * 4            # bias resident
                 + 2 * tm * cout * out_isize
                 + tm * cin * 4)           # accumulator scratch

    return pl.pallas_call(
        kernel,
        out_shape=jax.ShapeDtypeStruct((n_pad, cout), out_dtype),
        grid_spec=pltpu.PrefetchScalarGridSpec(
            num_scalar_prefetch=0,
            grid=grid,
            in_specs=[
                pl.BlockSpec((tm, tk), lambda i, k: (i, k)),     # A tile
                pl.BlockSpec((tk, cin), lambda i, k: (k, 0)),    # H tile
                pl.BlockSpec((cin, cout), lambda i, k: (0, 0)),  # W resident
                pl.BlockSpec((1, cout), lambda i, k: (0, 0)),    # b resident
            ],
            out_specs=pl.BlockSpec((tm, cout), lambda i, k: (i, 0)),
            scratch_shapes=[pltpu.VMEM((tm, cin), jnp.float32)],
        ),
        compiler_params=pltpu.CompilerParams(
            dimension_semantics=("parallel", "arbitrary"),  # reduction last
            vmem_limit_bytes=_vmem_limit_bytes(vmem_need),
        ),
        cost_estimate=pl.CostEstimate(
            flops=flops, transcendentals=0, bytes_accessed=bytes_accessed),
    )(a_hat, h, w, b)


# ----------------------------------------------------------------------------
# Kernel 2: global mean pool (K-tiled over nodes) + classifier MLP.
# ----------------------------------------------------------------------------
def _pool_mlp_kernel(p_ref, h_ref, lin_ref, out_ref, acc_ref, *, offs, dims):
    # p_ref  : [G, TK]     bf16 mean-pool tile
    # h_ref  : [TK, 64]    bf16 conv3 activation tile
    # lin_ref: [R, Wmax]   f32 packed MLP weights (8-row aligned segments)
    # out_ref: [G, Dout]
    # acc_ref: [G, 64]     f32 pooled-embedding accumulator
    k = pl.program_id(0)

    @pl.when(k == 0)
    def _():
        acc_ref[...] = jnp.zeros_like(acc_ref)

    acc_ref[...] += jnp.dot(p_ref[...], h_ref[...],
                            preferred_element_type=jnp.float32)

    @pl.when(k == pl.num_programs(0) - 1)
    def _():
        d_embed, d1, d2, d_out = dims
        o_w1, o_b1, o_w2, o_b2, o_w3, o_b3 = offs     # 8-row aligned offsets
        lin = lin_ref[...]
        g = acc_ref[...]
        g = jnp.maximum(
            jnp.dot(g, lin[o_w1:o_w1 + d_embed, :d1],
                    preferred_element_type=jnp.float32)
            + lin[o_b1:o_b1 + 1, :d1], 0.0)
        g = jnp.maximum(
            jnp.dot(g, lin[o_w2:o_w2 + d1, :d2],
                    preferred_element_type=jnp.float32)
            + lin[o_b2:o_b2 + 1, :d2], 0.0)
        g = (jnp.dot(g, lin[o_w3:o_w3 + d2, :d_out],
                     preferred_element_type=jnp.float32)
             + lin[o_b3:o_b3 + 1, :d_out])
        out_ref[...] = g.astype(out_ref.dtype)


def _pool_mlp(pool, h, lin_packed, *, dims, offs, num_graphs, tk):
    n_pad, d_embed = h.shape
    _, d1, d2, d_out = dims
    grid = (n_pad // tk,)
    kernel = functools.partial(_pool_mlp_kernel, offs=offs, dims=dims)

    flops = 2 * num_graphs * (n_pad * d_embed + d_embed * d1 + d1 * d2 + d2 * d_out)
    bytes_accessed = (pool.size * pool.dtype.itemsize
                      + h.size * h.dtype.itemsize
                      + lin_packed.size * lin_packed.dtype.itemsize
                      + num_graphs * d_out * 4)
    vmem_need = (2 * num_graphs * tk * 2
                 + 2 * tk * d_embed * 2
                 + 2 * lin_packed.size * 4
                 + 2 * num_graphs * d_out * 4
                 + num_graphs * d_embed * 4)

    return pl.pallas_call(
        kernel,
        out_shape=jax.ShapeDtypeStruct((num_graphs, d_out), jnp.float32),
        grid_spec=pltpu.PrefetchScalarGridSpec(
            num_scalar_prefetch=0,
            grid=grid,
            in_specs=[
                pl.BlockSpec((num_graphs, tk), lambda k: (0, k)),
                pl.BlockSpec((tk, d_embed), lambda k: (k, 0)),
                pl.BlockSpec(lin_packed.shape, lambda k: (0, 0)),
            ],
            out_specs=pl.BlockSpec((num_graphs, d_out), lambda k: (0, 0)),
            scratch_shapes=[pltpu.VMEM((num_graphs, d_embed), jnp.float32)],
        ),
        compiler_params=pltpu.CompilerParams(
            dimension_semantics=("arbitrary",),
            vmem_limit_bytes=_vmem_limit_bytes(vmem_need),
        ),
        cost_estimate=pl.CostEstimate(
            flops=flops, transcendentals=0, bytes_accessed=bytes_accessed),
    )(pool, h, lin_packed)


# ----------------------------------------------------------------------------
# Forward pass (graph -> dense A_hat / pool matrix glue in plain JAX)
# ----------------------------------------------------------------------------
@functools.partial(jax.jit, static_argnames=("num_graphs",))
def gcn_forward(params, x, edge_index, batch, edge_weight, num_graphs):
    n, in_channels = x.shape
    if edge_weight is None:
        edge_weight = jnp.ones((edge_index.shape[1],), dtype=jnp.float32)

    n_pad, tk = _pad_sizes(n)

    # gcn_norm: add self loops (weight 1.0), symmetric D^-1/2 A D^-1/2.
    src = jnp.concatenate(
        [edge_index[0], jnp.arange(n, dtype=edge_index.dtype)]).astype(jnp.int32)
    dst = jnp.concatenate(
        [edge_index[1], jnp.arange(n, dtype=edge_index.dtype)]).astype(jnp.int32)
    ew = jnp.concatenate([edge_weight.astype(jnp.float32),
                          jnp.ones((n,), jnp.float32)])
    deg = jnp.zeros((n,), jnp.float32).at[dst].add(ew)
    dinv = jnp.where(deg > 0, jax.lax.rsqrt(deg), 0.0)
    norm = dinv[src] * ew * dinv[dst]

    # Dense A_hat: single linearized 1-D scatter-add directly in bf16 (the MXU
    # compute dtype) -- no extra f32 build + cast pass.  Zero-padded rows/cols.
    lin_idx = dst * n_pad + src
    a_hat = (jnp.zeros((n_pad * n_pad,), jnp.bfloat16)
             .at[lin_idx].add(norm.astype(jnp.bfloat16))
             .reshape(n_pad, n_pad))

    # mean-pool matrix P: [G, n_pad] bf16; zero columns for padded nodes.
    onehot = (batch[None, :] ==
              jnp.arange(num_graphs, dtype=batch.dtype)[:, None]).astype(jnp.float32)
    counts = jnp.maximum(onehot.sum(axis=1, keepdims=True), 1.0)
    pool = jnp.pad(onehot / counts, ((0, 0), (0, n_pad - n))).astype(jnp.bfloat16)

    (w1, b1, w2, b2, w3, b3, lw1, lb1, lw2, lb2, lw3, lb3) = params
    out_channels = lw3.shape[1]

    # Node features: pad + cast to bf16 MXU operand.
    h0 = jnp.pad(x.astype(jnp.float32),
                 ((0, n_pad - n), (0, 0))).astype(jnp.bfloat16)

    # Conv layers: W as bf16 resident operand, bias as separate f32 operand.
    h1 = _gcn_conv(a_hat, h0, w1.astype(jnp.bfloat16), b1,
                   relu=True, out_dtype=jnp.bfloat16, tm=_TM, tk=tk)
    h2 = _gcn_conv(a_hat, h1, w2.astype(jnp.bfloat16), b2,
                   relu=True, out_dtype=jnp.bfloat16, tm=_TM, tk=tk)
    h3 = _gcn_conv(a_hat, h2, w3.astype(jnp.bfloat16), b3,
                   relu=False, out_dtype=jnp.bfloat16, tm=_TM, tk=tk)

    # Pack the three Linear layers, each segment padded to a multiple of 8 rows
    # so in-kernel slices land on sublane-tile boundaries.
    segs = [lw1, lb1, lw2, lb2, lw3, lb3]
    wmax = max(s.shape[1] for s in segs)
    rows, offs, r = [], [], 0
    for s in segs:
        offs.append(r)
        rp = ((s.shape[0] + 7) // 8) * 8
        rows.append(jnp.pad(s, ((0, rp - s.shape[0]), (0, wmax - s.shape[1]))))
        r += rp
    lin_packed = jnp.concatenate(rows, axis=0)

    dims = (lw1.shape[0], lw1.shape[1], lw2.shape[1], out_channels)
    return _pool_mlp(pool, h3, lin_packed, dims=dims, offs=tuple(offs),
                     num_graphs=num_graphs, tk=tk)


# ----------------------------------------------------------------------------
# Plain-JAX f32 reference (same math, no padding / bf16) for validation.
# ----------------------------------------------------------------------------
def gcn_reference(params, x, edge_index, batch, edge_weight, num_graphs):
    n = x.shape[0]
    if edge_weight is None:
        edge_weight = jnp.ones((edge_index.shape[1],), jnp.float32)
    src = jnp.concatenate([edge_index[0], jnp.arange(n, dtype=edge_index.dtype)])
    dst = jnp.concatenate([edge_index[1], jnp.arange(n, dtype=edge_index.dtype)])
    ew = jnp.concatenate([edge_weight.astype(jnp.float32), jnp.ones((n,), jnp.float32)])
    deg = jnp.zeros((n,), jnp.float32).at[dst].add(ew)
    dinv = jnp.where(deg > 0, 1.0 / jnp.sqrt(deg), 0.0)
    norm = dinv[src] * ew * dinv[dst]
    a = jnp.zeros((n, n), jnp.float32).at[dst, src].add(norm)
    (w1, b1, w2, b2, w3, b3, lw1, lb1, lw2, lb2, lw3, lb3) = params
    xf = x.astype(jnp.float32)
    h = jnp.maximum(a @ (xf @ w1) + b1, 0.0)
    h = jnp.maximum(a @ (h @ w2) + b2, 0.0)
    h = a @ (h @ w3) + b3
    onehot = (batch[None, :] == jnp.arange(num_graphs)[:, None]).astype(jnp.float32)
    p = onehot / jnp.maximum(onehot.sum(1, keepdims=True), 1.0)
    g = p @ h
    g = jnp.maximum(g @ lw1 + lb1, 0.0)
    g = jnp.maximum(g @ lw2 + lb2, 0.0)
    return g @ lw3 + lb3


# ----------------------------------------------------------------------------
# Deterministic parameter init (synthetic; matches module's shapes)
# ----------------------------------------------------------------------------
def init_params(in_channels, out_channels, seed=12345):
    key = jax.random.PRNGKey(seed)
    ks = jax.random.split(key, 6)

    def glorot(k, fan_in, fan_out):
        lim = jnp.sqrt(6.0 / (fan_in + fan_out))
        return jax.random.uniform(k, (fan_in, fan_out), jnp.float32, -lim, lim)

    w1 = glorot(ks[0], in_channels, 32); b1 = jnp.zeros((1, 32), jnp.float32)
    w2 = glorot(ks[1], 32, 48);          b2 = jnp.zeros((1, 48), jnp.float32)
    w3 = glorot(ks[2], 48, 64);          b3 = jnp.zeros((1, 64), jnp.float32)
    lw1 = glorot(ks[3], 64, 32); lb1 = jnp.zeros((1, 32), jnp.float32)
    lw2 = glorot(ks[4], 32, 32); lb2 = jnp.zeros((1, 32), jnp.float32)
    lw3 = glorot(ks[5], 32, out_channels)
    lb3 = jnp.zeros((1, out_channels), jnp.float32)
    return (w1, b1, w2, b2, w3, b3, lw1, lb1, lw2, lb2, lw3, lb3)


# ----------------------------------------------------------------------------
if __name__ == "__main__":
    IN_CHANNELS = 4
    OUT_CHANNELS = 3
    NUM_NODES = 16          # 2 graphs x 8 nodes
    NUM_GRAPHS = 2

    key = jax.random.PRNGKey(0)
    x = jax.random.normal(key, (NUM_NODES, IN_CHANNELS), jnp.float32)

    # Deterministic graph: a bidirectional ring within each of the 2 graphs.
    edges = []
    for g in range(NUM_GRAPHS):
        base = g * 8
        for i in range(8):
            a, b = base + i, base + (i + 1) % 8
            edges.append((a, b))
            edges.append((b, a))
    edge_index = jnp.array(edges, dtype=jnp.int32).T               # [2, E]
    batch = jnp.repeat(jnp.arange(NUM_GRAPHS, dtype=jnp.int32), 8)  # [N]
    edge_weight = None  # -> ones, as in the reference forward()

    params = init_params(IN_CHANNELS, OUT_CHANNELS)

    out = gcn_forward(params, x, edge_index, batch, edge_weight, NUM_GRAPHS)
    out = jax.block_until_ready(out)
    ref = gcn_reference(params, x, edge_index, batch, edge_weight, NUM_GRAPHS)

    assert out.shape == (NUM_GRAPHS, OUT_CHANNELS)
    assert jnp.all(jnp.isfinite(out))
    # bf16 MXU operands / activations with f32 accumulation -> small, bounded
    # error vs the pure-f32 reference.
    assert float(jnp.max(jnp.abs(out - ref))) < 7.5e-2
    print("KERNEL_OK")
</pallas_src>

<mosaic_0001>
module attributes {stable_mosaic.version = 11 : i64} {
  func.func private @main(%arg0: i32) attributes {dimension_semantics = [#tpu.dimension_semantics<core_parallel>], iteration_bounds = array<i64: 2>, tpu.core_type = #tpu.core_type<sc_scalar_subcore>, window_params = []} {
    return
  }
}

module attributes {stable_mosaic.version = 11 : i64} {
  func.func private @main(%arg0: i32) attributes {dimension_semantics = [#tpu.dimension_semantics<core_parallel>], iteration_bounds = array<i64: 2>, tpu.core_type = #tpu.core_type<sc_scalar_subcore>, window_params = []} {
    return
  }
}

module attributes {stable_mosaic.version = 11 : i64} {
  func.func @_gcn_conv_kernel(%arg0: i32, %arg1: i32, %arg2: memref<256x256xbf16, #tpu.memory_space<vmem>>, %arg3: memref<256x4xbf16, #tpu.memory_space<vmem>>, %arg4: memref<4x32xbf16, #tpu.memory_space<vmem>>, %arg5: memref<1x32xf32, #tpu.memory_space<vmem>>, %arg6: memref<256x32xbf16, #tpu.memory_space<vmem>>, %arg7: memref<256x4xf32, #tpu.memory_space<vmem>>) attributes {dimension_semantics = [#tpu.dimension_semantics<parallel>, #tpu.dimension_semantics<arbitrary>], iteration_bounds = array<i64: 1, 1>, scalar_prefetch = 0 : i64, scratch_operands = 1 : i64, tpu.core_type = #tpu.core_type<tc>, window_params = [{transform_indices = @transform_0, window_bounds = array<i64: 256, 256>}, {transform_indices = @transform_1, window_bounds = array<i64: 256, 4>}, {pipeline_mode = #tpu.pipeline_mode<synchronous>, transform_indices = @transform_2, window_bounds = array<i64: 4, 32>}, {pipeline_mode = #tpu.pipeline_mode<synchronous>, transform_indices = @transform_3, window_bounds = array<i64: 1, 32>}, {transform_indices = @transform_4, window_bounds = array<i64: 256, 32>}]} {
    %c0_i32 = arith.constant 0 : i32
    %0 = arith.cmpi eq, %arg1, %c0_i32 : i32
    %1 = arith.extui %0 : i1 to i32
    %c0_i32_0 = arith.constant 0 : i32
    %2 = arith.cmpi ne, %1, %c0_i32_0 : i32
    scf.if %2 {
      %cst_10 = arith.constant 0.000000e+00 : f32
      %12 = vector.broadcast %cst_10 : f32 to vector<256x4xf32>
      %c0_11 = arith.constant 0 : index
      %c0_12 = arith.constant 0 : index
      %13 = vector.load %arg7[%c0_11, %c0_12] : memref<256x4xf32, #tpu.memory_space<vmem>>, vector<256x4xf32>
      tpu.vector_store %arg7[%c0_11, %c0_12], %12 {strides = array<i32>} : memref<256x4xf32, #tpu.memory_space<vmem>>, vector<256x4xf32>,
    } else {
    }
    %c0 = arith.constant 0 : index
    %c0_1 = arith.constant 0 : index
    %3 = vector.load %arg7[%c0, %c0_1] : memref<256x4xf32, #tpu.memory_space<vmem>>, vector<256x4xf32>
    %c0_2 = arith.constant 0 : index
    %c0_3 = arith.constant 0 : index
    %4 = vector.load %arg2[%c0_2, %c0_3] : memref<256x256xbf16, #tpu.memory_space<vmem>>, vector<256x256xbf16>
    %c0_4 = arith.constant 0 : index
    %c0_5 = arith.constant 0 : index
    %5 = vector.load %arg3[%c0_4, %c0_5] : memref<256x4xbf16, #tpu.memory_space<vmem>>, vector<256x4xbf16>
    %cst = arith.constant dense<0.000000e+00> : vector<256x4xf32>
    %6 = tpu.matmul %4, %5, %cst {dimension_numbers = #tpu.dot_dimension_numbers<[1], [0], [0], [1], [0, 0, 1, 1], [], []>} : vector<256x256xbf16>, vector<256x4xbf16>, vector<256x4xf32> -> vector<256x4xf32>
    %7 = arith.addf %3, %6 : vector<256x4xf32>
    %c0_6 = arith.constant 0 : index
    %c0_7 = arith.constant 0 : index
    %8 = vector.load %arg7[%c0_6, %c0_7] : memref<256x4xf32, #tpu.memory_space<vmem>>, vector<256x4xf32>
    tpu.vector_store %arg7[%c0_6, %c0_7], %7 {strides = array<i32>} : memref<256x4xf32, #tpu.memory_space<vmem>>, vector<256x4xf32>,
    %c0_i32_8 = arith.constant 0 : i32
    %9 = arith.cmpi eq, %arg1, %c0_i32_8 : i32
    %10 = arith.extui %9 : i1 to i32
    %c0_i32_9 = arith.constant 0 : i32
    %11 = arith.cmpi ne, %10, %c0_i32_9 : i32
    scf.if %11 {
      %c0_10 = arith.constant 0 : index
      %c0_11 = arith.constant 0 : index
      %12 = vector.load %arg7[%c0_10, %c0_11] : memref<256x4xf32, #tpu.memory_space<vmem>>, vector<256x4xf32>
      %13 = arith.truncf %12 : vector<256x4xf32> to vector<256x4xbf16>
      %c0_12 = arith.constant 0 : index
      %c0_13 = arith.constant 0 : index
      %14 = vector.load %arg4[%c0_12, %c0_13] : memref<4x32xbf16, #tpu.memory_space<vmem>>, vector<4x32xbf16>
      %cst_14 = arith.constant dense<0.000000e+00> : vector<256x32xf32>
      %15 = tpu.matmul %13, %14, %cst_14 {dimension_numbers = #tpu.dot_dimension_numbers<[1], [0], [0], [1], [0, 0, 1, 1], [], []>} : vector<256x4xbf16>, vector<4x32xbf16>, vector<256x32xf32> -> vector<256x32xf32>
      %c0_15 = arith.constant 0 : index
      %c0_16 = arith.constant 0 : index
      %16 = vector.load %arg5[%c0_15, %c0_16] : memref<1x32xf32, #tpu.memory_space<vmem>>, vector<1x32xf32>
      %17 = vector.broadcast %16 : vector<1x32xf32> to vector<256x32xf32>
      %18 = arith.addf %15, %17 : vector<256x32xf32>
      %cst_17 = arith.constant 0.000000e+00 : f32
      %19 = vector.broadcast %cst_17 : f32 to vector<256x32xf32>
      %20 = arith.maximumf %18, %19 : vector<256x32xf32>
      %21 = arith.truncf %20 : vector<256x32xf32> to vector<256x32xbf16>
      %c0_18 = arith.constant 0 : index
      %c0_19 = arith.constant 0 : index
      %22 = vector.load %arg6[%c0_18, %c0_19] : memref<256x32xbf16, #tpu.memory_space<vmem>>, vector<256x32xbf16>
      tpu.vector_store %arg6[%c0_18, %c0_19], %21 {strides = array<i32>} : memref<256x32xbf16, #tpu.memory_space<vmem>>, vector<256x32xbf16>,
    } else {
    }
    return
  }
  func.func @transform_0(%arg0: i32, %arg1: i32) -> (i32, i32) {
    %c0_i32 = arith.constant 0 : i32
    return %arg0, %arg1 : i32, i32
  }
  func.func @transform_1(%arg0: i32, %arg1: i32) -> (i32, i32) {
    %c0_i32 = arith.constant 0 : i32
    %c0_i32_0 = arith.constant 0 : i32
    return %arg1, %c0_i32 : i32, i32
  }
  func.func @transform_2(%arg0: i32, %arg1: i32) -> (i32, i32) {
    %c0_i32 = arith.constant 0 : i32
    %c0_i32_0 = arith.constant 0 : i32
    %c0_i32_1 = arith.constant 0 : i32
    return %c0_i32, %c0_i32_0 : i32, i32
  }
  func.func @transform_3(%arg0: i32, %arg1: i32) -> (i32, i32) {
    %c0_i32 = arith.constant 0 : i32
    %c0_i32_0 = arith.constant 0 : i32
    %c0_i32_1 = arith.constant 0 : i32
    return %c0_i32, %c0_i32_0 : i32, i32
  }
  func.func @transform_4(%arg0: i32, %arg1: i32) -> (i32, i32) {
    %c0_i32 = arith.constant 0 : i32
    %c0_i32_0 = arith.constant 0 : i32
    return %arg0, %c0_i32 : i32, i32
  }
}

module attributes {stable_mosaic.version = 11 : i64} {
  func.func @_gcn_conv_kernel(%arg0: i32, %arg1: i32, %arg2: memref<256x256xbf16, #tpu.memory_space<vmem>>, %arg3: memref<256x48xbf16, #tpu.memory_space<vmem>>, %arg4: memref<48x64xbf16, #tpu.memory_space<vmem>>, %arg5: memref<1x64xf32, #tpu.memory_space<vmem>>, %arg6: memref<256x64xbf16, #tpu.memory_space<vmem>>, %arg7: memref<256x48xf32, #tpu.memory_space<vmem>>) attributes {dimension_semantics = [#tpu.dimension_semantics<parallel>, #tpu.dimension_semantics<arbitrary>], iteration_bounds = array<i64: 1, 1>, scalar_prefetch = 0 : i64, scratch_operands = 1 : i64, tpu.core_type = #tpu.core_type<tc>, window_params = [{transform_indices = @transform_0, window_bounds = array<i64: 256, 256>}, {transform_indices = @transform_1, window_bounds = array<i64: 256, 48>}, {pipeline_mode = #tpu.pipeline_mode<synchronous>, transform_indices = @transform_2, window_bounds = array<i64: 48, 64>}, {pipeline_mode = #tpu.pipeline_mode<synchronous>, transform_indices = @transform_3, window_bounds = array<i64: 1, 64>}, {transform_indices = @transform_4, window_bounds = array<i64: 256, 64>}]} {
    %c0_i32 = arith.constant 0 : i32
    %0 = arith.cmpi eq, %arg1, %c0_i32 : i32
    %1 = arith.extui %0 : i1 to i32
    %c0_i32_0 = arith.constant 0 : i32
    %2 = arith.cmpi ne, %1, %c0_i32_0 : i32
    scf.if %2 {
      %cst_10 = arith.constant 0.000000e+00 : f32
      %12 = vector.broadcast %cst_10 : f32 to vector<256x48xf32>
      %c0_11 = arith.constant 0 : index
      %c0_12 = arith.constant 0 : index
      %13 = vector.load %arg7[%c0_11, %c0_12] : memref<256x48xf32, #tpu.memory_space<vmem>>, vector<256x48xf32>
      tpu.vector_store %arg7[%c0_11, %c0_12], %12 {strides = array<i32>} : memref<256x48xf32, #tpu.memory_space<vmem>>, vector<256x48xf32>,
    } else {
    }
    %c0 = arith.constant 0 : index
    %c0_1 = arith.constant 0 : index
    %3 = vector.load %arg7[%c0, %c0_1] : memref<256x48xf32, #tpu.memory_space<vmem>>, vector<256x48xf32>
    %c0_2 = arith.constant 0 : index
    %c0_3 = arith.constant 0 : index
    %4 = vector.load %arg2[%c0_2, %c0_3] : memref<256x256xbf16, #tpu.memory_space<vmem>>, vector<256x256xbf16>
    %c0_4 = arith.constant 0 : index
    %c0_5 = arith.constant 0 : index
    %5 = vector.load %arg3[%c0_4, %c0_5] : memref<256x48xbf16, #tpu.memory_space<vmem>>, vector<256x48xbf16>
    %cst = arith.constant dense<0.000000e+00> : vector<256x48xf32>
    %6 = tpu.matmul %4, %5, %cst {dimension_numbers = #tpu.dot_dimension_numbers<[1], [0], [0], [1], [0, 0, 1, 1], [], []>} : vector<256x256xbf16>, vector<256x48xbf16>, vector<256x48xf32> -> vector<256x48xf32>
    %7 = arith.addf %3, %6 : vector<256x48xf32>
    %c0_6 = arith.constant 0 : index
    %c0_7 = arith.constant 0 : index
    %8 = vector.load %arg7[%c0_6, %c0_7] : memref<256x48xf32, #tpu.memory_space<vmem>>, vector<256x48xf32>
    tpu.vector_store %arg7[%c0_6, %c0_7], %7 {strides = array<i32>} : memref<256x48xf32, #tpu.memory_space<vmem>>, vector<256x48xf32>,
    %c0_i32_8 = arith.constant 0 : i32
    %9 = arith.cmpi eq, %arg1, %c0_i32_8 : i32
    %10 = arith.extui %9 : i1 to i32
    %c0_i32_9 = arith.constant 0 : i32
    %11 = arith.cmpi ne, %10, %c0_i32_9 : i32
    scf.if %11 {
      %c0_10 = arith.constant 0 : index
      %c0_11 = arith.constant 0 : index
      %12 = vector.load %arg7[%c0_10, %c0_11] : memref<256x48xf32, #tpu.memory_space<vmem>>, vector<256x48xf32>
      %13 = arith.truncf %12 : vector<256x48xf32> to vector<256x48xbf16>
      %c0_12 = arith.constant 0 : index
      %c0_13 = arith.constant 0 : index
      %14 = vector.load %arg4[%c0_12, %c0_13] : memref<48x64xbf16, #tpu.memory_space<vmem>>, vector<48x64xbf16>
      %cst_14 = arith.constant dense<0.000000e+00> : vector<256x64xf32>
      %15 = tpu.matmul %13, %14, %cst_14 {dimension_numbers = #tpu.dot_dimension_numbers<[1], [0], [0], [1], [0, 0, 1, 1], [], []>} : vector<256x48xbf16>, vector<48x64xbf16>, vector<256x64xf32> -> vector<256x64xf32>
      %c0_15 = arith.constant 0 : index
      %c0_16 = arith.constant 0 : index
      %16 = vector.load %arg5[%c0_15, %c0_16] : memref<1x64xf32, #tpu.memory_space<vmem>>, vector<1x64xf32>
      %17 = vector.broadcast %16 : vector<1x64xf32> to vector<256x64xf32>
      %18 = arith.addf %15, %17 : vector<256x64xf32>
      %19 = arith.truncf %18 : vector<256x64xf32> to vector<256x64xbf16>
      %c0_17 = arith.constant 0 : index
      %c0_18 = arith.constant 0 : index
      %20 = vector.load %arg6[%c0_17, %c0_18] : memref<256x64xbf16, #tpu.memory_space<vmem>>, vector<256x64xbf16>
      tpu.vector_store %arg6[%c0_17, %c0_18], %19 {strides = array<i32>} : memref<256x64xbf16, #tpu.memory_space<vmem>>, vector<256x64xbf16>,
    } else {
    }
    return
  }
  func.func @transform_0(%arg0: i32, %arg1: i32) -> (i32, i32) {
    %c0_i32 = arith.constant 0 : i32
    return %arg0, %arg1 : i32, i32
  }
  func.func @transform_1(%arg0: i32, %arg1: i32) -> (i32, i32) {
    %c0_i32 = arith.constant 0 : i32
    %c0_i32_0 = arith.constant 0 : i32
    return %arg1, %c0_i32 : i32, i32
  }
  func.func @transform_2(%arg0: i32, %arg1: i32) -> (i32, i32) {
    %c0_i32 = arith.constant 0 : i32
    %c0_i32_0 = arith.constant 0 : i32
    %c0_i32_1 = arith.constant 0 : i32
    return %c0_i32, %c0_i32_0 : i32, i32
  }
  func.func @transform_3(%arg0: i32, %arg1: i32) -> (i32, i32) {
    %c0_i32 = arith.constant 0 : i32
    %c0_i32_0 = arith.constant 0 : i32
    %c0_i32_1 = arith.constant 0 : i32
    return %c0_i32, %c0_i32_0 : i32, i32
  }
  func.func @transform_4(%arg0: i32, %arg1: i32) -> (i32, i32) {
    %c0_i32 = arith.constant 0 : i32
    %c0_i32_0 = arith.constant 0 : i32
    return %arg0, %c0_i32 : i32, i32
  }
}

module attributes {stable_mosaic.version = 11 : i64} {
  func.func @_gcn_conv_kernel(%arg0: i32, %arg1: i32, %arg2: memref<256x256xbf16, #tpu.memory_space<vmem>>, %arg3: memref<256x32xbf16, #tpu.memory_space<vmem>>, %arg4: memref<32x48xbf16, #tpu.memory_space<vmem>>, %arg5: memref<1x48xf32, #tpu.memory_space<vmem>>, %arg6: memref<256x48xbf16, #tpu.memory_space<vmem>>, %arg7: memref<256x32xf32, #tpu.memory_space<vmem>>) attributes {dimension_semantics = [#tpu.dimension_semantics<parallel>, #tpu.dimension_semantics<arbitrary>], iteration_bounds = array<i64: 1, 1>, scalar_prefetch = 0 : i64, scratch_operands = 1 : i64, tpu.core_type = #tpu.core_type<tc>, window_params = [{transform_indices = @transform_0, window_bounds = array<i64: 256, 256>}, {transform_indices = @transform_1, window_bounds = array<i64: 256, 32>}, {pipeline_mode = #tpu.pipeline_mode<synchronous>, transform_indices = @transform_2, window_bounds = array<i64: 32, 48>}, {pipeline_mode = #tpu.pipeline_mode<synchronous>, transform_indices = @transform_3, window_bounds = array<i64: 1, 48>}, {transform_indices = @transform_4, window_bounds = array<i64: 256, 48>}]} {
    %c0_i32 = arith.constant 0 : i32
    %0 = arith.cmpi eq, %arg1, %c0_i32 : i32
    %1 = arith.extui %0 : i1 to i32
    %c0_i32_0 = arith.constant 0 : i32
    %2 = arith.cmpi ne, %1, %c0_i32_0 : i32
    scf.if %2 {
      %cst_10 = arith.constant 0.000000e+00 : f32
      %12 = vector.broadcast %cst_10 : f32 to vector<256x32xf32>
      %c0_11 = arith.constant 0 : index
      %c0_12 = arith.constant 0 : index
      %13 = vector.load %arg7[%c0_11, %c0_12] : memref<256x32xf32, #tpu.memory_space<vmem>>, vector<256x32xf32>
      tpu.vector_store %arg7[%c0_11, %c0_12], %12 {strides = array<i32>} : memref<256x32xf32, #tpu.memory_space<vmem>>, vector<256x32xf32>,
    } else {
    }
    %c0 = arith.constant 0 : index
    %c0_1 = arith.constant 0 : index
    %3 = vector.load %arg7[%c0, %c0_1] : memref<256x32xf32, #tpu.memory_space<vmem>>, vector<256x32xf32>
    %c0_2 = arith.constant 0 : index
    %c0_3 = arith.constant 0 : index
    %4 = vector.load %arg2[%c0_2, %c0_3] : memref<256x256xbf16, #tpu.memory_space<vmem>>, vector<256x256xbf16>
    %c0_4 = arith.constant 0 : index
    %c0_5 = arith.constant 0 : index
    %5 = vector.load %arg3[%c0_4, %c0_5] : memref<256x32xbf16, #tpu.memory_space<vmem>>, vector<256x32xbf16>
    %cst = arith.constant dense<0.000000e+00> : vector<256x32xf32>
    %6 = tpu.matmul %4, %5, %cst {dimension_numbers = #tpu.dot_dimension_numbers<[1], [0], [0], [1], [0, 0, 1, 1], [], []>} : vector<256x256xbf16>, vector<256x32xbf16>, vector<256x32xf32> -> vector<256x32xf32>
    %7 = arith.addf %3, %6 : vector<256x32xf32>
    %c0_6 = arith.constant 0 : index
    %c0_7 = arith.constant 0 : index
    %8 = vector.load %arg7[%c0_6, %c0_7] : memref<256x32xf32, #tpu.memory_space<vmem>>, vector<256x32xf32>
    tpu.vector_store %arg7[%c0_6, %c0_7], %7 {strides = array<i32>} : memref<256x32xf32, #tpu.memory_space<vmem>>, vector<256x32xf32>,
    %c0_i32_8 = arith.constant 0 : i32
    %9 = arith.cmpi eq, %arg1, %c0_i32_8 : i32
    %10 = arith.extui %9 : i1 to i32
    %c0_i32_9 = arith.constant 0 : i32
    %11 = arith.cmpi ne, %10, %c0_i32_9 : i32
    scf.if %11 {
      %c0_10 = arith.constant 0 : index
      %c0_11 = arith.constant 0 : index
      %12 = vector.load %arg7[%c0_10, %c0_11] : memref<256x32xf32, #tpu.memory_space<vmem>>, vector<256x32xf32>
      %13 = arith.truncf %12 : vector<256x32xf32> to vector<256x32xbf16>
      %c0_12 = arith.constant 0 : index
      %c0_13 = arith.constant 0 : index
      %14 = vector.load %arg4[%c0_12, %c0_13] : memref<32x48xbf16, #tpu.memory_space<vmem>>, vector<32x48xbf16>
      %cst_14 = arith.constant dense<0.000000e+00> : vector<256x48xf32>
      %15 = tpu.matmul %13, %14, %cst_14 {dimension_numbers = #tpu.dot_dimension_numbers<[1], [0], [0], [1], [0, 0, 1, 1], [], []>} : vector<256x32xbf16>, vector<32x48xbf16>, vector<256x48xf32> -> vector<256x48xf32>
      %c0_15 = arith.constant 0 : index
      %c0_16 = arith.constant 0 : index
      %16 = vector.load %arg5[%c0_15, %c0_16] : memref<1x48xf32, #tpu.memory_space<vmem>>, vector<1x48xf32>
      %17 = vector.broadcast %16 : vector<1x48xf32> to vector<256x48xf32>
      %18 = arith.addf %15, %17 : vector<256x48xf32>
      %cst_17 = arith.constant 0.000000e+00 : f32
      %19 = vector.broadcast %cst_17 : f32 to vector<256x48xf32>
      %20 = arith.maximumf %18, %19 : vector<256x48xf32>
      %21 = arith.truncf %20 : vector<256x48xf32> to vector<256x48xbf16>
      %c0_18 = arith.constant 0 : index
      %c0_19 = arith.constant 0 : index
      %22 = vector.load %arg6[%c0_18, %c0_19] : memref<256x48xbf16, #tpu.memory_space<vmem>>, vector<256x48xbf16>
      tpu.vector_store %arg6[%c0_18, %c0_19], %21 {strides = array<i32>} : memref<256x48xbf16, #tpu.memory_space<vmem>>, vector<256x48xbf16>,
    } else {
    }
    return
  }
  func.func @transform_0(%arg0: i32, %arg1: i32) -> (i32, i32) {
    %c0_i32 = arith.constant 0 : i32
    return %arg0, %arg1 : i32, i32
  }
  func.func @transform_1(%arg0: i32, %arg1: i32) -> (i32, i32) {
    %c0_i32 = arith.constant 0 : i32
    %c0_i32_0 = arith.constant 0 : i32
    return %arg1, %c0_i32 : i32, i32
  }
  func.func @transform_2(%arg0: i32, %arg1: i32) -> (i32, i32) {
    %c0_i32 = arith.constant 0 : i32
    %c0_i32_0 = arith.constant 0 : i32
    %c0_i32_1 = arith.constant 0 : i32
    return %c0_i32, %c0_i32_0 : i32, i32
  }
  func.func @transform_3(%arg0: i32, %arg1: i32) -> (i32, i32) {
    %c0_i32 = arith.constant 0 : i32
    %c0_i32_0 = arith.constant 0 : i32
    %c0_i32_1 = arith.constant 0 : i32
    return %c0_i32, %c0_i32_0 : i32, i32
  }
  func.func @transform_4(%arg0: i32, %arg1: i32) -> (i32, i32) {
    %c0_i32 = arith.constant 0 : i32
    %c0_i32_0 = arith.constant 0 : i32
    return %arg0, %c0_i32 : i32, i32
  }
}

module attributes {stable_mosaic.version = 11 : i64} {
  func.func @_pool_mlp_kernel(%arg0: i32, %arg1: memref<2x256xbf16, #tpu.memory_space<vmem>>, %arg2: memref<256x64xbf16, #tpu.memory_space<vmem>>, %arg3: memref<152x32xf32, #tpu.memory_space<vmem>>, %arg4: memref<2x3xf32, #tpu.memory_space<vmem>>, %arg5: memref<2x64xf32, #tpu.memory_space<vmem>>) attributes {dimension_semantics = [#tpu.dimension_semantics<arbitrary>], iteration_bounds = array<i64: 1>, scalar_prefetch = 0 : i64, scratch_operands = 1 : i64, tpu.core_type = #tpu.core_type<tc>, window_params = [{transform_indices = @transform_0, window_bounds = array<i64: 2, 256>}, {transform_indices = @transform_1, window_bounds = array<i64: 256, 64>}, {pipeline_mode = #tpu.pipeline_mode<synchronous>, transform_indices = @transform_2, window_bounds = array<i64: 152, 32>}, {pipeline_mode = #tpu.pipeline_mode<synchronous>, transform_indices = @transform_3, window_bounds = array<i64: 2, 3>}]} {
    %c0_i32 = arith.constant 0 : i32
    %0 = arith.cmpi eq, %arg0, %c0_i32 : i32
    %1 = arith.extui %0 : i1 to i32
    %c0_i32_0 = arith.constant 0 : i32
    %2 = arith.cmpi ne, %1, %c0_i32_0 : i32
    scf.if %2 {
      %cst_10 = arith.constant 0.000000e+00 : f32
      %12 = vector.broadcast %cst_10 : f32 to vector<2x64xf32>
      %c0_11 = arith.constant 0 : index
      %c0_12 = arith.constant 0 : index
      %13 = vector.load %arg5[%c0_11, %c0_12] : memref<2x64xf32, #tpu.memory_space<vmem>>, vector<2x64xf32>
      tpu.vector_store %arg5[%c0_11, %c0_12], %12 {strides = array<i32>} : memref<2x64xf32, #tpu.memory_space<vmem>>, vector<2x64xf32>,
    } else {
    }
    %c0 = arith.constant 0 : index
    %c0_1 = arith.constant 0 : index
    %3 = vector.load %arg5[%c0, %c0_1] : memref<2x64xf32, #tpu.memory_space<vmem>>, vector<2x64xf32>
    %c0_2 = arith.constant 0 : index
    %c0_3 = arith.constant 0 : index
    %4 = vector.load %arg1[%c0_2, %c0_3] : memref<2x256xbf16, #tpu.memory_space<vmem>>, vector<2x256xbf16>
    %c0_4 = arith.constant 0 : index
    %c0_5 = arith.constant 0 : index
    %5 = vector.load %arg2[%c0_4, %c0_5] : memref<256x64xbf16, #tpu.memory_space<vmem>>, vector<256x64xbf16>
    %cst = arith.constant dense<0.000000e+00> : vector<2x64xf32>
    %6 = tpu.matmul %4, %5, %cst {dimension_numbers = #tpu.dot_dimension_numbers<[1], [0], [0], [1], [0, 0, 1, 1], [], []>} : vector<2x256xbf16>, vector<256x64xbf16>, vector<2x64xf32> -> vector<2x64xf32>
    %7 = arith.addf %3, %6 : vector<2x64xf32>
    %c0_6 = arith.constant 0 : index
    %c0_7 = arith.constant 0 : index
    %8 = vector.load %arg5[%c0_6, %c0_7] : memref<2x64xf32, #tpu.memory_space<vmem>>, vector<2x64xf32>
    tpu.vector_store %arg5[%c0_6, %c0_7], %7 {strides = array<i32>} : memref<2x64xf32, #tpu.memory_space<vmem>>, vector<2x64xf32>,
    %c0_i32_8 = arith.constant 0 : i32
    %9 = arith.cmpi eq, %arg0, %c0_i32_8 : i32
    %10 = arith.extui %9 : i1 to i32
    %c0_i32_9 = arith.constant 0 : i32
    %11 = arith.cmpi ne, %10, %c0_i32_9 : i32
    scf.if %11 {
      %c0_10 = arith.constant 0 : index
      %c0_11 = arith.constant 0 : index
      %12 = vector.load %arg3[%c0_10, %c0_11] : memref<152x32xf32, #tpu.memory_space<vmem>>, vector<152x32xf32>
      %c0_12 = arith.constant 0 : index
      %c0_13 = arith.constant 0 : index
      %13 = vector.load %arg5[%c0_12, %c0_13] : memref<2x64xf32, #tpu.memory_space<vmem>>, vector<2x64xf32>
      %14 = vector.extract_strided_slice %12 {offsets = [0, 0], sizes = [64, 32], strides = [1, 1]} : vector<152x32xf32> to vector<64x32xf32>
      %cst_14 = arith.constant dense<0.000000e+00> : vector<2x32xf32>
      %15 = tpu.matmul %13, %14, %cst_14 {dimension_numbers = #tpu.dot_dimension_numbers<[1], [0], [0], [1], [0, 0, 1, 1], [], []>} : vector<2x64xf32>, vector<64x32xf32>, vector<2x32xf32> -> vector<2x32xf32>
      %16 = vector.extract_strided_slice %12 {offsets = [64, 0], sizes = [1, 32], strides = [1, 1]} : vector<152x32xf32> to vector<1x32xf32>
      %17 = vector.broadcast %16 : vector<1x32xf32> to vector<2x32xf32>
      %18 = arith.addf %15, %17 : vector<2x32xf32>
      %cst_15 = arith.constant 0.000000e+00 : f32
      %19 = vector.broadcast %cst_15 : f32 to vector<2x32xf32>
      %20 = arith.maximumf %18, %19 : vector<2x32xf32>
      %21 = vector.extract_strided_slice %12 {offsets = [72, 0], sizes = [32, 32], strides = [1, 1]} : vector<152x32xf32> to vector<32x32xf32>
      %cst_16 = arith.constant dense<0.000000e+00> : vector<2x32xf32>
      %22 = tpu.matmul %20, %21, %cst_16 {dimension_numbers = #tpu.dot_dimension_numbers<[1], [0], [0], [1], [0, 0, 1, 1], [], []>} : vector<2x32xf32>, vector<32x32xf32>, vector<2x32xf32> -> vector<2x32xf32>
      %23 = vector.extract_strided_slice %12 {offsets = [104, 0], sizes = [1, 32], strides = [1, 1]} : vector<152x32xf32> to vector<1x32xf32>
      %24 = vector.broadcast %23 : vector<1x32xf32> to vector<2x32xf32>
      %25 = arith.addf %22, %24 : vector<2x32xf32>
      %cst_17 = arith.constant 0.000000e+00 : f32
      %26 = vector.broadcast %cst_17 : f32 to vector<2x32xf32>
      %27 = arith.maximumf %25, %26 : vector<2x32xf32>
      %28 = vector.extract_strided_slice %12 {offsets = [112, 0], sizes = [32, 3], strides = [1, 1]} : vector<152x32xf32> to vector<32x3xf32>
      %cst_18 = arith.constant dense<0.000000e+00> : vector<2x3xf32>
      %29 = tpu.matmul %27, %28, %cst_18 {dimension_numbers = #tpu.dot_dimension_numbers<[1], [0], [0], [1], [0, 0, 1, 1], [], []>} : vector<2x32xf32>, vector<32x3xf32>, vector<2x3xf32> -> vector<2x3xf32>
      %30 = vector.extract_strided_slice %12 {offsets = [144, 0], sizes = [1, 3], strides = [1, 1]} : vector<152x32xf32> to vector<1x3xf32>
      %31 = vector.broadcast %30 : vector<1x3xf32> to vector<2x3xf32>
      %32 = arith.addf %29, %31 : vector<2x3xf32>
      %c0_19 = arith.constant 0 : index
      %c0_20 = arith.constant 0 : index
      %33 = vector.load %arg4[%c0_19, %c0_20] : memref<2x3xf32, #tpu.memory_space<vmem>>, vector<2x3xf32>
      tpu.vector_store %arg4[%c0_19, %c0_20], %32 {strides = array<i32>} : memref<2x3xf32, #tpu.memory_space<vmem>>, vector<2x3xf32>,
    } else {
    }
    return
  }
  func.func @transform_0(%arg0: i32) -> (i32, i32) {
    %c0_i32 = arith.constant 0 : i32
    %c0_i32_0 = arith.constant 0 : i32
    return %c0_i32, %arg0 : i32, i32
  }
  func.func @transform_1(%arg0: i32) -> (i32, i32) {
    %c0_i32 = arith.constant 0 : i32
    %c0_i32_0 = arith.constant 0 : i32
    return %arg0, %c0_i32 : i32, i32
  }
  func.func @transform_2(%arg0: i32) -> (i32, i32) {
    %c0_i32 = arith.constant 0 : i32
    %c0_i32_0 = arith.constant 0 : i32
    %c0_i32_1 = arith.constant 0 : i32
    return %c0_i32, %c0_i32_0 : i32, i32
  }
  func.func @transform_3(%arg0: i32) -> (i32, i32) {
    %c0_i32 = arith.constant 0 : i32
    %c0_i32_0 = arith.constant 0 : i32
    %c0_i32_1 = arith.constant 0 : i32
    return %c0_i32, %c0_i32_0 : i32, i32
  }
}

</mosaic_0001>

<bundles_post_ra>
// kernel: gcn_forward.7
= control target key start
LH: loop header
LB: loop body
LE: loop exit
PB: predicated region body
PF: predicated region fallthrough
CT: control target
= control target key end

     0   :  { %v638_v2 = vmov 0.0   ;;  %v68_v10 = vlaneseq  ;;  %v639_v14 = vmov 1966171168   ;;  %s804_s0 = inlined_call_operand.vmem [shape: bf16[2,256], index: 0, kind: input, shape index: {}]   ;;  %s805_s1 = inlined_call_operand.vmem [shape: bf16[256,64], index: 1, kind: input, shape index: {}]   ;;  %s806_s2 = inlined_call_operand.vmem [shape: f32[152,32], index: 2, kind: input, shape index: {}]   ;;  %s807_s3 = inlined_call_operand.hbm [shape: f32[2,3], index: 3, kind: output, shape index: {}]  }
   0x1   :  { %v600_v0 = vld [vmem:[%s805_s1 + $0x78] sm:$0xff]   ;;  %555 = vmatprep.subr.mxu1 %v638_v2  ;;  %v602_v3 = vld [vmem:[%s805_s1 + $0x70] sm:$0xff]   ;;  %v604_v5 = vld [vmem:[%s805_s1 + $0x68] sm:$0xff]   ;;  %v66_v15 = vunpack.c.l.s4 %v639_v14 }
   0x2   :  { %v601_v1 = vld [vmem:[%s805_s1 + $0x38] sm:$0xff]   ;;  %514 = vmatprep.subr.bf16.mxu0 %v600_v0  ;;  %v603_v4 = vld [vmem:[%s805_s1 + $0x30] sm:$0xff]   ;;  %v605_v6 = vld [vmem:[%s805_s1 + $0x28] sm:$0xff]   ;;  %v699_v16 = vshrl.u32 %v68_v10, 7 }
   0x3   :  { %515 = vmatpush3.bf16.msra.mxu0 %v601_v1  ;;  %v606_v7 = vld [vmem:[%s805_s1 + $0x60] sm:$0xff]   ;;  %v608_v9 = vld [vmem:[%s805_s1 + $0x58] sm:$0xff]   ;;  %v610_v12 = vld [vmem:[%s805_s1 + $0x50] sm:$0xff]  }
   0x4   :  { %516 = vmatprep.subr.bf16.mxu0 %v602_v3  ;;  %v607_v8 = vld [vmem:[%s805_s1 + $0x20] sm:$0xff]   ;;  %v609_v11 = vld [vmem:[%s805_s1 + $0x18] sm:$0xff]  }
   0x5   :  { %v494_v13 = vld.sshfl [vmem:[%s804_s0] sm:$0x11 pattern:$0x75316420] }
   0x7   :  { %517 = vmatpush3.bf16.msra.mxu0 %v603_v4 }
   0x8   :  { %518 = vmatprep.subr.bf16.mxu0 %v604_v5 }
   0xb   :  { %519 = vmatpush3.bf16.msra.mxu0 %v605_v6 }
   0xc   :  { %520 = vmatprep.subr.bf16.mxu0 %v606_v7 }
   0xf   :  { %521 = vmatpush3.bf16.msra.mxu0 %v607_v8 }
  0x10   :  { %522 = vmatprep.subr.bf16.mxu0 %v608_v9 }
  0x11   :  { %8 = vsyncpa [#allocation4], 0  ;;  %v611_v17 = vld [vmem:[%s805_s1 + $0x10] sm:$0xff]   ;;  %v64_v18 = vcombine.high %v494_v13, %v494_v13  ;;  %v67_v19 = vunpack.c.0.s8 %v66_v15  ;;  %v612_v20 = vld [vmem:[%s805_s1 + $0x48] sm:$0xff]   ;;  %vm20_vm0 = vcmask 517120   ;;  %vm640_vm1 = vmmov 0  }
  0x12   :  { %v613_v22 = vld [vmem:[%s805_s1 + $0x8] sm:$0xff]   ;;  %v614_v24 = vld [vmem:[%s805_s1 + $0x40] sm:$0xff]   ;;  %21 = vst.msk [vmem:[#allocation2] sm:$0x3] %vm20_vm0, %v638_v2  ;;  %v230_v27 = vld [vmem:[%s806_s2 + $0x38] sm:$0xff]  ;;  %571 = vmatprep.mubr.msk.f32.mxu1 %vm640_vm1, %v638_v2  ;;  %vm247_vm2 = vcmask 523264  }
  0x13   :  { %523 = vmatpush3.bf16.msra.mxu0 %v609_v11  ;;  %v70_v21 = vsub.s32 %v67_v19, %v699_v16  ;;  %v615_v25 = vld [vmem:[%s805_s1] sm:$0xff]   ;;  %556 = vmatpush3.msra.mxu1 %v230_v27  ;;  %v229_v28 = vld [vmem:[%s806_s2 + $0x30] sm:$0xff]  ;;  %v228_v29 = vld [vmem:[%s806_s2 + $0x28] sm:$0xff]  ;;  %v245_v47 = vsub.s32 0, %v699_v16  ;;  %vm326_vm3 = vcmask 261120   ;;  %s641_s26 = smov [#allocation3]  }
  0x14   :  { %524 = vmatprep.subr.bf16.mxu0 %v610_v12  ;;  %557 = vmatprep.subr.mxu1 %v638_v2  ;;  %v227_v30 = vld [vmem:[%s806_s2 + $0x20] sm:$0xff]  ;;  %v226_v31 = vld [vmem:[%s806_s2 + $0x18] sm:$0xff]  ;;  %v225_v32 = vld [vmem:[%s806_s2 + $0x10] sm:$0xff]  ;;  %s486_s27 = sshll.u32 %s641_s26, 4  ;;  %vm478_vm4 = vcmask 17408   ;;  %s487_s27 = int_to_ptr.vmem [resolvable:$true] %s486_s27 }
  0x15   :  { %v78_v23 = vrot.slane %v64_v18, %v70_v21  ;;  %v71_v26 = vrot.slane %v494_v13, %v70_v21  ;;  %558 = vmatpush3.msra.mxu1 %v229_v28  ;;  %v224_v33 = vld [vmem:[%s806_s2 + $0x8] sm:$0xff]  ;;  %v223_v34 = vld [vmem:[%s806_s2] sm:$0xff]  ;;  %v234_v44 = vld [vmem:[%s806_s2 + $0x58] sm:$0xff]  ;;  %s616_s28 = scalar_lea.vmem %s487_s27, 32  ;;  %p621_p1 = scmp.lt.s32.totalorder %s487_s27, %s487_s27 }
  0x16   :  { %559 = vmatprep.subr.mxu1 %v638_v2  ;;  %v235_v42 = vld [vmem:[%s806_s2 + $0x60] sm:$0xff]  ;;  %v233_v45 = vld [vmem:[%s806_s2 + $0x50] sm:$0xff]  ;;  %v232_v46 = vld [vmem:[%s806_s2 + $0x48] sm:$0xff]  ;;  %p617_p0 = scmp.ne.s32.totalorder %s487_s27, %s616_s28  ;;  %p622_p2 = scmp.lt.s32.totalorder %s616_s28, %s616_s28 }
  0x17   :  { %525 = vmatpush3.bf16.msra.mxu0 %v611_v17  ;;  %209 = vmatprep.mubr.bf16.mxu0 %v78_v23  ;;  %v231_v48 = vld [vmem:[%s806_s2 + $0x40] sm:$0xff]  ;;  %v240_v54 = vld [vmem:[%s806_s2 + $0x88] sm:$0xff]  ;;  %v238_v56 = vld [vmem:[%s806_s2 + $0x78] sm:$0xff] }
  0x18   :  { %526 = vmatprep.subr.bf16.mxu0 %v612_v20  ;;  %560 = vmatpush3.msra.mxu1 %v228_v29  ;;  %v246_v49 = vrot.slane %v231_v48, %v245_v47  ;;  %v239_v55 = vld [vmem:[%s806_s2 + $0x80] sm:$0xff]  ;;  %v237_v57 = vld [vmem:[%s806_s2 + $0x70] sm:$0xff]  ;;  %v236_v58 = vld [vmem:[%s806_s2 + $0x68] sm:$0xff]  ;;  %p623_p3 = por %p622_p2, %p621_p1 }
  0x19   :  { %561 = vmatprep.subr.mxu1 %v638_v2  ;;  %v22_v36 = vld [vmem:[#allocation2] sm:$0x3]  ;;  %v325_v59 = vrot.slane %v236_v58, %v245_v47  ;;  %v241_v0 = vld [vmem:[%s806_s2 + $0x90] sm:$0xff] }
  0x1a   :  { %562 = vmatpush3.msra.mxu1 %v227_v30  ;;  %v404_v1 = vrot.slane %v241_v0, %v245_v47  ;;  %p624_p4 = pnand %p623_p3, %p617_p0 }
  0x1b   :  { %527 = vmatpush3.bf16.msra.mxu0 %v613_v22  ;;  %563 = vmatprep.subr.mxu1 %v638_v2 }
  0x1c   :  { %528 = vmatprep.subr.bf16.mxu0 %v614_v24  ;;  %564 = vmatpush3.msra.mxu1 %v226_v31 }
  0x1d   :  { %565 = vmatprep.subr.mxu1 %v638_v2 }
  0x1e   :  { %566 = vmatpush3.msra.mxu1 %v225_v32 }
  0x1f   :  { %529 = vmatpush3.bf16.msra.mxu0 %v615_v25  ;;  %567 = vmatprep.subr.mxu1 %v638_v2 }
  0x20   :  { %568 = vmatpush3.msra.mxu1 %v224_v33 }
  0x21   :  { %569 = vmatprep.subr.mxu1 %v638_v2 }
  0x22   :  { %210 = vmatmul.mubr.bf16.vlgmr.msra.gmra.mxu0 %v71_v26  ;;  %570 = vmatpush3.msra.mxu1 %v223_v34 }
  0x23   :  { %574 = vmatprep.subr.mxu1 %v638_v2 }
  0xe2   :  { %v530_v35 = vpop.f32.mrf.mxu0 }
  0xe4   :  { %v531_v37 = vpop.f32.mrf.mxu0 }
  0xe5   :  { %v532_v38 = vadd.f32 %v531_v37, %v530_v35 }
  0xe6   :  { %v533_v39 = vpop.f32.mrf.mxu0 }
  0xe7   :  { %v217_v40 = vadd.f32 %v532_v38, %v22_v36 }
  0xe8   :  { %v534_v41 = vpop.f32.mrf.mxu0 }
  0xe9   :  { %219 = vst.msk [vmem:[#allocation2] sm:$0x3] %vm20_vm0, %v217_v40 }
  0xf0   :  { %v242_v43 = vld [vmem:[#allocation2] sm:$0x3] }
  0xf1   :  { %572 = vmatmul.mubr.msk.f32.vlgmr.msra.gmra.mxu1 %vm247_vm2, %v242_v43 }
  0xf2   :  { %575 = vmatpush3.msra.mxu1 %v235_v42  ;;  %582 = vmatprep.mubr.msk.f32.mxu1 %vm640_vm1, %v638_v2 }
  0xf3   :  { %576 = vmatprep.subr.mxu1 %v638_v2 }
  0xf4   :  { %577 = vmatpush3.msra.mxu1 %v234_v44 }
  0xf5   :  { %578 = vmatprep.subr.mxu1 %v638_v2 }
  0xf6   :  { %579 = vmatpush3.msra.mxu1 %v233_v45 }
  0xf7   :  { %580 = vmatprep.subr.mxu1 %v638_v2 }
  0xf8   :  { %581 = vmatpush3.msra.mxu1 %v232_v46 }
  0xf9   :  { %585 = vmatprep.subr.mxu1 %v638_v2 }
 0x1b1   :  { %v317_v50 = vpop.f32.mrf.mxu1 }
 0x1b2   :  { %v318_v51 = vadd.f32 %v317_v50, %v246_v49 }
 0x1b3   :  { %v573_v52 = vpop.f32.mrf.mxu1 }
 0x1b4   :  { %v321_v53 = vmax.f32 %v318_v51, 0.0 }
 0x1b6   :  { %583 = vmatmul.mubr.msk.f32.vlgmr.msra.gmra.mxu1 %vm326_vm3, %v321_v53 }
 0x1b7   :  { %586 = vmatpush3.msra.mxu1 %v240_v54  ;;  %593 = vmatprep.mubr.msk.f32.mxu1 %vm640_vm1, %v638_v2 }
 0x1b8   :  { %587 = vmatprep.subr.mxu1 %v638_v2 }
 0x1b9   :  { %588 = vmatpush3.msra.mxu1 %v239_v55 }
 0x1ba   :  { %589 = vmatprep.subr.mxu1 %v638_v2 }
 0x1bb   :  { %590 = vmatpush3.msra.mxu1 %v238_v56 }
 0x1bc   :  { %591 = vmatprep.subr.mxu1 %v638_v2 }
 0x1bd   :  { %592 = vmatpush3.msra.mxu1 %v237_v57 }
 0x276   :  { %v396_v60 = vpop.f32.mrf.mxu1 }
 0x277   :  { %v397_v61 = vadd.f32 %v396_v60, %v325_v59 }
 0x278   :  { %v584_v62 = vpop.f32.mrf.mxu1 }
 0x279   :  { %v400_v63 = vmax.f32 %v397_v61, 0.0 }
 0x27b   :  { %594 = vmatmul.mubr.msk.f32.vlgmr.msra.gmra.mxu1 %vm326_vm3, %v400_v63 }
 0x33b   :  { %v474_v2 = vpop.f32.mrf.mxu1 }
 0x33c   :  { %v475_v3 = vadd.f32 %v474_v2, %v404_v1 }
 0x33d   :  { %v595_v4 = vpop.f32.mrf.mxu1 }
 0x33e   :  { %479 = vst.msk [vmem:[#allocation3] sm:$0x3] %vm478_vm4, %v475_v3 }
 0x33f   :  { %627 = shalt.err (!%p624_p4)
}
 0x340   :  { %489 = dma.vmem_to_hbm [thread:$0]  %s487_s27, 32, %s807_s3, [#allocation4]  }
 0x341   :  { %636 = dma.done.wait [#allocation4], 32  }
 0x342   :  { %637 = vsyncadd [#allocation4], 4294967264 }
 0x343   :  { %493 = vsyncpa [#allocation4], 1 }

// kernel: gcn_forward.4
= control target key start
LH: loop header
LB: loop body
LE: loop exit
PB: predicated region body
PF: predicated region fallthrough
CT: control target
= control target key end

     0   :  { %vm22_vm0 = vcmask 31744   ;;  %v1476_v43 = vmov 0.0   ;;  %vm740_vm1 = vcmask 1041408   ;;  %vm1065_vm2 = vcmask 257024   ;;  %s1894_s1 = inlined_call_operand.vmem [shape: bf16[256,4], index: 1, kind: input, shape index: {}]   ;;  %s1895_s0 = inlined_call_operand.vmem [shape: bf16[256,256], index: 0, kind: input, shape index: {}]   ;;  %s1896_s2 = inlined_call_operand.vmem [shape: bf16[4,32], index: 2, kind: input, shape index: {}]   ;;  %s1897_s3 = inlined_call_operand.vmem [shape: f32[1,32], index: 3, kind: input, shape index: {}]   ;;  %s1898_s4 = inlined_call_operand.vmem [shape: bf16[256,32], index: 4, kind: output, shape index: {}]  }
   0x1   :  { %v1412_v0 = vld [vmem:[%s1894_s1 + $0x78] sm:$0xff]   ;;  %v1414_v2 = vld [vmem:[%s1894_s1 + $0x70] sm:$0xff]   ;;  %v1416_v4 = vld [vmem:[%s1894_s1 + $0x68] sm:$0xff]   ;;  %23 = vst.msk [vmem:[#allocation2] sm:$0xff] %vm22_vm0, %v1476_v43 }
   0x2   :  { %v1413_v1 = vld [vmem:[%s1894_s1 + $0x38] sm:$0xff]   ;;  %1231 = vmatprep.subr.bf16.mxu0 %v1412_v0  ;;  %1394 = vmatprep.subr.bf16.mxu1 %v1412_v0  ;;  %v1415_v3 = vld [vmem:[%s1894_s1 + $0x30] sm:$0xff]   ;;  %v1417_v5 = vld [vmem:[%s1894_s1 + $0x28] sm:$0xff]   ;;  %24 = vst.msk [vmem:[#allocation2 + $0x8] sm:$0xff] %vm22_vm0, %v1476_v43 }
   0x3   :  { %1232 = vmatpush3.bf16.msra.mxu0 %v1413_v1  ;;  %1402 = vmatpush3.bf16.msra.mxu1 %v1413_v1  ;;  %v1418_v6 = vld [vmem:[%s1894_s1 + $0x60] sm:$0xff]   ;;  %v1420_v8 = vld [vmem:[%s1894_s1 + $0x58] sm:$0xff]   ;;  %v1422_v10 = vld [vmem:[%s1894_s1 + $0x50] sm:$0xff]   ;;  %25 = vst.msk [vmem:[#allocation2 + $0x10] sm:$0xff] %vm22_vm0, %v1476_v43 }
   0x4   :  { %1233 = vmatprep.subr.bf16.mxu0 %v1414_v2  ;;  %1395 = vmatprep.subr.bf16.mxu1 %v1414_v2  ;;  %v1419_v7 = vld [vmem:[%s1894_s1 + $0x20] sm:$0xff]   ;;  %v1421_v9 = vld [vmem:[%s1894_s1 + $0x18] sm:$0xff]   ;;  %v1423_v12 = vld [vmem:[%s1894_s1 + $0x10] sm:$0xff]   ;;  %26 = vst.msk [vmem:[#allocation2 + $0x18] sm:$0xff] %vm22_vm0, %v1476_v43 }
   0x5   :  { %v1430_v11 = vld [vmem:[%s1895_s0 + $0x4] ss:$8 sps:$4 sm:$0xff]   ;;  %v1428_v17 = vld [vmem:[%s1895_s0] ss:$8 sps:$4 sm:$0xff]   ;;  %v1431_v19 = vld [vmem:[%s1895_s0 + $0x14] ss:$8 sps:$4 sm:$0xff]  }
   0x6   :  { %439 = vmatprep.mubr.bf16.mxu0 %v1430_v11  ;;  %v1424_v13 = vld [vmem:[%s1894_s1 + $0x48] sm:$0xff]   ;;  %v1426_v15 = vld [vmem:[%s1894_s1 + $0x40] sm:$0xff]   ;;  %v1464_v21 = vld [vmem:[%s1895_s0 + $0xd4] ss:$8 sps:$4 sm:$0xff]   ;;  %27 = vst.msk [vmem:[#allocation2 + $0x20] sm:$0xff] %vm22_vm0, %v1476_v43 }
   0x7   :  { %1234 = vmatpush3.bf16.msra.mxu0 %v1415_v3  ;;  %1403 = vmatpush3.bf16.msra.mxu1 %v1415_v3  ;;  %v1425_v14 = vld [vmem:[%s1894_s1 + $0x8] sm:$0xff]   ;;  %v1427_v16 = vld [vmem:[%s1894_s1] sm:$0xff]   ;;  %v1433_v22 = vld [vmem:[%s1895_s0 + $0x10] ss:$8 sps:$4 sm:$0xff]   ;;  %28 = vst.msk [vmem:[#allocation2 + $0x28] sm:$0xff] %vm22_vm0, %v1476_v43 }
   0x8   :  { %1235 = vmatprep.subr.bf16.mxu0 %v1416_v4  ;;  %1396 = vmatprep.subr.bf16.mxu1 %v1416_v4  ;;  %v1460_v18 = vld [vmem:[%s1895_s0 + $0xc4] ss:$8 sps:$4 sm:$0xff]   ;;  %v1458_v20 = vld [vmem:[%s1895_s0 + $0xc0] ss:$8 sps:$4 sm:$0xff]   ;;  %v1466_v24 = vld [vmem:[%s1895_s0 + $0xd0] ss:$8 sps:$4 sm:$0xff]  }
   0x9   :  { %535 = vmatprep.mubr.bf16.mxu1 %v1460_v18  ;;  %v1434_v23 = vld [vmem:[%s1895_s0 + $0x24] ss:$8 sps:$4 sm:$0xff]   ;;  %v1436_v26 = vld [vmem:[%s1895_s0 + $0x20] ss:$8 sps:$4 sm:$0xff]   ;;  %v1437_v27 = vld [vmem:[%s1895_s0 + $0x34] ss:$8 sps:$4 sm:$0xff]  }
   0xa   :  { %v1470_v25 = vld [vmem:[%s1895_s0 + $0xe4] ss:$8 sps:$4 sm:$0xff]   ;;  %v1472_v28 = vld [vmem:[%s1895_s0 + $0xe0] ss:$8 sps:$4 sm:$0xff]   ;;  %v1473_v29 = vld [vmem:[%s1895_s0 + $0xf4] ss:$8 sps:$4 sm:$0xff]  }
   0xb   :  { %1236 = vmatpush3.bf16.msra.mxu0 %v1417_v5  ;;  %1404 = vmatpush3.bf16.msra.mxu1 %v1417_v5  ;;  %v1439_v30 = vld [vmem:[%s1895_s0 + $0x30] ss:$8 sps:$4 sm:$0xff]   ;;  %v1440_v31 = vld [vmem:[%s1895_s0 + $0x44] ss:$8 sps:$4 sm:$0xff]   ;;  %v1442_v33 = vld [vmem:[%s1895_s0 + $0x40] ss:$8 sps:$4 sm:$0xff]  }
   0xc   :  { %1237 = vmatprep.subr.bf16.mxu0 %v1418_v6  ;;  %1397 = vmatprep.subr.bf16.mxu1 %v1418_v6  ;;  %v1475_v32 = vld [vmem:[%s1895_s0 + $0xf0] ss:$8 sps:$4 sm:$0xff]   ;;  %v1443_v34 = vld [vmem:[%s1895_s0 + $0x54] ss:$8 sps:$4 sm:$0xff]   ;;  %v1446_v36 = vld [vmem:[%s1895_s0 + $0x64] ss:$8 sps:$4 sm:$0xff]  }
   0xd   :  { %v1445_v35 = vld [vmem:[%s1895_s0 + $0x50] ss:$8 sps:$4 sm:$0xff]   ;;  %v1448_v37 = vld [vmem:[%s1895_s0 + $0x60] ss:$8 sps:$4 sm:$0xff]   ;;  %v1449_v38 = vld [vmem:[%s1895_s0 + $0x74] ss:$8 sps:$4 sm:$0xff]  }
   0xe   :  { %v1451_v39 = vld [vmem:[%s1895_s0 + $0x70] ss:$8 sps:$4 sm:$0xff]   ;;  %v1452_v40 = vld [vmem:[%s1895_s0 + $0x84] ss:$8 sps:$4 sm:$0xff]   ;;  %v1454_v41 = vld [vmem:[%s1895_s0 + $0x80] ss:$8 sps:$4 sm:$0xff]  }
   0xf   :  { %1238 = vmatpush3.bf16.msra.mxu0 %v1419_v7  ;;  %1405 = vmatpush3.bf16.msra.mxu1 %v1419_v7  ;;  %v1455_v42 = vld [vmem:[%s1895_s0 + $0x94] ss:$8 sps:$4 sm:$0xff]   ;;  %29 = vst.msk [vmem:[#allocation2 + $0x30] sm:$0xff] %vm22_vm0, %v1476_v43  ;;  %30 = vst.msk [vmem:[#allocation2 + $0x38] sm:$0xff] %vm22_vm0, %v1476_v43  ;;  %v1457_v44 = vld [vmem:[%s1895_s0 + $0x90] ss:$8 sps:$4 sm:$0xff]  }
  0x10   :  { %1239 = vmatprep.subr.bf16.mxu0 %v1420_v8  ;;  %1398 = vmatprep.subr.bf16.mxu1 %v1420_v8  ;;  %31 = vst.msk [vmem:[#allocation2 + $0x40] sm:$0xff] %vm22_vm0, %v1476_v43  ;;  %32 = vst.msk [vmem:[#allocation2 + $0x48] sm:$0xff] %vm22_vm0, %v1476_v43  ;;  %v1461_v45 = vld [vmem:[%s1895_s0 + $0xa4] ss:$8 sps:$4 sm:$0xff]   ;;  %v1463_v46 = vld [vmem:[%s1895_s0 + $0xa0] ss:$8 sps:$4 sm:$0xff]  }
  0x11   :  { %33 = vst.msk [vmem:[#allocation2 + $0x50] sm:$0xff] %vm22_vm0, %v1476_v43  ;;  %34 = vst.msk [vmem:[#allocation2 + $0x58] sm:$0xff] %vm22_vm0, %v1476_v43  ;;  %v1467_v47 = vld [vmem:[%s1895_s0 + $0xb4] ss:$8 sps:$4 sm:$0xff]   ;;  %v1469_v48 = vld [vmem:[%s1895_s0 + $0xb0] ss:$8 sps:$4 sm:$0xff]  }
  0x12   :  { %35 = vst.msk [vmem:[#allocation2 + $0x60] sm:$0xff] %vm22_vm0, %v1476_v43  ;;  %36 = vst.msk [vmem:[#allocation2 + $0x68] sm:$0xff] %vm22_vm0, %v1476_v43  ;;  %v684_v49 = vld [vmem:[%s1896_s2] sm:$0x3]  ;;  %v56_v62 = vld [vmem:[#allocation2 + $0x8] sm:$0xff] }
  0x13   :  { %1240 = vmatpush3.bf16.msra.mxu0 %v1421_v9  ;;  %1406 = vmatpush3.bf16.msra.mxu1 %v1421_v9  ;;  %37 = vst.msk [vmem:[#allocation2 + $0x70] sm:$0xff] %vm22_vm0, %v1476_v43  ;;  %38 = vst.msk [vmem:[#allocation2 + $0x78] sm:$0xff] %vm22_vm0, %v1476_v43  ;;  %v742_v50 = vsel %vm740_vm1, %v684_v49, 0  ;;  %v55_v53 = vld [vmem:[#allocation2] sm:$0xff]  ;;  %v57_v8 = vld [vmem:[#allocation2 + $0x10] sm:$0xff] }
  0x14   :  { %1241 = vmatprep.subr.bf16.mxu0 %v1422_v10  ;;  %1399 = vmatprep.subr.bf16.mxu1 %v1422_v10  ;;  %39 = vst.msk [vmem:[#allocation2 + $0x80] sm:$0xff] %vm22_vm0, %v1476_v43  ;;  %40 = vst.msk [vmem:[#allocation2 + $0x88] sm:$0xff] %vm22_vm0, %v1476_v43  ;;  %v58_v18 = vld [vmem:[#allocation2 + $0x18] sm:$0xff] }
  0x15   :  { %41 = vst.msk [vmem:[#allocation2 + $0x90] sm:$0xff] %vm22_vm0, %v1476_v43  ;;  %42 = vst.msk [vmem:[#allocation2 + $0x98] sm:$0xff] %vm22_vm0, %v1476_v43 }
  0x16   :  { %43 = vst.msk [vmem:[#allocation2 + $0xa0] sm:$0xff] %vm22_vm0, %v1476_v43  ;;  %44 = vst.msk [vmem:[#allocation2 + $0xa8] sm:$0xff] %vm22_vm0, %v1476_v43 }
  0x17   :  { %1242 = vmatpush3.bf16.msra.mxu0 %v1423_v12  ;;  %1407 = vmatpush3.bf16.msra.mxu1 %v1423_v12  ;;  %45 = vst.msk [vmem:[#allocation2 + $0xb0] sm:$0xff] %vm22_vm0, %v1476_v43  ;;  %46 = vst.msk [vmem:[#allocation2 + $0xb8] sm:$0xff] %vm22_vm0, %v1476_v43 }
  0x18   :  { %1243 = vmatprep.subr.bf16.mxu0 %v1424_v13  ;;  %1400 = vmatprep.subr.bf16.mxu1 %v1424_v13  ;;  %47 = vst.msk [vmem:[#allocation2 + $0xc0] sm:$0xff] %vm22_vm0, %v1476_v43  ;;  %48 = vst.msk [vmem:[#allocation2 + $0xc8] sm:$0xff] %vm22_vm0, %v1476_v43 }
  0x19   :  { %49 = vst.msk [vmem:[#allocation2 + $0xd0] sm:$0xff] %vm22_vm0, %v1476_v43  ;;  %50 = vst.msk [vmem:[#allocation2 + $0xd8] sm:$0xff] %vm22_vm0, %v1476_v43 }
  0x1a   :  { %51 = vst.msk [vmem:[#allocation2 + $0xe0] sm:$0xff] %vm22_vm0, %v1476_v43  ;;  %52 = vst.msk [vmem:[#allocation2 + $0xe8] sm:$0xff] %vm22_vm0, %v1476_v43 }
  0x1b   :  { %1244 = vmatpush3.bf16.msra.mxu0 %v1425_v14  ;;  %1408 = vmatpush3.bf16.msra.mxu1 %v1425_v14  ;;  %53 = vst.msk [vmem:[#allocation2 + $0xf0] sm:$0xff] %vm22_vm0, %v1476_v43  ;;  %54 = vst.msk [vmem:[#allocation2 + $0xf8] sm:$0xff] %vm22_vm0, %v1476_v43 }
  0x1c   :  { %1245 = vmatprep.subr.bf16.mxu0 %v1426_v15  ;;  %1401 = vmatprep.subr.bf16.mxu1 %v1426_v15 }
  0x1f   :  { %1246 = vmatpush3.bf16.msra.mxu0 %v1427_v16  ;;  %1409 = vmatpush3.bf16.msra.mxu1 %v1427_v16  ;;  %v79_v56 = vld [vmem:[#allocation2 + $0xc0] sm:$0xff]  ;;  %v80_v2 = vld [vmem:[#allocation2 + $0xc8] sm:$0xff] }
  0x20   :  { %1410 = vmatprep.subr.msk.bf16.mxu1 %vm740_vm1, %v684_v49  ;;  %v81_v12 = vld [vmem:[#allocation2 + $0xd0] sm:$0xff] }
  0x22   :  { %440 = vmatmul.mubr.bf16.vlgmr.msra.gmra.mxu0 %v1428_v17  ;;  %536 = vmatmul.mubr.bf16.vlgmr.msra.gmra.mxu1 %v1458_v20 }
  0x23   :  { %447 = vmatprep.mubr.bf16.mxu0 %v1431_v19  ;;  %543 = vmatprep.mubr.bf16.mxu1 %v1464_v21 }
  0x24   :  { %1361 = vmatpush3.bf16.msra.mxu1 %v742_v50 }
  0x2a   :  { %448 = vmatmul.mubr.bf16.gmra.mxu0 %v1433_v22  ;;  %544 = vmatmul.mubr.bf16.gmra.mxu1 %v1466_v24  ;;  %v82_v22 = vld [vmem:[#allocation2 + $0xd8] sm:$0xff] }
  0x2b   :  { %455 = vmatprep.mubr.bf16.mxu0 %v1434_v23  ;;  %551 = vmatprep.mubr.bf16.mxu1 %v1470_v25 }
  0x32   :  { %456 = vmatmul.mubr.bf16.gmra.mxu0 %v1436_v26  ;;  %552 = vmatmul.mubr.bf16.gmra.mxu1 %v1472_v28  ;;  %v59_v28 = vld [vmem:[#allocation2 + $0x20] sm:$0xff] }
  0x33   :  { %463 = vmatprep.mubr.bf16.mxu0 %v1437_v27  ;;  %559 = vmatprep.mubr.bf16.mxu1 %v1473_v29 }
  0x3a   :  { %464 = vmatmul.mubr.bf16.gmra.mxu0 %v1439_v30  ;;  %560 = vmatmul.mubr.bf16.gmra.mxu1 %v1475_v32 }
  0x3b   :  { %471 = vmatprep.mubr.bf16.mxu0 %v1440_v31 }
  0x42   :  { %472 = vmatmul.mubr.bf16.gmra.mxu0 %v1442_v33 }
  0x43   :  { %479 = vmatprep.mubr.bf16.mxu0 %v1443_v34 }
  0x4a   :  { %480 = vmatmul.mubr.bf16.gmra.mxu0 %v1445_v35  ;;  %v83_v35 = vld [vmem:[#allocation2 + $0xe0] sm:$0xff] }
  0x4b   :  { %487 = vmatprep.mubr.bf16.mxu0 %v1446_v36 }
  0x52   :  { %488 = vmatmul.mubr.bf16.gmra.mxu0 %v1448_v37 }
  0x53   :  { %495 = vmatprep.mubr.bf16.mxu0 %v1449_v38 }
  0x5a   :  { %496 = vmatmul.mubr.bf16.gmra.mxu0 %v1451_v39 }
  0x5b   :  { %503 = vmatprep.mubr.bf16.mxu0 %v1452_v40 }
  0x62   :  { %504 = vmatmul.mubr.bf16.gmra.mxu0 %v1454_v41  ;;  %v60_v41 = vld [vmem:[#allocation2 + $0x28] sm:$0xff] }
  0x63   :  { %511 = vmatprep.mubr.bf16.mxu0 %v1455_v42 }
  0x6a   :  { %512 = vmatmul.mubr.bf16.gmra.mxu0 %v1457_v44 }
  0x6b   :  { %519 = vmatprep.mubr.bf16.mxu0 %v1461_v45  ;;  %v84_v45 = vld [vmem:[#allocation2 + $0xe8] sm:$0xff] }
  0x72   :  { %520 = vmatmul.mubr.bf16.gmra.mxu0 %v1463_v46 }
  0x73   :  { %527 = vmatprep.mubr.bf16.mxu0 %v1467_v47 }
  0x7a   :  { %528 = vmatmul.mubr.bf16.gmra.mxu0 %v1469_v48 }
  0xe2   :  { %v1247_v51 = vpop.f32.mrf.mxu0  ;;  %v1319_v52 = vpop.f32.mrf.mxu1 }
  0xe4   :  { %v1248_v54 = vpop.f32.mrf.mxu0  ;;  %v1320_v57 = vpop.f32.mrf.mxu1 }
  0xe5   :  { %v1249_v55 = vadd.f32 %v1248_v54, %v1247_v51  ;;  %v1321_v59 = vadd.f32 %v1320_v57, %v1319_v52  ;;  %v61_v51 = vld [vmem:[#allocation2 + $0x30] sm:$0xff] }
  0xe6   :  { %v1250_v58 = vpop.f32.mrf.mxu0  ;;  %v1322_v61 = vpop.f32.mrf.mxu1 }
  0xe7   :  { %v568_v60 = vadd.f32 %v1249_v55, %v55_v53  ;;  %v592_v0 = vadd.f32 %v1321_v59, %v79_v56 }
  0xe8   :  { %v1251_v63 = vpop.f32.mrf.mxu0  ;;  %v1323_v3 = vpop.f32.mrf.mxu1 }
  0xe9   :  { %601 = vst.msk [vmem:[#allocation2] sm:$0xff] %vm22_vm0, %v568_v60  ;;  %v1252_v1 = vadd.f32 %v1251_v63, %v1250_v58  ;;  %625 = vst.msk [vmem:[#allocation2 + $0xc0] sm:$0xff] %vm22_vm0, %v592_v0  ;;  %v1324_v5 = vadd.f32 %v1323_v3, %v1322_v61  ;;  %v85_v58 = vld [vmem:[#allocation2 + $0xf0] sm:$0xff]  ;;  %v62_v0 = vld [vmem:[#allocation2 + $0x38] sm:$0xff] }
  0xea   :  { %v1253_v4 = vpop.f32.mrf.mxu0  ;;  %v1325_v7 = vpop.f32.mrf.mxu1 }
  0xeb   :  { %v569_v6 = vadd.f32 %v1252_v1, %v56_v62  ;;  %v593_v10 = vadd.f32 %v1324_v5, %v80_v2 }
  0xec   :  { %v1254_v9 = vpop.f32.mrf.mxu0  ;;  %v1326_v13 = vpop.f32.mrf.mxu1 }
  0xed   :  { %602 = vst.msk [vmem:[#allocation2 + $0x8] sm:$0xff] %vm22_vm0, %v569_v6  ;;  %v1255_v11 = vadd.f32 %v1254_v9, %v1253_v4  ;;  %626 = vst.msk [vmem:[#allocation2 + $0xc8] sm:$0xff] %vm22_vm0, %v593_v10  ;;  %v1327_v15 = vadd.f32 %v1326_v13, %v1325_v7  ;;  %v86_v4 = vld [vmem:[#allocation2 + $0xf8] sm:$0xff]  ;;  %v63_v9 = vld [vmem:[#allocation2 + $0x40] sm:$0xff] }
  0xee   :  { %v1256_v14 = vpop.f32.mrf.mxu0  ;;  %v1328_v17 = vpop.f32.mrf.mxu1 }
  0xef   :  { %v570_v16 = vadd.f32 %v1255_v11, %v57_v8  ;;  %v594_v20 = vadd.f32 %v1327_v15, %v81_v12 }
  0xf0   :  { %v1257_v19 = vpop.f32.mrf.mxu0  ;;  %v1329_v23 = vpop.f32.mrf.mxu1  ;;  %v636_v30 = vld [vmem:[#allocation2] sm:$0xff] }
  0xf1   :  { %603 = vst.msk [vmem:[#allocation2 + $0x10] sm:$0xff] %vm22_vm0, %v570_v16  ;;  %v1258_v21 = vadd.f32 %v1257_v19, %v1256_v14  ;;  %627 = vst.msk [vmem:[#allocation2 + $0xd0] sm:$0xff] %vm22_vm0, %v594_v20  ;;  %v1330_v25 = vadd.f32 %v1329_v23, %v1328_v17  ;;  %v65_v23 = vld [vmem:[#allocation2 + $0x50] sm:$0xff] }
  0xf2   :  { %v1259_v24 = vpop.f32.mrf.mxu0  ;;  %v1331_v27 = vpop.f32.mrf.mxu1 }
  0xf3   :  { %v571_v26 = vadd.f32 %v1258_v21, %v58_v18  ;;  %v595_v32 = vadd.f32 %v1330_v25, %v82_v22  ;;  %v64_v18 = vld [vmem:[#allocation2 + $0x48] sm:$0xff] }
  0xf4   :  { %v1260_v29 = vpop.f32.mrf.mxu0  ;;  %v637_v31 = vld [vmem:[#allocation2 + $0x8] sm:$0xff]  ;;  %v1332_v36 = vpop.f32.mrf.mxu1 }
  0xf5   :  { %604 = vst.msk [vmem:[#allocation2 + $0x18] sm:$0xff] %vm22_vm0, %v571_v26  ;;  %v1261_v33 = vadd.f32 %v1260_v29, %v1259_v24  ;;  %v668_v34 = vpack.c.bf16 %v637_v31, %v636_v30  ;;  %628 = vst.msk [vmem:[#allocation2 + $0xd8] sm:$0xff] %vm22_vm0, %v595_v32  ;;  %v1333_v38 = vadd.f32 %v1332_v36, %v1331_v27  ;;  %v66_v31 = vld [vmem:[#allocation2 + $0x58] sm:$0xff]  ;;  %v67_v36 = vld [vmem:[#allocation2 + $0x60] sm:$0xff] }
  0xf6   :  { %v1262_v37 = vpop.f32.mrf.mxu0  ;;  %v1334_v40 = vpop.f32.mrf.mxu1 }
  0xf7   :  { %v572_v39 = vadd.f32 %v1261_v33, %v59_v28  ;;  %1362 = vmatprep.mubr.msk.bf16.mxu1 %vm22_vm0, %v668_v34  ;;  %v596_v43 = vadd.f32 %v1333_v38, %v83_v35 }
  0xf8   :  { %v1263_v42 = vpop.f32.mrf.mxu0  ;;  %v1335_v46 = vpop.f32.mrf.mxu1  ;;  %v638_v53 = vld [vmem:[#allocation2 + $0x10] sm:$0xff] }
  0xf9   :  { %605 = vst.msk [vmem:[#allocation2 + $0x20] sm:$0xff] %vm22_vm0, %v572_v39  ;;  %v1264_v44 = vadd.f32 %v1263_v42, %v1262_v37  ;;  %629 = vst.msk [vmem:[#allocation2 + $0xe0] sm:$0xff] %vm22_vm0, %v596_v43  ;;  %v1336_v48 = vadd.f32 %v1335_v46, %v1334_v40 }
  0xfa   :  { %v1265_v47 = vpop.f32.mrf.mxu0  ;;  %v1337_v50 = vpop.f32.mrf.mxu1 }
  0xfb   :  { %v573_v49 = vadd.f32 %v1264_v44, %v60_v41  ;;  %v597_v55 = vadd.f32 %v1336_v48, %v84_v45  ;;  %v68_v44 = vld [vmem:[#allocation2 + $0x68] sm:$0xff] }
  0xfc   :  { %v1266_v52 = vpop.f32.mrf.mxu0  ;;  %v639_v54 = vld [vmem:[#allocation2 + $0x18] sm:$0xff]  ;;  %v1338_v59 = vpop.f32.mrf.mxu1 }
  0xfd   :  { %606 = vst.msk [vmem:[#allocation2 + $0x28] sm:$0xff] %vm22_vm0, %v573_v49  ;;  %v1267_v56 = vadd.f32 %v1266_v52, %v1265_v47  ;;  %v669_v57 = vpack.c.bf16 %v639_v54, %v638_v53  ;;  %630 = vst.msk [vmem:[#allocation2 + $0xe8] sm:$0xff] %vm22_vm0, %v597_v55  ;;  %v1339_v61 = vadd.f32 %v1338_v59, %v1337_v50  ;;  %v69_v49 = vld [vmem:[#allocation2 + $0x70] sm:$0xff] }
  0xfe   :  { %v1268_v60 = vpop.f32.mrf.mxu0  ;;  %v1340_v63 = vpop.f32.mrf.mxu1 }
  0xff   :  { %v574_v62 = vadd.f32 %v1267_v56, %v61_v51  ;;  %1363 = vmatmul.mubr.msk.bf16.vlgmr.msra.gmra.mxu1 %vm22_vm0, %v669_v57  ;;  %v598_v2 = vadd.f32 %v1339_v61, %v85_v58  ;;  %v70_v57 = vld [vmem:[#allocation2 + $0x78] sm:$0xff] }
 0x100   :  { %v1269_v1 = vpop.f32.mrf.mxu0  ;;  %v1341_v5 = vpop.f32.mrf.mxu1  ;;  %v640_v11 = vld [vmem:[#allocation2 + $0x20] sm:$0xff] }
 0x101   :  { %607 = vst.msk [vmem:[#allocation2 + $0x30] sm:$0xff] %vm22_vm0, %v574_v62  ;;  %v1270_v3 = vadd.f32 %v1269_v1, %v1268_v60  ;;  %631 = vst.msk [vmem:[#allocation2 + $0xf0] sm:$0xff] %vm22_vm0, %v598_v2  ;;  %v1342_v7 = vadd.f32 %v1341_v5, %v1340_v63  ;;  %v71_v62 = vld [vmem:[#allocation2 + $0x80] sm:$0xff] }
 0x102   :  { %v1271_v6 = vpop.f32.mrf.mxu0 }
 0x103   :  { %v575_v8 = vadd.f32 %v1270_v3, %v62_v0  ;;  %v599_v13 = vadd.f32 %v1342_v7, %v86_v4 }
 0x104   :  { %v1272_v10 = vpop.f32.mrf.mxu0  ;;  %v641_v12 = vld [vmem:[#allocation2 + $0x28] sm:$0xff] }
 0x105   :  { %608 = vst.msk [vmem:[#allocation2 + $0x38] sm:$0xff] %vm22_vm0, %v575_v8  ;;  %v1273_v14 = vadd.f32 %v1272_v10, %v1271_v6  ;;  %v670_v15 = vpack.c.bf16 %v641_v12, %v640_v11  ;;  %632 = vst.msk [vmem:[#allocation2 + $0xf8] sm:$0xff] %vm22_vm0, %v599_v13  ;;  %v72_v6 = vld [vmem:[#allocation2 + $0x88] sm:$0xff]  ;;  %v73_v11 = vld [vmem:[#allocation2 + $0x90] sm:$0xff] }
 0x106   :  { %v1274_v16 = vpop.f32.mrf.mxu0 }
 0x107   :  { %v576_v17 = vadd.f32 %v1273_v14, %v63_v9  ;;  %1366 = vmatprep.mubr.msk.bf16.mxu1 %vm22_vm0, %v670_v15 }
 0x108   :  { %v1275_v19 = vpop.f32.mrf.mxu0  ;;  %v642_v25 = vld [vmem:[#allocation2 + $0x30] sm:$0xff] }
 0x109   :  { %609 = vst.msk [vmem:[#allocation2 + $0x40] sm:$0xff] %vm22_vm0, %v576_v17  ;;  %v1276_v20 = vadd.f32 %v1275_v19, %v1274_v16  ;;  %v74_v19 = vld [vmem:[#allocation2 + $0x98] sm:$0xff] }
 0x10a   :  { %v1277_v21 = vpop.f32.mrf.mxu0 }
 0x10b   :  { %v577_v22 = vadd.f32 %v1276_v20, %v64_v18 }
 0x10c   :  { %v1278_v24 = vpop.f32.mrf.mxu0  ;;  %v643_v26 = vld [vmem:[#allocation2 + $0x38] sm:$0xff] }
 0x10d   :  { %610 = vst.msk [vmem:[#allocation2 + $0x48] sm:$0xff] %vm22_vm0, %v577_v22  ;;  %v1279_v27 = vadd.f32 %v1278_v24, %v1277_v21  ;;  %v671_v28 = vpack.c.bf16 %v643_v26, %v642_v25  ;;  %v75_v24 = vld [vmem:[#allocation2 + $0xa0] sm:$0xff] }
 0x10e   :  { %v1280_v29 = vpop.f32.mrf.mxu0 }
 0x10f   :  { %v578_v30 = vadd.f32 %v1279_v27, %v65_v23  ;;  %1367 = vmatmul.mubr.msk.bf16.gmra.mxu1 %vm22_vm0, %v671_v28 }
 0x110   :  { %v1281_v32 = vpop.f32.mrf.mxu0  ;;  %v644_v38 = vld [vmem:[#allocation2 + $0x40] sm:$0xff] }
 0x111   :  { %611 = vst.msk [vmem:[#allocation2 + $0x50] sm:$0xff] %vm22_vm0, %v578_v30  ;;  %v1282_v33 = vadd.f32 %v1281_v32, %v1280_v29  ;;  %v76_v32 = vld [vmem:[#allocation2 + $0xa8] sm:$0xff] }
 0x112   :  { %v1283_v34 = vpop.f32.mrf.mxu0 }
 0x113   :  { %v579_v35 = vadd.f32 %v1282_v33, %v66_v31 }
 0x114   :  { %v1284_v37 = vpop.f32.mrf.mxu0  ;;  %v645_v39 = vld [vmem:[#allocation2 + $0x48] sm:$0xff] }
 0x115   :  { %612 = vst.msk [vmem:[#allocation2 + $0x58] sm:$0xff] %vm22_vm0, %v579_v35  ;;  %v1285_v40 = vadd.f32 %v1284_v37, %v1283_v34  ;;  %v672_v41 = vpack.c.bf16 %v645_v39, %v644_v38  ;;  %v77_v37 = vld [vmem:[#allocation2 + $0xb0] sm:$0xff] }
 0x116   :  { %v1286_v42 = vpop.f32.mrf.mxu0 }
 0x117   :  { %v580_v43 = vadd.f32 %v1285_v40, %v67_v36  ;;  %1370 = vmatprep.mubr.msk.bf16.mxu1 %vm22_vm0, %v672_v41 }
 0x118   :  { %v1287_v45 = vpop.f32.mrf.mxu0  ;;  %v646_v51 = vld [vmem:[#allocation2 + $0x50] sm:$0xff] }
 0x119   :  { %613 = vst.msk [vmem:[#allocation2 + $0x60] sm:$0xff] %vm22_vm0, %v580_v43  ;;  %v1288_v46 = vadd.f32 %v1287_v45, %v1286_v42  ;;  %v78_v45 = vld [vmem:[#allocation2 + $0xb8] sm:$0xff] }
 0x11a   :  { %v1289_v47 = vpop.f32.mrf.mxu0 }
 0x11b   :  { %v581_v48 = vadd.f32 %v1288_v46, %v68_v44 }
 0x11c   :  { %v1290_v50 = vpop.f32.mrf.mxu0  ;;  %v647_v52 = vld [vmem:[#allocation2 + $0x58] sm:$0xff] }
 0x11d   :  { %614 = vst.msk [vmem:[#allocation2 + $0x68] sm:$0xff] %vm22_vm0, %v581_v48  ;;  %v1291_v53 = vadd.f32 %v1290_v50, %v1289_v47  ;;  %v673_v54 = vpack.c.bf16 %v647_v52, %v646_v51  ;;  %v660_v52 = vld [vmem:[#allocation2 + $0xc0] sm:$0xff] }
 0x11e   :  { %v1292_v55 = vpop.f32.mrf.mxu0 }
 0x11f   :  { %v582_v56 = vadd.f32 %v1291_v53, %v69_v49  ;;  %1371 = vmatmul.mubr.msk.bf16.gmra.mxu1 %vm22_vm0, %v673_v54  ;;  %v661_v53 = vld [vmem:[#allocation2 + $0xc8] sm:$0xff] }
 0x120   :  { %v1293_v58 = vpop.f32.mrf.mxu0  ;;  %v648_v0 = vld [vmem:[#allocation2 + $0x60] sm:$0xff] }
 0x121   :  { %615 = vst.msk [vmem:[#allocation2 + $0x70] sm:$0xff] %vm22_vm0, %v582_v56  ;;  %v1294_v59 = vadd.f32 %v1293_v58, %v1292_v55  ;;  %v662_v58 = vld [vmem:[#allocation2 + $0xd0] sm:$0xff] }
 0x122   :  { %v1295_v60 = vpop.f32.mrf.mxu0 }
 0x123   :  { %v583_v61 = vadd.f32 %v1294_v59, %v70_v57  ;;  %v680_v57 = vpack.c.bf16 %v661_v53, %v660_v52  ;;  %v663_v59 = vld [vmem:[#allocation2 + $0xd8] sm:$0xff] }
 0x124   :  { %v1296_v63 = vpop.f32.mrf.mxu0  ;;  %v649_v1 = vld [vmem:[#allocation2 + $0x68] sm:$0xff] }
 0x125   :  { %616 = vst.msk [vmem:[#allocation2 + $0x78] sm:$0xff] %vm22_vm0, %v583_v61  ;;  %v1297_v2 = vadd.f32 %v1296_v63, %v1295_v60  ;;  %v674_v3 = vpack.c.bf16 %v649_v1, %v648_v0  ;;  %v664_v60 = vld [vmem:[#allocation2 + $0xe0] sm:$0xff]  ;;  %v665_v61 = vld [vmem:[#allocation2 + $0xe8] sm:$0xff]  ;;  %v666_v0 = vld [vmem:[#allocation2 + $0xf0] sm:$0xff] }
 0x126   :  { %v1298_v4 = vpop.f32.mrf.mxu0  ;;  %v682_v63 = vpack.c.bf16 %v665_v61, %v664_v60  ;;  %v667_v1 = vld [vmem:[#allocation2 + $0xf8] sm:$0xff] }
 0x127   :  { %v584_v5 = vadd.f32 %v1297_v2, %v71_v62  ;;  %1374 = vmatprep.mubr.msk.bf16.mxu1 %vm22_vm0, %v674_v3  ;;  %v681_v62 = vpack.c.bf16 %v663_v59, %v662_v58  ;;  %v683_v2 = vpack.c.bf16 %v667_v1, %v666_v0  ;;  %v1732_v3 = vld [vmem:[%s1897_s3] ss:$0 sm:$0xff] }
 0x128   :  { %v1299_v7 = vpop.f32.mrf.mxu0  ;;  %v650_v13 = vld [vmem:[#allocation2 + $0x70] sm:$0xff] }
 0x129   :  { %617 = vst.msk [vmem:[#allocation2 + $0x80] sm:$0xff] %vm22_vm0, %v584_v5  ;;  %v1300_v8 = vadd.f32 %v1299_v7, %v1298_v4 }
 0x12a   :  { %v1301_v9 = vpop.f32.mrf.mxu0 }
 0x12b   :  { %v585_v10 = vadd.f32 %v1300_v8, %v72_v6 }
 0x12c   :  { %v1302_v12 = vpop.f32.mrf.mxu0  ;;  %v651_v14 = vld [vmem:[#allocation2 + $0x78] sm:$0xff] }
 0x12d   :  { %618 = vst.msk [vmem:[#allocation2 + $0x88] sm:$0xff] %vm22_vm0, %v585_v10  ;;  %v1303_v15 = vadd.f32 %v1302_v12, %v1301_v9  ;;  %v675_v16 = vpack.c.bf16 %v651_v14, %v650_v13 }
 0x12e   :  { %v1304_v17 = vpop.f32.mrf.mxu0 }
 0x12f   :  { %v586_v18 = vadd.f32 %v1303_v15, %v73_v11  ;;  %1375 = vmatmul.mubr.msk.bf16.gmra.mxu1 %vm22_vm0, %v675_v16 }
 0x130   :  { %v1305_v20 = vpop.f32.mrf.mxu0  ;;  %v652_v26 = vld [vmem:[#allocation2 + $0x80] sm:$0xff] }
 0x131   :  { %619 = vst.msk [vmem:[#allocation2 + $0x90] sm:$0xff] %vm22_vm0, %v586_v18  ;;  %v1306_v21 = vadd.f32 %v1305_v20, %v1304_v17 }
 0x132   :  { %v1307_v22 = vpop.f32.mrf.mxu0 }
 0x133   :  { %v587_v23 = vadd.f32 %v1306_v21, %v74_v19 }
 0x134   :  { %v1308_v25 = vpop.f32.mrf.mxu0  ;;  %v653_v27 = vld [vmem:[#allocation2 + $0x88] sm:$0xff] }
 0x135   :  { %620 = vst.msk [vmem:[#allocation2 + $0x98] sm:$0xff] %vm22_vm0, %v587_v23  ;;  %v1309_v28 = vadd.f32 %v1308_v25, %v1307_v22  ;;  %v676_v29 = vpack.c.bf16 %v653_v27, %v652_v26 }
 0x136   :  { %v1310_v30 = vpop.f32.mrf.mxu0 }
 0x137   :  { %v588_v31 = vadd.f32 %v1309_v28, %v75_v24  ;;  %1378 = vmatprep.mubr.msk.bf16.mxu1 %vm22_vm0, %v676_v29 }
 0x138   :  { %v1311_v33 = vpop.f32.mrf.mxu0  ;;  %v654_v39 = vld [vmem:[#allocation2 + $0x90] sm:$0xff] }
 0x139   :  { %621 = vst.msk [vmem:[#allocation2 + $0xa0] sm:$0xff] %vm22_vm0, %v588_v31  ;;  %v1312_v34 = vadd.f32 %v1311_v33, %v1310_v30 }
 0x13a   :  { %v1313_v35 = vpop.f32.mrf.mxu0 }
 0x13b   :  { %v589_v36 = vadd.f32 %v1312_v34, %v76_v32 }
 0x13c   :  { %v1314_v38 = vpop.f32.mrf.mxu0  ;;  %v655_v40 = vld [vmem:[#allocation2 + $0x98] sm:$0xff] }
 0x13d   :  { %622 = vst.msk [vmem:[#allocation2 + $0xa8] sm:$0xff] %vm22_vm0, %v589_v36  ;;  %v1315_v41 = vadd.f32 %v1314_v38, %v1313_v35  ;;  %v677_v42 = vpack.c.bf16 %v655_v40, %v654_v39 }
 0x13e   :  { %v1316_v43 = vpop.f32.mrf.mxu0 }
 0x13f   :  { %v590_v44 = vadd.f32 %v1315_v41, %v77_v37  ;;  %1379 = vmatmul.mubr.msk.bf16.gmra.mxu1 %vm22_vm0, %v677_v42 }
 0x140   :  { %v1317_v46 = vpop.f32.mrf.mxu0  ;;  %v656_v49 = vld [vmem:[#allocation2 + $0xa0] sm:$0xff] }
 0x141   :  { %623 = vst.msk [vmem:[#allocation2 + $0xb0] sm:$0xff] %vm22_vm0, %v590_v44  ;;  %v1318_v47 = vadd.f32 %v1317_v46, %v1316_v43 }
 0x143   :  { %v591_v48 = vadd.f32 %v1318_v47, %v78_v45 }
 0x144   :  { %v657_v50 = vld [vmem:[#allocation2 + $0xa8] sm:$0xff] }
 0x145   :  { %624 = vst.msk [vmem:[#allocation2 + $0xb8] sm:$0xff] %vm22_vm0, %v591_v48  ;;  %v678_v51 = vpack.c.bf16 %v657_v50, %v656_v49 }
 0x147   :  { %1382 = vmatprep.mubr.msk.bf16.mxu1 %vm22_vm0, %v678_v51 }
 0x148   :  { %v658_v54 = vld [vmem:[#allocation2 + $0xb0] sm:$0xff] }
 0x14c   :  { %v659_v55 = vld [vmem:[#allocation2 + $0xb8] sm:$0xff] }
 0x14d   :  { %v679_v56 = vpack.c.bf16 %v659_v55, %v658_v54 }
 0x14f   :  { %1383 = vmatmul.mubr.msk.bf16.gmra.mxu1 %vm22_vm0, %v679_v56 }
 0x150   :  { %1386 = vmatprep.mubr.msk.bf16.mxu1 %vm22_vm0, %v680_v57 }
 0x157   :  { %1387 = vmatmul.mubr.msk.bf16.gmra.mxu1 %vm22_vm0, %v681_v62 }
 0x158   :  { %1390 = vmatprep.mubr.msk.bf16.mxu1 %vm22_vm0, %v682_v63 }
 0x15f   :  { %1391 = vmatmul.mubr.msk.bf16.gmra.mxu1 %vm22_vm0, %v683_v2 }
 0x1bf   :  { %v1364_v4 = vpop.f32.mrf.mxu1 }
 0x1c0   :  { %v787_v5 = vadd.f32 %v1364_v4, %v1732_v3 }
 0x1c1   :  { %v778_v6 = vpop.f32.mrf.mxu1 }
 0x1c2   :  { %v907_v7 = vmax.f32 %v787_v5, 0.0  ;;  %v779_v8 = vadd.f32 %v1732_v3, %v778_v6 }
 0x1c3   :  { %v1365_v9 = vpop.f32.mrf.mxu1 }
 0x1c4   :  { %v1201_v10 = vpack.c.bf16 %v907_v7, %v907_v7  ;;  %v905_v11 = vmax.f32 %v779_v8, 0.0  ;;  %v790_v12 = vadd.f32 %v1365_v9, %v1732_v3 }
 0x1c5   :  { %v781_v13 = vpop.f32.mrf.mxu1 }
 0x1c6   :  { %1068 = vst.msk [vmem:[%s1898_s4 + $0x8] sm:$0xf] %vm1065_vm2, %v1201_v10  ;;  %v1199_v14 = vpack.c.bf16 %v905_v11, %v905_v11  ;;  %v908_v15 = vmax.f32 %v790_v12, 0.0  ;;  %v782_v16 = vadd.f32 %v1732_v3, %v781_v13 }
 0x1c8   :  { %1066 = vst.msk [vmem:[%s1898_s4] sm:$0xf] %vm1065_vm2, %v1199_v14  ;;  %v1202_v17 = vpack.c.bf16 %v908_v15, %v908_v15  ;;  %v906_v18 = vmax.f32 %v782_v16, 0.0 }
 0x1ca   :  { %1069 = vst.msk [vmem:[%s1898_s4 + $0xc] sm:$0xf] %vm1065_vm2, %v1202_v17  ;;  %v1200_v19 = vpack.c.bf16 %v906_v18, %v906_v18 }
 0x1cc   :  { %1067 = vst.msk [vmem:[%s1898_s4 + $0x4] sm:$0xf] %vm1065_vm2, %v1200_v19 }
 0x1cf   :  { %v1368_v20 = vpop.f32.mrf.mxu1 }
 0x1d0   :  { %v803_v21 = vadd.f32 %v1368_v20, %v1732_v3 }
 0x1d1   :  { %v794_v22 = vpop.f32.mrf.mxu1 }
 0x1d2   :  { %v911_v23 = vmax.f32 %v803_v21, 0.0  ;;  %v795_v24 = vadd.f32 %v1732_v3, %v794_v22 }
 0x1d3   :  { %v1369_v25 = vpop.f32.mrf.mxu1 }
 0x1d4   :  { %v1205_v26 = vpack.c.bf16 %v911_v23, %v911_v23  ;;  %v909_v27 = vmax.f32 %v795_v24, 0.0  ;;  %v806_v28 = vadd.f32 %v1369_v25, %v1732_v3 }
 0x1d5   :  { %v797_v29 = vpop.f32.mrf.mxu1 }
 0x1d6   :  { %1072 = vst.msk [vmem:[%s1898_s4 + $0x18] sm:$0xf] %vm1065_vm2, %v1205_v26  ;;  %v1203_v30 = vpack.c.bf16 %v909_v27, %v909_v27  ;;  %v912_v31 = vmax.f32 %v806_v28, 0.0  ;;  %v798_v32 = vadd.f32 %v1732_v3, %v797_v29 }
 0x1d8   :  { %1070 = vst.msk [vmem:[%s1898_s4 + $0x10] sm:$0xf] %vm1065_vm2, %v1203_v30  ;;  %v1206_v33 = vpack.c.bf16 %v912_v31, %v912_v31  ;;  %v910_v34 = vmax.f32 %v798_v32, 0.0 }
 0x1da   :  { %1073 = vst.msk [vmem:[%s1898_s4 + $0x1c] sm:$0xf] %vm1065_vm2, %v1206_v33  ;;  %v1204_v35 = vpack.c.bf16 %v910_v34, %v910_v34 }
 0x1dc   :  { %1071 = vst.msk [vmem:[%s1898_s4 + $0x14] sm:$0xf] %vm1065_vm2, %v1204_v35 }
 0x1df   :  { %v1372_v36 = vpop.f32.mrf.mxu1 }
 0x1e0   :  { %v819_v37 = vadd.f32 %v1372_v36, %v1732_v3 }
 0x1e1   :  { %v810_v38 = vpop.f32.mrf.mxu1 }
 0x1e2   :  { %v915_v39 = vmax.f32 %v819_v37, 0.0  ;;  %v811_v40 = vadd.f32 %v1732_v3, %v810_v38 }
 0x1e3   :  { %v1373_v41 = vpop.f32.mrf.mxu1 }
 0x1e4   :  { %v1209_v42 = vpack.c.bf16 %v915_v39, %v915_v39  ;;  %v913_v43 = vmax.f32 %v811_v40, 0.0  ;;  %v822_v44 = vadd.f32 %v1373_v41, %v1732_v3 }
 0x1e5   :  { %v813_v45 = vpop.f32.mrf.mxu1 }
 0x1e6   :  { %1076 = vst.msk [vmem:[%s1898_s4 + $0x28] sm:$0xf] %vm1065_vm2, %v1209_v42  ;;  %v1207_v46 = vpack.c.bf16 %v913_v43, %v913_v43  ;;  %v916_v47 = vmax.f32 %v822_v44, 0.0  ;;  %v814_v48 = vadd.f32 %v1732_v3, %v813_v45 }
 0x1e8   :  { %1074 = vst.msk [vmem:[%s1898_s4 + $0x20] sm:$0xf] %vm1065_vm2, %v1207_v46  ;;  %v1210_v49 = vpack.c.bf16 %v916_v47, %v916_v47  ;;  %v914_v50 = vmax.f32 %v814_v48, 0.0 }
 0x1ea   :  { %1077 = vst.msk [vmem:[%s1898_s4 + $0x2c] sm:$0xf] %vm1065_vm2, %v1210_v49  ;;  %v1208_v51 = vpack.c.bf16 %v914_v50, %v914_v50 }
 0x1ec   :  { %1075 = vst.msk [vmem:[%s1898_s4 + $0x24] sm:$0xf] %vm1065_vm2, %v1208_v51 }
 0x1ef   :  { %v1376_v52 = vpop.f32.mrf.mxu1 }
 0x1f0   :  { %v835_v53 = vadd.f32 %v1376_v52, %v1732_v3 }
 0x1f1   :  { %v826_v54 = vpop.f32.mrf.mxu1 }
 0x1f2   :  { %v919_v55 = vmax.f32 %v835_v53, 0.0  ;;  %v827_v56 = vadd.f32 %v1732_v3, %v826_v54 }
 0x1f3   :  { %v1377_v57 = vpop.f32.mrf.mxu1 }
 0x1f4   :  { %v1213_v58 = vpack.c.bf16 %v919_v55, %v919_v55  ;;  %v917_v59 = vmax.f32 %v827_v56, 0.0  ;;  %v838_v60 = vadd.f32 %v1377_v57, %v1732_v3 }
 0x1f5   :  { %v829_v61 = vpop.f32.mrf.mxu1 }
 0x1f6   :  { %1080 = vst.msk [vmem:[%s1898_s4 + $0x38] sm:$0xf] %vm1065_vm2, %v1213_v58  ;;  %v1211_v62 = vpack.c.bf16 %v917_v59, %v917_v59  ;;  %v920_v63 = vmax.f32 %v838_v60, 0.0  ;;  %v830_v0 = vadd.f32 %v1732_v3, %v829_v61 }
 0x1f8   :  { %1078 = vst.msk [vmem:[%s1898_s4 + $0x30] sm:$0xf] %vm1065_vm2, %v1211_v62  ;;  %v1214_v1 = vpack.c.bf16 %v920_v63, %v920_v63  ;;  %v918_v2 = vmax.f32 %v830_v0, 0.0 }
 0x1fa   :  { %1081 = vst.msk [vmem:[%s1898_s4 + $0x3c] sm:$0xf] %vm1065_vm2, %v1214_v1  ;;  %v1212_v4 = vpack.c.bf16 %v918_v2, %v918_v2 }
 0x1fc   :  { %1079 = vst.msk [vmem:[%s1898_s4 + $0x34] sm:$0xf] %vm1065_vm2, %v1212_v4 }
 0x1ff   :  { %v1380_v5 = vpop.f32.mrf.mxu1 }
 0x200   :  { %v851_v6 = vadd.f32 %v1380_v5, %v1732_v3 }
 0x201   :  { %v842_v7 = vpop.f32.mrf.mxu1 }
 0x202   :  { %v923_v8 = vmax.f32 %v851_v6, 0.0  ;;  %v843_v9 = vadd.f32 %v1732_v3, %v842_v7 }
 0x203   :  { %v1381_v10 = vpop.f32.mrf.mxu1 }
 0x204   :  { %v1217_v11 = vpack.c.bf16 %v923_v8, %v923_v8  ;;  %v921_v12 = vmax.f32 %v843_v9, 0.0  ;;  %v854_v13 = vadd.f32 %v1381_v10, %v1732_v3 }
 0x205   :  { %v845_v14 = vpop.f32.mrf.mxu1 }
 0x206   :  { %1084 = vst.msk [vmem:[%s1898_s4 + $0x48] sm:$0xf] %vm1065_vm2, %v1217_v11  ;;  %v1215_v15 = vpack.c.bf16 %v921_v12, %v921_v12  ;;  %v924_v16 = vmax.f32 %v854_v13, 0.0  ;;  %v846_v17 = vadd.f32 %v1732_v3, %v845_v14 }
 0x208   :  { %1082 = vst.msk [vmem:[%s1898_s4 + $0x40] sm:$0xf] %vm1065_vm2, %v1215_v15  ;;  %v1218_v18 = vpack.c.bf16 %v924_v16, %v924_v16  ;;  %v922_v19 = vmax.f32 %v846_v17, 0.0 }
 0x20a   :  { %1085 = vst.msk [vmem:[%s1898_s4 + $0x4c] sm:$0xf] %vm1065_vm2, %v1218_v18  ;;  %v1216_v20 = vpack.c.bf16 %v922_v19, %v922_v19 }
 0x20c   :  { %1083 = vst.msk [vmem:[%s1898_s4 + $0x44] sm:$0xf] %vm1065_vm2, %v1216_v20 }
 0x20f   :  { %v1384_v21 = vpop.f32.mrf.mxu1 }
 0x210   :  { %v867_v22 = vadd.f32 %v1384_v21, %v1732_v3 }
 0x211   :  { %v858_v23 = vpop.f32.mrf.mxu1 }
 0x212   :  { %v927_v24 = vmax.f32 %v867_v22, 0.0  ;;  %v859_v25 = vadd.f32 %v1732_v3, %v858_v23 }
 0x213   :  { %v1385_v26 = vpop.f32.mrf.mxu1 }
 0x214   :  { %v1221_v27 = vpack.c.bf16 %v927_v24, %v927_v24  ;;  %v925_v28 = vmax.f32 %v859_v25, 0.0  ;;  %v870_v29 = vadd.f32 %v1385_v26, %v1732_v3 }
 0x215   :  { %v861_v30 = vpop.f32.mrf.mxu1 }
 0x216   :  { %1088 = vst.msk [vmem:[%s1898_s4 + $0x58] sm:$0xf] %vm1065_vm2, %v1221_v27  ;;  %v1219_v31 = vpack.c.bf16 %v925_v28, %v925_v28  ;;  %v928_v32 = vmax.f32 %v870_v29, 0.0  ;;  %v862_v33 = vadd.f32 %v1732_v3, %v861_v30 }
 0x217   :  { %v1388_v34 = vpop.f32.mrf.mxu1 }
 0x218   :  { %1086 = vst.msk [vmem:[%s1898_s4 + $0x50] sm:$0xf] %vm1065_vm2, %v1219_v31  ;;  %v1222_v35 = vpack.c.bf16 %v928_v32, %v928_v32  ;;  %v926_v36 = vmax.f32 %v862_v33, 0.0  ;;  %v883_v37 = vadd.f32 %v1388_v34, %v1732_v3 }
 0x219   :  { %v874_v38 = vpop.f32.mrf.mxu1 }
 0x21a   :  { %1089 = vst.msk [vmem:[%s1898_s4 + $0x5c] sm:$0xf] %vm1065_vm2, %v1222_v35  ;;  %v1220_v39 = vpack.c.bf16 %v926_v36, %v926_v36  ;;  %v931_v40 = vmax.f32 %v883_v37, 0.0  ;;  %v875_v41 = vadd.f32 %v1732_v3, %v874_v38 }
 0x21b   :  { %v1389_v42 = vpop.f32.mrf.mxu1 }
 0x21c   :  { %1087 = vst.msk [vmem:[%s1898_s4 + $0x54] sm:$0xf] %vm1065_vm2, %v1220_v39  ;;  %v1225_v43 = vpack.c.bf16 %v931_v40, %v931_v40  ;;  %v929_v44 = vmax.f32 %v875_v41, 0.0  ;;  %v886_v45 = vadd.f32 %v1389_v42, %v1732_v3 }
 0x21d   :  { %v877_v46 = vpop.f32.mrf.mxu1 }
 0x21e   :  { %1092 = vst.msk [vmem:[%s1898_s4 + $0x68] sm:$0xf] %vm1065_vm2, %v1225_v43  ;;  %v1223_v47 = vpack.c.bf16 %v929_v44, %v929_v44  ;;  %v932_v48 = vmax.f32 %v886_v45, 0.0  ;;  %v878_v49 = vadd.f32 %v1732_v3, %v877_v46 }
 0x21f   :  { %v1392_v50 = vpop.f32.mrf.mxu1 }
 0x220   :  { %1090 = vst.msk [vmem:[%s1898_s4 + $0x60] sm:$0xf] %vm1065_vm2, %v1223_v47  ;;  %v1226_v51 = vpack.c.bf16 %v932_v48, %v932_v48  ;;  %v930_v52 = vmax.f32 %v878_v49, 0.0  ;;  %v899_v53 = vadd.f32 %v1392_v50, %v1732_v3 }
 0x221   :  { %v890_v54 = vpop.f32.mrf.mxu1 }
 0x222   :  { %1093 = vst.msk [vmem:[%s1898_s4 + $0x6c] sm:$0xf] %vm1065_vm2, %v1226_v51  ;;  %v1224_v55 = vpack.c.bf16 %v930_v52, %v930_v52  ;;  %v935_v56 = vmax.f32 %v899_v53, 0.0  ;;  %v891_v57 = vadd.f32 %v1732_v3, %v890_v54 }
 0x223   :  { %v1393_v58 = vpop.f32.mrf.mxu1 }
 0x224   :  { %1091 = vst.msk [vmem:[%s1898_s4 + $0x64] sm:$0xf] %vm1065_vm2, %v1224_v55  ;;  %v1229_v59 = vpack.c.bf16 %v935_v56, %v935_v56  ;;  %v933_v60 = vmax.f32 %v891_v57, 0.0  ;;  %v902_v61 = vadd.f32 %v1393_v58, %v1732_v3 }
 0x225   :  { %v893_v62 = vpop.f32.mrf.mxu1 }
 0x226   :  { %1096 = vst.msk [vmem:[%s1898_s4 + $0x78] sm:$0xf] %vm1065_vm2, %v1229_v59  ;;  %v1227_v63 = vpack.c.bf16 %v933_v60, %v933_v60  ;;  %v936_v0 = vmax.f32 %v902_v61, 0.0  ;;  %v894_v1 = vadd.f32 %v1732_v3, %v893_v62 }
 0x228   :  { %1094 = vst.msk [vmem:[%s1898_s4 + $0x70] sm:$0xf] %vm1065_vm2, %v1227_v63  ;;  %v1230_v2 = vpack.c.bf16 %v936_v0, %v936_v0  ;;  %v934_v4 = vmax.f32 %v894_v1, 0.0 }
 0x22a   :  { %1097 = vst.msk [vmem:[%s1898_s4 + $0x7c] sm:$0xf] %vm1065_vm2, %v1230_v2  ;;  %v1228_v5 = vpack.c.bf16 %v934_v4, %v934_v4 }
 0x22c   :  { %1095 = vst.msk [vmem:[%s1898_s4 + $0x74] sm:$0xf] %vm1065_vm2, %v1228_v5 }

// kernel: gcn_forward.6
= control target key start
LH: loop header
LB: loop body
LE: loop exit
PB: predicated region body
PF: predicated region fallthrough
CT: control target
= control target key end

     0   :  { %vm22_vm0 = vcmask 392192   ;;  %v1474_v43 = vmov 0.0   ;;  %vm1052_vm1 = vcmask 519168   ;;  %s1898_s1 = inlined_call_operand.vmem [shape: bf16[256,48], index: 1, kind: input, shape index: {}]   ;;  %s1899_s0 = inlined_call_operand.vmem [shape: bf16[256,256], index: 0, kind: input, shape index: {}]   ;;  %s1900_s2 = inlined_call_operand.vmem [shape: bf16[48,64], index: 2, kind: input, shape index: {}]   ;;  %s1901_s3 = inlined_call_operand.vmem [shape: f32[1,64], index: 3, kind: input, shape index: {}]   ;;  %s1902_s4 = inlined_call_operand.vmem [shape: bf16[256,64], index: 4, kind: output, shape index: {}]  }
   0x1   :  { %v1407_v0 = vld [vmem:[%s1898_s1 + $0x78] sm:$0xff]   ;;  %v1409_v2 = vld [vmem:[%s1898_s1 + $0x70] sm:$0xff]   ;;  %v1411_v4 = vld [vmem:[%s1898_s1 + $0x68] sm:$0xff]   ;;  %23 = vst.msk [vmem:[#allocation2] sm:$0xff] %vm22_vm0, %v1474_v43 }
   0x2   :  { %v1408_v1 = vld [vmem:[%s1898_s1 + $0x38] sm:$0xff]   ;;  %1221 = vmatprep.subr.bf16.mxu0 %v1407_v0  ;;  %1390 = vmatprep.subr.bf16.mxu1 %v1407_v0  ;;  %v1410_v3 = vld [vmem:[%s1898_s1 + $0x30] sm:$0xff]   ;;  %v1412_v5 = vld [vmem:[%s1898_s1 + $0x28] sm:$0xff]   ;;  %24 = vst.msk [vmem:[#allocation2 + $0x8] sm:$0xff] %vm22_vm0, %v1474_v43 }
   0x3   :  { %1222 = vmatpush3.bf16.msra.mxu0 %v1408_v1  ;;  %1398 = vmatpush3.bf16.msra.mxu1 %v1408_v1  ;;  %v1413_v6 = vld [vmem:[%s1898_s1 + $0x60] sm:$0xff]   ;;  %v1415_v8 = vld [vmem:[%s1898_s1 + $0x58] sm:$0xff]   ;;  %v1417_v10 = vld [vmem:[%s1898_s1 + $0x50] sm:$0xff]   ;;  %25 = vst.msk [vmem:[#allocation2 + $0x10] sm:$0xff] %vm22_vm0, %v1474_v43 }
   0x4   :  { %1223 = vmatprep.subr.bf16.mxu0 %v1409_v2  ;;  %1391 = vmatprep.subr.bf16.mxu1 %v1409_v2  ;;  %v1414_v7 = vld [vmem:[%s1898_s1 + $0x20] sm:$0xff]   ;;  %v1416_v9 = vld [vmem:[%s1898_s1 + $0x18] sm:$0xff]   ;;  %v1418_v12 = vld [vmem:[%s1898_s1 + $0x10] sm:$0xff]   ;;  %26 = vst.msk [vmem:[#allocation2 + $0x18] sm:$0xff] %vm22_vm0, %v1474_v43 }
   0x5   :  { %v1425_v11 = vld [vmem:[%s1899_s0 + $0x4] ss:$8 sps:$4 sm:$0xff]   ;;  %v1423_v17 = vld [vmem:[%s1899_s0] ss:$8 sps:$4 sm:$0xff]   ;;  %v1426_v19 = vld [vmem:[%s1899_s0 + $0x14] ss:$8 sps:$4 sm:$0xff]  }
   0x6   :  { %439 = vmatprep.mubr.bf16.mxu0 %v1425_v11  ;;  %v1419_v13 = vld [vmem:[%s1898_s1 + $0x48] sm:$0xff]   ;;  %v1421_v15 = vld [vmem:[%s1898_s1 + $0x40] sm:$0xff]   ;;  %v1459_v21 = vld [vmem:[%s1899_s0 + $0xd4] ss:$8 sps:$4 sm:$0xff]   ;;  %27 = vst.msk [vmem:[#allocation2 + $0x20] sm:$0xff] %vm22_vm0, %v1474_v43 }
   0x7   :  { %1224 = vmatpush3.bf16.msra.mxu0 %v1410_v3  ;;  %1399 = vmatpush3.bf16.msra.mxu1 %v1410_v3  ;;  %v1420_v14 = vld [vmem:[%s1898_s1 + $0x8] sm:$0xff]   ;;  %v1422_v16 = vld [vmem:[%s1898_s1] sm:$0xff]   ;;  %v1428_v22 = vld [vmem:[%s1899_s0 + $0x10] ss:$8 sps:$4 sm:$0xff]   ;;  %28 = vst.msk [vmem:[#allocation2 + $0x28] sm:$0xff] %vm22_vm0, %v1474_v43 }
   0x8   :  { %1225 = vmatprep.subr.bf16.mxu0 %v1411_v4  ;;  %1392 = vmatprep.subr.bf16.mxu1 %v1411_v4  ;;  %v1455_v18 = vld [vmem:[%s1899_s0 + $0xc4] ss:$8 sps:$4 sm:$0xff]   ;;  %v1453_v20 = vld [vmem:[%s1899_s0 + $0xc0] ss:$8 sps:$4 sm:$0xff]   ;;  %v1461_v24 = vld [vmem:[%s1899_s0 + $0xd0] ss:$8 sps:$4 sm:$0xff]  }
   0x9   :  { %535 = vmatprep.mubr.bf16.mxu1 %v1455_v18  ;;  %v1429_v23 = vld [vmem:[%s1899_s0 + $0x24] ss:$8 sps:$4 sm:$0xff]   ;;  %v1431_v26 = vld [vmem:[%s1899_s0 + $0x20] ss:$8 sps:$4 sm:$0xff]   ;;  %v1432_v27 = vld [vmem:[%s1899_s0 + $0x34] ss:$8 sps:$4 sm:$0xff]  }
   0xa   :  { %v1465_v25 = vld [vmem:[%s1899_s0 + $0xe4] ss:$8 sps:$4 sm:$0xff]   ;;  %v1467_v28 = vld [vmem:[%s1899_s0 + $0xe0] ss:$8 sps:$4 sm:$0xff]   ;;  %v1468_v29 = vld [vmem:[%s1899_s0 + $0xf4] ss:$8 sps:$4 sm:$0xff]  }
   0xb   :  { %1226 = vmatpush3.bf16.msra.mxu0 %v1412_v5  ;;  %1400 = vmatpush3.bf16.msra.mxu1 %v1412_v5  ;;  %v1434_v30 = vld [vmem:[%s1899_s0 + $0x30] ss:$8 sps:$4 sm:$0xff]   ;;  %v1435_v31 = vld [vmem:[%s1899_s0 + $0x44] ss:$8 sps:$4 sm:$0xff]   ;;  %v1437_v33 = vld [vmem:[%s1899_s0 + $0x40] ss:$8 sps:$4 sm:$0xff]  }
   0xc   :  { %1227 = vmatprep.subr.bf16.mxu0 %v1413_v6  ;;  %1393 = vmatprep.subr.bf16.mxu1 %v1413_v6  ;;  %v1470_v32 = vld [vmem:[%s1899_s0 + $0xf0] ss:$8 sps:$4 sm:$0xff]   ;;  %v1438_v34 = vld [vmem:[%s1899_s0 + $0x54] ss:$8 sps:$4 sm:$0xff]   ;;  %v1441_v36 = vld [vmem:[%s1899_s0 + $0x64] ss:$8 sps:$4 sm:$0xff]  }
   0xd   :  { %v1440_v35 = vld [vmem:[%s1899_s0 + $0x50] ss:$8 sps:$4 sm:$0xff]   ;;  %v1443_v37 = vld [vmem:[%s1899_s0 + $0x60] ss:$8 sps:$4 sm:$0xff]   ;;  %v1444_v38 = vld [vmem:[%s1899_s0 + $0x74] ss:$8 sps:$4 sm:$0xff]  }
   0xe   :  { %v1446_v39 = vld [vmem:[%s1899_s0 + $0x70] ss:$8 sps:$4 sm:$0xff]   ;;  %v1447_v40 = vld [vmem:[%s1899_s0 + $0x84] ss:$8 sps:$4 sm:$0xff]   ;;  %v1449_v41 = vld [vmem:[%s1899_s0 + $0x80] ss:$8 sps:$4 sm:$0xff]  }
   0xf   :  { %1228 = vmatpush3.bf16.msra.mxu0 %v1414_v7  ;;  %1401 = vmatpush3.bf16.msra.mxu1 %v1414_v7  ;;  %v1450_v42 = vld [vmem:[%s1899_s0 + $0x94] ss:$8 sps:$4 sm:$0xff]   ;;  %29 = vst.msk [vmem:[#allocation2 + $0x30] sm:$0xff] %vm22_vm0, %v1474_v43  ;;  %30 = vst.msk [vmem:[#allocation2 + $0x38] sm:$0xff] %vm22_vm0, %v1474_v43  ;;  %v1452_v44 = vld [vmem:[%s1899_s0 + $0x90] ss:$8 sps:$4 sm:$0xff]  }
  0x10   :  { %1229 = vmatprep.subr.bf16.mxu0 %v1415_v8  ;;  %1394 = vmatprep.subr.bf16.mxu1 %v1415_v8  ;;  %31 = vst.msk [vmem:[#allocation2 + $0x40] sm:$0xff] %vm22_vm0, %v1474_v43  ;;  %32 = vst.msk [vmem:[#allocation2 + $0x48] sm:$0xff] %vm22_vm0, %v1474_v43  ;;  %v1456_v45 = vld [vmem:[%s1899_s0 + $0xa4] ss:$8 sps:$4 sm:$0xff]   ;;  %v1458_v46 = vld [vmem:[%s1899_s0 + $0xa0] ss:$8 sps:$4 sm:$0xff]  }
  0x11   :  { %33 = vst.msk [vmem:[#allocation2 + $0x50] sm:$0xff] %vm22_vm0, %v1474_v43  ;;  %34 = vst.msk [vmem:[#allocation2 + $0x58] sm:$0xff] %vm22_vm0, %v1474_v43  ;;  %v1462_v47 = vld [vmem:[%s1899_s0 + $0xb4] ss:$8 sps:$4 sm:$0xff]   ;;  %v1472_v49 = vld [vmem:[%s1900_s2 + $0x8] sm:$0xff]  }
  0x12   :  { %35 = vst.msk [vmem:[#allocation2 + $0x60] sm:$0xff] %vm22_vm0, %v1474_v43  ;;  %36 = vst.msk [vmem:[#allocation2 + $0x68] sm:$0xff] %vm22_vm0, %v1474_v43  ;;  %v1471_v48 = vld [vmem:[%s1900_s2 + $0x10] sm:$0xff]   ;;  %v1473_v51 = vld [vmem:[%s1900_s2] sm:$0xff]  }
  0x13   :  { %1230 = vmatpush3.bf16.msra.mxu0 %v1416_v9  ;;  %1402 = vmatpush3.bf16.msra.mxu1 %v1416_v9  ;;  %37 = vst.msk [vmem:[#allocation2 + $0x70] sm:$0xff] %vm22_vm0, %v1474_v43  ;;  %38 = vst.msk [vmem:[#allocation2 + $0x78] sm:$0xff] %vm22_vm0, %v1474_v43  ;;  %v1464_v50 = vld [vmem:[%s1899_s0 + $0xb0] ss:$8 sps:$4 sm:$0xff]   ;;  %v55_v54 = vld [vmem:[#allocation2] sm:$0xff] }
  0x14   :  { %1231 = vmatprep.subr.bf16.mxu0 %v1417_v10  ;;  %1395 = vmatprep.subr.bf16.mxu1 %v1417_v10  ;;  %39 = vst.msk [vmem:[#allocation2 + $0x80] sm:$0xff] %vm22_vm0, %v1474_v43  ;;  %40 = vst.msk [vmem:[#allocation2 + $0x88] sm:$0xff] %vm22_vm0, %v1474_v43  ;;  %v56_v63 = vld [vmem:[#allocation2 + $0x8] sm:$0xff]  ;;  %v57_v9 = vld [vmem:[#allocation2 + $0x10] sm:$0xff] }
  0x15   :  { %41 = vst.msk [vmem:[#allocation2 + $0x90] sm:$0xff] %vm22_vm0, %v1474_v43  ;;  %42 = vst.msk [vmem:[#allocation2 + $0x98] sm:$0xff] %vm22_vm0, %v1474_v43 }
  0x16   :  { %43 = vst.msk [vmem:[#allocation2 + $0xa0] sm:$0xff] %vm22_vm0, %v1474_v43  ;;  %44 = vst.msk [vmem:[#allocation2 + $0xa8] sm:$0xff] %vm22_vm0, %v1474_v43 }
  0x17   :  { %1232 = vmatpush3.bf16.msra.mxu0 %v1418_v12  ;;  %1403 = vmatpush3.bf16.msra.mxu1 %v1418_v12  ;;  %45 = vst.msk [vmem:[#allocation2 + $0xb0] sm:$0xff] %vm22_vm0, %v1474_v43  ;;  %46 = vst.msk [vmem:[#allocation2 + $0xb8] sm:$0xff] %vm22_vm0, %v1474_v43 }
  0x18   :  { %1233 = vmatprep.subr.bf16.mxu0 %v1419_v13  ;;  %1396 = vmatprep.subr.bf16.mxu1 %v1419_v13  ;;  %47 = vst.msk [vmem:[#allocation2 + $0xc0] sm:$0xff] %vm22_vm0, %v1474_v43  ;;  %48 = vst.msk [vmem:[#allocation2 + $0xc8] sm:$0xff] %vm22_vm0, %v1474_v43 }
  0x19   :  { %49 = vst.msk [vmem:[#allocation2 + $0xd0] sm:$0xff] %vm22_vm0, %v1474_v43  ;;  %50 = vst.msk [vmem:[#allocation2 + $0xd8] sm:$0xff] %vm22_vm0, %v1474_v43 }
  0x1a   :  { %51 = vst.msk [vmem:[#allocation2 + $0xe0] sm:$0xff] %vm22_vm0, %v1474_v43  ;;  %52 = vst.msk [vmem:[#allocation2 + $0xe8] sm:$0xff] %vm22_vm0, %v1474_v43 }
  0x1b   :  { %1234 = vmatpush3.bf16.msra.mxu0 %v1420_v14  ;;  %1404 = vmatpush3.bf16.msra.mxu1 %v1420_v14  ;;  %53 = vst.msk [vmem:[#allocation2 + $0xf0] sm:$0xff] %vm22_vm0, %v1474_v43  ;;  %54 = vst.msk [vmem:[#allocation2 + $0xf8] sm:$0xff] %vm22_vm0, %v1474_v43 }
  0x1c   :  { %1235 = vmatprep.subr.bf16.mxu0 %v1421_v15  ;;  %1397 = vmatprep.subr.bf16.mxu1 %v1421_v15 }
  0x1f   :  { %1236 = vmatpush3.bf16.msra.mxu0 %v1422_v16  ;;  %1405 = vmatpush3.bf16.msra.mxu1 %v1422_v16  ;;  %v79_v57 = vld [vmem:[#allocation2 + $0xc0] sm:$0xff]  ;;  %v80_v3 = vld [vmem:[#allocation2 + $0xc8] sm:$0xff] }
  0x20   :  { %1352 = vmatprep.subr.bf16.mxu1 %v1471_v48  ;;  %v81_v13 = vld [vmem:[#allocation2 + $0xd0] sm:$0xff] }
  0x22   :  { %440 = vmatmul.mubr.bf16.vlgmr.msra.gmra.mxu0 %v1423_v17  ;;  %536 = vmatmul.mubr.bf16.vlgmr.msra.gmra.mxu1 %v1453_v20 }
  0x23   :  { %447 = vmatprep.mubr.bf16.mxu0 %v1426_v19  ;;  %543 = vmatprep.mubr.bf16.mxu1 %v1459_v21  ;;  %v58_v19 = vld [vmem:[#allocation2 + $0x18] sm:$0xff] }
  0x24   :  { %1353 = vmatpush3.bf16.msra.mxu1 %v1471_v48 }
  0x25   :  { %1354 = vmatprep.subr.bf16.mxu1 %v1472_v49 }
  0x28   :  { %1355 = vmatpush3.bf16.msra.mxu1 %v1472_v49 }
  0x29   :  { %1356 = vmatprep.subr.bf16.mxu1 %v1473_v51 }
  0x2a   :  { %448 = vmatmul.mubr.bf16.gmra.mxu0 %v1428_v22  ;;  %544 = vmatmul.mubr.bf16.gmra.mxu1 %v1461_v24 }
  0x2b   :  { %455 = vmatprep.mubr.bf16.mxu0 %v1429_v23  ;;  %551 = vmatprep.mubr.bf16.mxu1 %v1465_v25  ;;  %v82_v23 = vld [vmem:[#allocation2 + $0xd8] sm:$0xff] }
  0x2c   :  { %1357 = vmatpush3.bf16.msra.mxu1 %v1473_v51 }
  0x32   :  { %456 = vmatmul.mubr.bf16.gmra.mxu0 %v1431_v26  ;;  %552 = vmatmul.mubr.bf16.gmra.mxu1 %v1467_v28 }
  0x33   :  { %463 = vmatprep.mubr.bf16.mxu0 %v1432_v27  ;;  %559 = vmatprep.mubr.bf16.mxu1 %v1468_v29  ;;  %v59_v29 = vld [vmem:[#allocation2 + $0x20] sm:$0xff] }
  0x3a   :  { %464 = vmatmul.mubr.bf16.gmra.mxu0 %v1434_v30  ;;  %560 = vmatmul.mubr.bf16.gmra.mxu1 %v1470_v32 }
  0x3b   :  { %471 = vmatprep.mubr.bf16.mxu0 %v1435_v31 }
  0x42   :  { %472 = vmatmul.mubr.bf16.gmra.mxu0 %v1437_v33 }
  0x43   :  { %479 = vmatprep.mubr.bf16.mxu0 %v1438_v34 }
  0x4a   :  { %480 = vmatmul.mubr.bf16.gmra.mxu0 %v1440_v35 }
  0x4b   :  { %487 = vmatprep.mubr.bf16.mxu0 %v1441_v36  ;;  %v83_v36 = vld [vmem:[#allocation2 + $0xe0] sm:$0xff] }
  0x52   :  { %488 = vmatmul.mubr.bf16.gmra.mxu0 %v1443_v37 }
  0x53   :  { %495 = vmatprep.mubr.bf16.mxu0 %v1444_v38 }
  0x5a   :  { %496 = vmatmul.mubr.bf16.gmra.mxu0 %v1446_v39 }
  0x5b   :  { %503 = vmatprep.mubr.bf16.mxu0 %v1447_v40 }
  0x62   :  { %504 = vmatmul.mubr.bf16.gmra.mxu0 %v1449_v41 }
  0x63   :  { %511 = vmatprep.mubr.bf16.mxu0 %v1450_v42  ;;  %v60_v42 = vld [vmem:[#allocation2 + $0x28] sm:$0xff] }
  0x6a   :  { %512 = vmatmul.mubr.bf16.gmra.mxu0 %v1452_v44 }
  0x6b   :  { %519 = vmatprep.mubr.bf16.mxu0 %v1456_v45 }
  0x72   :  { %520 = vmatmul.mubr.bf16.gmra.mxu0 %v1458_v46  ;;  %v84_v46 = vld [vmem:[#allocation2 + $0xe8] sm:$0xff] }
  0x73   :  { %527 = vmatprep.mubr.bf16.mxu0 %v1462_v47 }
  0x7a   :  { %528 = vmatmul.mubr.bf16.gmra.mxu0 %v1464_v50 }
  0xe2   :  { %v1237_v52 = vpop.f32.mrf.mxu0  ;;  %v1309_v53 = vpop.f32.mrf.mxu1 }
  0xe4   :  { %v1238_v55 = vpop.f32.mrf.mxu0  ;;  %v1310_v58 = vpop.f32.mrf.mxu1 }
  0xe5   :  { %v1239_v56 = vadd.f32 %v1238_v55, %v1237_v52  ;;  %v1311_v60 = vadd.f32 %v1310_v58, %v1309_v53  ;;  %v61_v52 = vld [vmem:[#allocation2 + $0x30] sm:$0xff] }
  0xe6   :  { %v1240_v59 = vpop.f32.mrf.mxu0  ;;  %v1312_v62 = vpop.f32.mrf.mxu1 }
  0xe7   :  { %v568_v61 = vadd.f32 %v1239_v56, %v55_v54  ;;  %v592_v1 = vadd.f32 %v1311_v60, %v79_v57 }
  0xe8   :  { %v1241_v0 = vpop.f32.mrf.mxu0  ;;  %v1313_v4 = vpop.f32.mrf.mxu1 }
  0xe9   :  { %601 = vst.msk [vmem:[#allocation2] sm:$0xff] %vm22_vm0, %v568_v61  ;;  %v1242_v2 = vadd.f32 %v1241_v0, %v1240_v59  ;;  %625 = vst.msk [vmem:[#allocation2 + $0xc0] sm:$0xff] %vm22_vm0, %v592_v1  ;;  %v1314_v6 = vadd.f32 %v1313_v4, %v1312_v62  ;;  %v85_v59 = vld [vmem:[#allocation2 + $0xf0] sm:$0xff]  ;;  %v62_v1 = vld [vmem:[#allocation2 + $0x38] sm:$0xff] }
  0xea   :  { %v1243_v5 = vpop.f32.mrf.mxu0  ;;  %v1315_v8 = vpop.f32.mrf.mxu1 }
  0xeb   :  { %v569_v7 = vadd.f32 %v1242_v2, %v56_v63  ;;  %v593_v11 = vadd.f32 %v1314_v6, %v80_v3 }
  0xec   :  { %v1244_v10 = vpop.f32.mrf.mxu0  ;;  %v1316_v14 = vpop.f32.mrf.mxu1 }
  0xed   :  { %602 = vst.msk [vmem:[#allocation2 + $0x8] sm:$0xff] %vm22_vm0, %v569_v7  ;;  %v1245_v12 = vadd.f32 %v1244_v10, %v1243_v5  ;;  %626 = vst.msk [vmem:[#allocation2 + $0xc8] sm:$0xff] %vm22_vm0, %v593_v11  ;;  %v1317_v16 = vadd.f32 %v1316_v14, %v1315_v8  ;;  %v86_v5 = vld [vmem:[#allocation2 + $0xf8] sm:$0xff]  ;;  %v63_v10 = vld [vmem:[#allocation2 + $0x40] sm:$0xff] }
  0xee   :  { %v1246_v15 = vpop.f32.mrf.mxu0  ;;  %v1318_v18 = vpop.f32.mrf.mxu1 }
  0xef   :  { %v570_v17 = vadd.f32 %v1245_v12, %v57_v9  ;;  %v594_v21 = vadd.f32 %v1317_v16, %v81_v13 }
  0xf0   :  { %v1247_v20 = vpop.f32.mrf.mxu0  ;;  %v1319_v24 = vpop.f32.mrf.mxu1  ;;  %v636_v31 = vld [vmem:[#allocation2] sm:$0xff] }
  0xf1   :  { %603 = vst.msk [vmem:[#allocation2 + $0x10] sm:$0xff] %vm22_vm0, %v570_v17  ;;  %v1248_v22 = vadd.f32 %v1247_v20, %v1246_v15  ;;  %627 = vst.msk [vmem:[#allocation2 + $0xd0] sm:$0xff] %vm22_vm0, %v594_v21  ;;  %v1320_v26 = vadd.f32 %v1319_v24, %v1318_v18  ;;  %v65_v24 = vld [vmem:[#allocation2 + $0x50] sm:$0xff] }
  0xf2   :  { %v1249_v25 = vpop.f32.mrf.mxu0  ;;  %v1321_v28 = vpop.f32.mrf.mxu1 }
  0xf3   :  { %v571_v27 = vadd.f32 %v1248_v22, %v58_v19  ;;  %v595_v33 = vadd.f32 %v1320_v26, %v82_v23  ;;  %v64_v19 = vld [vmem:[#allocation2 + $0x48] sm:$0xff] }
  0xf4   :  { %v1250_v30 = vpop.f32.mrf.mxu0  ;;  %v637_v32 = vld [vmem:[#allocation2 + $0x8] sm:$0xff]  ;;  %v1322_v37 = vpop.f32.mrf.mxu1 }
  0xf5   :  { %604 = vst.msk [vmem:[#allocation2 + $0x18] sm:$0xff] %vm22_vm0, %v571_v27  ;;  %v1251_v34 = vadd.f32 %v1250_v30, %v1249_v25  ;;  %v668_v35 = vpack.c.bf16 %v637_v32, %v636_v31  ;;  %628 = vst.msk [vmem:[#allocation2 + $0xd8] sm:$0xff] %vm22_vm0, %v595_v33  ;;  %v1323_v39 = vadd.f32 %v1322_v37, %v1321_v28  ;;  %v66_v32 = vld [vmem:[#allocation2 + $0x58] sm:$0xff]  ;;  %v67_v37 = vld [vmem:[#allocation2 + $0x60] sm:$0xff] }
  0xf6   :  { %v1252_v38 = vpop.f32.mrf.mxu0  ;;  %v1324_v41 = vpop.f32.mrf.mxu1 }
  0xf7   :  { %v572_v40 = vadd.f32 %v1251_v34, %v59_v29  ;;  %1358 = vmatprep.mubr.msk.bf16.mxu1 %vm22_vm0, %v668_v35  ;;  %v596_v44 = vadd.f32 %v1323_v39, %v83_v36 }
  0xf8   :  { %v1253_v43 = vpop.f32.mrf.mxu0  ;;  %v1325_v47 = vpop.f32.mrf.mxu1  ;;  %v638_v54 = vld [vmem:[#allocation2 + $0x10] sm:$0xff] }
  0xf9   :  { %605 = vst.msk [vmem:[#allocation2 + $0x20] sm:$0xff] %vm22_vm0, %v572_v40  ;;  %v1254_v45 = vadd.f32 %v1253_v43, %v1252_v38  ;;  %629 = vst.msk [vmem:[#allocation2 + $0xe0] sm:$0xff] %vm22_vm0, %v596_v44  ;;  %v1326_v49 = vadd.f32 %v1325_v47, %v1324_v41 }
  0xfa   :  { %v1255_v48 = vpop.f32.mrf.mxu0  ;;  %v1327_v51 = vpop.f32.mrf.mxu1 }
  0xfb   :  { %v573_v50 = vadd.f32 %v1254_v45, %v60_v42  ;;  %v597_v56 = vadd.f32 %v1326_v49, %v84_v46  ;;  %v68_v45 = vld [vmem:[#allocation2 + $0x68] sm:$0xff] }
  0xfc   :  { %v1256_v53 = vpop.f32.mrf.mxu0  ;;  %v639_v55 = vld [vmem:[#allocation2 + $0x18] sm:$0xff]  ;;  %v1328_v60 = vpop.f32.mrf.mxu1 }
  0xfd   :  { %606 = vst.msk [vmem:[#allocation2 + $0x28] sm:$0xff] %vm22_vm0, %v573_v50  ;;  %v1257_v57 = vadd.f32 %v1256_v53, %v1255_v48  ;;  %v669_v58 = vpack.c.bf16 %v639_v55, %v638_v54  ;;  %630 = vst.msk [vmem:[#allocation2 + $0xe8] sm:$0xff] %vm22_vm0, %v597_v56  ;;  %v1329_v62 = vadd.f32 %v1328_v60, %v1327_v51  ;;  %v69_v50 = vld [vmem:[#allocation2 + $0x70] sm:$0xff] }
  0xfe   :  { %v1258_v61 = vpop.f32.mrf.mxu0  ;;  %v1330_v0 = vpop.f32.mrf.mxu1 }
  0xff   :  { %v574_v63 = vadd.f32 %v1257_v57, %v61_v52  ;;  %1359 = vmatmul.mubr.msk.bf16.vlgmr.msra.gmra.mxu1 %vm22_vm0, %v669_v58  ;;  %v598_v3 = vadd.f32 %v1329_v62, %v85_v59  ;;  %v70_v58 = vld [vmem:[#allocation2 + $0x78] sm:$0xff] }
 0x100   :  { %v1259_v2 = vpop.f32.mrf.mxu0  ;;  %v1331_v6 = vpop.f32.mrf.mxu1  ;;  %v640_v12 = vld [vmem:[#allocation2 + $0x20] sm:$0xff] }
 0x101   :  { %607 = vst.msk [vmem:[#allocation2 + $0x30] sm:$0xff] %vm22_vm0, %v574_v63  ;;  %v1260_v4 = vadd.f32 %v1259_v2, %v1258_v61  ;;  %631 = vst.msk [vmem:[#allocation2 + $0xf0] sm:$0xff] %vm22_vm0, %v598_v3  ;;  %v1332_v8 = vadd.f32 %v1331_v6, %v1330_v0  ;;  %v71_v63 = vld [vmem:[#allocation2 + $0x80] sm:$0xff] }
 0x102   :  { %v1261_v7 = vpop.f32.mrf.mxu0 }
 0x103   :  { %v575_v9 = vadd.f32 %v1260_v4, %v62_v1  ;;  %v599_v14 = vadd.f32 %v1332_v8, %v86_v5 }
 0x104   :  { %v1262_v11 = vpop.f32.mrf.mxu0  ;;  %v641_v13 = vld [vmem:[#allocation2 + $0x28] sm:$0xff] }
 0x105   :  { %608 = vst.msk [vmem:[#allocation2 + $0x38] sm:$0xff] %vm22_vm0, %v575_v9  ;;  %v1263_v15 = vadd.f32 %v1262_v11, %v1261_v7  ;;  %v670_v16 = vpack.c.bf16 %v641_v13, %v640_v12  ;;  %632 = vst.msk [vmem:[#allocation2 + $0xf8] sm:$0xff] %vm22_vm0, %v599_v14  ;;  %v72_v7 = vld [vmem:[#allocation2 + $0x88] sm:$0xff]  ;;  %v73_v12 = vld [vmem:[#allocation2 + $0x90] sm:$0xff] }
 0x106   :  { %v1264_v17 = vpop.f32.mrf.mxu0 }
 0x107   :  { %v576_v18 = vadd.f32 %v1263_v15, %v63_v10  ;;  %1362 = vmatprep.mubr.msk.bf16.mxu1 %vm22_vm0, %v670_v16 }
 0x108   :  { %v1265_v20 = vpop.f32.mrf.mxu0  ;;  %v642_v26 = vld [vmem:[#allocation2 + $0x30] sm:$0xff] }
 0x109   :  { %609 = vst.msk [vmem:[#allocation2 + $0x40] sm:$0xff] %vm22_vm0, %v576_v18  ;;  %v1266_v21 = vadd.f32 %v1265_v20, %v1264_v17  ;;  %v74_v20 = vld [vmem:[#allocation2 + $0x98] sm:$0xff] }
 0x10a   :  { %v1267_v22 = vpop.f32.mrf.mxu0 }
 0x10b   :  { %v577_v23 = vadd.f32 %v1266_v21, %v64_v19 }
 0x10c   :  { %v1268_v25 = vpop.f32.mrf.mxu0  ;;  %v643_v27 = vld [vmem:[#allocation2 + $0x38] sm:$0xff] }
 0x10d   :  { %610 = vst.msk [vmem:[#allocation2 + $0x48] sm:$0xff] %vm22_vm0, %v577_v23  ;;  %v1269_v28 = vadd.f32 %v1268_v25, %v1267_v22  ;;  %v671_v29 = vpack.c.bf16 %v643_v27, %v642_v26  ;;  %v75_v25 = vld [vmem:[#allocation2 + $0xa0] sm:$0xff] }
 0x10e   :  { %v1270_v30 = vpop.f32.mrf.mxu0 }
 0x10f   :  { %v578_v31 = vadd.f32 %v1269_v28, %v65_v24  ;;  %1363 = vmatmul.mubr.msk.bf16.gmra.mxu1 %vm22_vm0, %v671_v29 }
 0x110   :  { %v1271_v33 = vpop.f32.mrf.mxu0  ;;  %v644_v39 = vld [vmem:[#allocation2 + $0x40] sm:$0xff] }
 0x111   :  { %611 = vst.msk [vmem:[#allocation2 + $0x50] sm:$0xff] %vm22_vm0, %v578_v31  ;;  %v1272_v34 = vadd.f32 %v1271_v33, %v1270_v30  ;;  %v76_v33 = vld [vmem:[#allocation2 + $0xa8] sm:$0xff] }
 0x112   :  { %v1273_v35 = vpop.f32.mrf.mxu0 }
 0x113   :  { %v579_v36 = vadd.f32 %v1272_v34, %v66_v32 }
 0x114   :  { %v1274_v38 = vpop.f32.mrf.mxu0  ;;  %v645_v40 = vld [vmem:[#allocation2 + $0x48] sm:$0xff] }
 0x115   :  { %612 = vst.msk [vmem:[#allocation2 + $0x58] sm:$0xff] %vm22_vm0, %v579_v36  ;;  %v1275_v41 = vadd.f32 %v1274_v38, %v1273_v35  ;;  %v672_v42 = vpack.c.bf16 %v645_v40, %v644_v39  ;;  %v77_v38 = vld [vmem:[#allocation2 + $0xb0] sm:$0xff] }
 0x116   :  { %v1276_v43 = vpop.f32.mrf.mxu0 }
 0x117   :  { %v580_v44 = vadd.f32 %v1275_v41, %v67_v37  ;;  %1366 = vmatprep.mubr.msk.bf16.mxu1 %vm22_vm0, %v672_v42 }
 0x118   :  { %v1277_v46 = vpop.f32.mrf.mxu0  ;;  %v646_v52 = vld [vmem:[#allocation2 + $0x50] sm:$0xff] }
 0x119   :  { %613 = vst.msk [vmem:[#allocation2 + $0x60] sm:$0xff] %vm22_vm0, %v580_v44  ;;  %v1278_v47 = vadd.f32 %v1277_v46, %v1276_v43  ;;  %v78_v46 = vld [vmem:[#allocation2 + $0xb8] sm:$0xff] }
 0x11a   :  { %v1279_v48 = vpop.f32.mrf.mxu0 }
 0x11b   :  { %v581_v49 = vadd.f32 %v1278_v47, %v68_v45 }
 0x11c   :  { %v1280_v51 = vpop.f32.mrf.mxu0  ;;  %v647_v53 = vld [vmem:[#allocation2 + $0x58] sm:$0xff] }
 0x11d   :  { %614 = vst.msk [vmem:[#allocation2 + $0x68] sm:$0xff] %vm22_vm0, %v581_v49  ;;  %v1281_v54 = vadd.f32 %v1280_v51, %v1279_v48  ;;  %v673_v55 = vpack.c.bf16 %v647_v53, %v646_v52  ;;  %v660_v53 = vld [vmem:[#allocation2 + $0xc0] sm:$0xff] }
 0x11e   :  { %v1282_v56 = vpop.f32.mrf.mxu0 }
 0x11f   :  { %v582_v57 = vadd.f32 %v1281_v54, %v69_v50  ;;  %1367 = vmatmul.mubr.msk.bf16.gmra.mxu1 %vm22_vm0, %v673_v55  ;;  %v661_v54 = vld [vmem:[#allocation2 + $0xc8] sm:$0xff] }
 0x120   :  { %v1283_v59 = vpop.f32.mrf.mxu0  ;;  %v648_v1 = vld [vmem:[#allocation2 + $0x60] sm:$0xff] }
 0x121   :  { %615 = vst.msk [vmem:[#allocation2 + $0x70] sm:$0xff] %vm22_vm0, %v582_v57  ;;  %v1284_v60 = vadd.f32 %v1283_v59, %v1282_v56  ;;  %v662_v59 = vld [vmem:[#allocation2 + $0xd0] sm:$0xff] }
 0x122   :  { %v1285_v61 = vpop.f32.mrf.mxu0 }
 0x123   :  { %v583_v62 = vadd.f32 %v1284_v60, %v70_v58  ;;  %v680_v58 = vpack.c.bf16 %v661_v54, %v660_v53  ;;  %v663_v60 = vld [vmem:[#allocation2 + $0xd8] sm:$0xff] }
 0x124   :  { %v1286_v0 = vpop.f32.mrf.mxu0  ;;  %v649_v2 = vld [vmem:[#allocation2 + $0x68] sm:$0xff] }
 0x125   :  { %616 = vst.msk [vmem:[#allocation2 + $0x78] sm:$0xff] %vm22_vm0, %v583_v62  ;;  %v1287_v3 = vadd.f32 %v1286_v0, %v1285_v61  ;;  %v674_v4 = vpack.c.bf16 %v649_v2, %v648_v1  ;;  %v664_v61 = vld [vmem:[#allocation2 + $0xe0] sm:$0xff]  ;;  %v665_v62 = vld [vmem:[#allocation2 + $0xe8] sm:$0xff]  ;;  %v666_v1 = vld [vmem:[#allocation2 + $0xf0] sm:$0xff] }
 0x126   :  { %v1288_v5 = vpop.f32.mrf.mxu0  ;;  %v682_v0 = vpack.c.bf16 %v665_v62, %v664_v61  ;;  %v667_v2 = vld [vmem:[#allocation2 + $0xf8] sm:$0xff] }
 0x127   :  { %v584_v6 = vadd.f32 %v1287_v3, %v71_v63  ;;  %1370 = vmatprep.mubr.msk.bf16.mxu1 %vm22_vm0, %v674_v4  ;;  %v681_v63 = vpack.c.bf16 %v663_v60, %v662_v59  ;;  %v683_v3 = vpack.c.bf16 %v667_v2, %v666_v1  ;;  %v1736_v4 = vld [vmem:[%s1901_s3] ss:$0 sm:$0xff] }
 0x128   :  { %v1289_v8 = vpop.f32.mrf.mxu0  ;;  %v650_v14 = vld [vmem:[#allocation2 + $0x70] sm:$0xff] }
 0x129   :  { %617 = vst.msk [vmem:[#allocation2 + $0x80] sm:$0xff] %vm22_vm0, %v584_v6  ;;  %v1290_v9 = vadd.f32 %v1289_v8, %v1288_v5 }
 0x12a   :  { %v1291_v10 = vpop.f32.mrf.mxu0 }
 0x12b   :  { %v585_v11 = vadd.f32 %v1290_v9, %v72_v7 }
 0x12c   :  { %v1292_v13 = vpop.f32.mrf.mxu0  ;;  %v651_v15 = vld [vmem:[#allocation2 + $0x78] sm:$0xff] }
 0x12d   :  { %618 = vst.msk [vmem:[#allocation2 + $0x88] sm:$0xff] %vm22_vm0, %v585_v11  ;;  %v1293_v16 = vadd.f32 %v1292_v13, %v1291_v10  ;;  %v675_v17 = vpack.c.bf16 %v651_v15, %v650_v14 }
 0x12e   :  { %v1294_v18 = vpop.f32.mrf.mxu0 }
 0x12f   :  { %v586_v19 = vadd.f32 %v1293_v16, %v73_v12  ;;  %1371 = vmatmul.mubr.msk.bf16.gmra.mxu1 %vm22_vm0, %v675_v17 }
 0x130   :  { %v1295_v21 = vpop.f32.mrf.mxu0  ;;  %v652_v27 = vld [vmem:[#allocation2 + $0x80] sm:$0xff] }
 0x131   :  { %619 = vst.msk [vmem:[#allocation2 + $0x90] sm:$0xff] %vm22_vm0, %v586_v19  ;;  %v1296_v22 = vadd.f32 %v1295_v21, %v1294_v18 }
 0x132   :  { %v1297_v23 = vpop.f32.mrf.mxu0 }
 0x133   :  { %v587_v24 = vadd.f32 %v1296_v22, %v74_v20 }
 0x134   :  { %v1298_v26 = vpop.f32.mrf.mxu0  ;;  %v653_v28 = vld [vmem:[#allocation2 + $0x88] sm:$0xff] }
 0x135   :  { %620 = vst.msk [vmem:[#allocation2 + $0x98] sm:$0xff] %vm22_vm0, %v587_v24  ;;  %v1299_v29 = vadd.f32 %v1298_v26, %v1297_v23  ;;  %v676_v30 = vpack.c.bf16 %v653_v28, %v652_v27 }
 0x136   :  { %v1300_v31 = vpop.f32.mrf.mxu0 }
 0x137   :  { %v588_v32 = vadd.f32 %v1299_v29, %v75_v25  ;;  %1374 = vmatprep.mubr.msk.bf16.mxu1 %vm22_vm0, %v676_v30 }
 0x138   :  { %v1301_v34 = vpop.f32.mrf.mxu0  ;;  %v654_v40 = vld [vmem:[#allocation2 + $0x90] sm:$0xff] }
 0x139   :  { %621 = vst.msk [vmem:[#allocation2 + $0xa0] sm:$0xff] %vm22_vm0, %v588_v32  ;;  %v1302_v35 = vadd.f32 %v1301_v34, %v1300_v31 }
 0x13a   :  { %v1303_v36 = vpop.f32.mrf.mxu0 }
 0x13b   :  { %v589_v37 = vadd.f32 %v1302_v35, %v76_v33 }
 0x13c   :  { %v1304_v39 = vpop.f32.mrf.mxu0  ;;  %v655_v41 = vld [vmem:[#allocation2 + $0x98] sm:$0xff] }
 0x13d   :  { %622 = vst.msk [vmem:[#allocation2 + $0xa8] sm:$0xff] %vm22_vm0, %v589_v37  ;;  %v1305_v42 = vadd.f32 %v1304_v39, %v1303_v36  ;;  %v677_v43 = vpack.c.bf16 %v655_v41, %v654_v40 }
 0x13e   :  { %v1306_v44 = vpop.f32.mrf.mxu0 }
 0x13f   :  { %v590_v45 = vadd.f32 %v1305_v42, %v77_v38  ;;  %1375 = vmatmul.mubr.msk.bf16.gmra.mxu1 %vm22_vm0, %v677_v43 }
 0x140   :  { %v1307_v47 = vpop.f32.mrf.mxu0  ;;  %v656_v50 = vld [vmem:[#allocation2 + $0xa0] sm:$0xff] }
 0x141   :  { %623 = vst.msk [vmem:[#allocation2 + $0xb0] sm:$0xff] %vm22_vm0, %v590_v45  ;;  %v1308_v48 = vadd.f32 %v1307_v47, %v1306_v44 }
 0x143   :  { %v591_v49 = vadd.f32 %v1308_v48, %v78_v46 }
 0x144   :  { %v657_v51 = vld [vmem:[#allocation2 + $0xa8] sm:$0xff] }
 0x145   :  { %624 = vst.msk [vmem:[#allocation2 + $0xb8] sm:$0xff] %vm22_vm0, %v591_v49  ;;  %v678_v52 = vpack.c.bf16 %v657_v51, %v656_v50 }
 0x147   :  { %1378 = vmatprep.mubr.msk.bf16.mxu1 %vm22_vm0, %v678_v52 }
 0x148   :  { %v658_v55 = vld [vmem:[#allocation2 + $0xb0] sm:$0xff] }
 0x14c   :  { %v659_v56 = vld [vmem:[#allocation2 + $0xb8] sm:$0xff] }
 0x14d   :  { %v679_v57 = vpack.c.bf16 %v659_v56, %v658_v55 }
 0x14f   :  { %1379 = vmatmul.mubr.msk.bf16.gmra.mxu1 %vm22_vm0, %v679_v57 }
 0x150   :  { %1382 = vmatprep.mubr.msk.bf16.mxu1 %vm22_vm0, %v680_v58 }
 0x157   :  { %1383 = vmatmul.mubr.msk.bf16.gmra.mxu1 %vm22_vm0, %v681_v63 }
 0x158   :  { %1386 = vmatprep.mubr.msk.bf16.mxu1 %vm22_vm0, %v682_v0 }
 0x15f   :  { %1387 = vmatmul.mubr.msk.bf16.gmra.mxu1 %vm22_vm0, %v683_v3 }
 0x1bf   :  { %v1360_v5 = vpop.f32.mrf.mxu1 }
 0x1c0   :  { %v806_v6 = vadd.f32 %v1360_v5, %v1736_v4 }
 0x1c1   :  { %v797_v7 = vpop.f32.mrf.mxu1 }
 0x1c2   :  { %v1191_v8 = vpack.c.bf16 %v806_v6, %v806_v6  ;;  %v798_v9 = vadd.f32 %v1736_v4, %v797_v7 }
 0x1c3   :  { %v1361_v10 = vpop.f32.mrf.mxu1 }
 0x1c4   :  { %1055 = vst.msk [vmem:[%s1902_s4 + $0x8] sm:$0xf] %vm1052_vm1, %v1191_v8  ;;  %v1189_v11 = vpack.c.bf16 %v798_v9, %v798_v9  ;;  %v809_v12 = vadd.f32 %v1361_v10, %v1736_v4 }
 0x1c5   :  { %v800_v13 = vpop.f32.mrf.mxu1 }
 0x1c6   :  { %1053 = vst.msk [vmem:[%s1902_s4] sm:$0xf] %vm1052_vm1, %v1189_v11  ;;  %v1192_v14 = vpack.c.bf16 %v809_v12, %v809_v12  ;;  %v801_v15 = vadd.f32 %v1736_v4, %v800_v13 }
 0x1c8   :  { %1056 = vst.msk [vmem:[%s1902_s4 + $0xc] sm:$0xf] %vm1052_vm1, %v1192_v14  ;;  %v1190_v16 = vpack.c.bf16 %v801_v15, %v801_v15 }
 0x1ca   :  { %1054 = vst.msk [vmem:[%s1902_s4 + $0x4] sm:$0xf] %vm1052_vm1, %v1190_v16 }
 0x1cf   :  { %v1364_v17 = vpop.f32.mrf.mxu1 }
 0x1d0   :  { %v822_v18 = vadd.f32 %v1364_v17, %v1736_v4 }
 0x1d1   :  { %v813_v19 = vpop.f32.mrf.mxu1 }
 0x1d2   :  { %v1195_v20 = vpack.c.bf16 %v822_v18, %v822_v18  ;;  %v814_v21 = vadd.f32 %v1736_v4, %v813_v19 }
 0x1d3   :  { %v1365_v22 = vpop.f32.mrf.mxu1 }
 0x1d4   :  { %1059 = vst.msk [vmem:[%s1902_s4 + $0x18] sm:$0xf] %vm1052_vm1, %v1195_v20  ;;  %v1193_v23 = vpack.c.bf16 %v814_v21, %v814_v21  ;;  %v825_v24 = vadd.f32 %v1365_v22, %v1736_v4 }
 0x1d5   :  { %v816_v25 = vpop.f32.mrf.mxu1 }
 0x1d6   :  { %1057 = vst.msk [vmem:[%s1902_s4 + $0x10] sm:$0xf] %vm1052_vm1, %v1193_v23  ;;  %v1196_v26 = vpack.c.bf16 %v825_v24, %v825_v24  ;;  %v817_v27 = vadd.f32 %v1736_v4, %v816_v25 }
 0x1d8   :  { %1060 = vst.msk [vmem:[%s1902_s4 + $0x1c] sm:$0xf] %vm1052_vm1, %v1196_v26  ;;  %v1194_v28 = vpack.c.bf16 %v817_v27, %v817_v27 }
 0x1da   :  { %1058 = vst.msk [vmem:[%s1902_s4 + $0x14] sm:$0xf] %vm1052_vm1, %v1194_v28 }
 0x1df   :  { %v1368_v29 = vpop.f32.mrf.mxu1 }
 0x1e0   :  { %v838_v30 = vadd.f32 %v1368_v29, %v1736_v4 }
 0x1e1   :  { %v829_v31 = vpop.f32.mrf.mxu1 }
 0x1e2   :  { %v1199_v32 = vpack.c.bf16 %v838_v30, %v838_v30  ;;  %v830_v33 = vadd.f32 %v1736_v4, %v829_v31 }
 0x1e3   :  { %v1369_v34 = vpop.f32.mrf.mxu1 }
 0x1e4   :  { %1063 = vst.msk [vmem:[%s1902_s4 + $0x28] sm:$0xf] %vm1052_vm1, %v1199_v32  ;;  %v1197_v35 = vpack.c.bf16 %v830_v33, %v830_v33  ;;  %v841_v36 = vadd.f32 %v1369_v34, %v1736_v4 }
 0x1e5   :  { %v832_v37 = vpop.f32.mrf.mxu1 }
 0x1e6   :  { %1061 = vst.msk [vmem:[%s1902_s4 + $0x20] sm:$0xf] %vm1052_vm1, %v1197_v35  ;;  %v1200_v38 = vpack.c.bf16 %v841_v36, %v841_v36  ;;  %v833_v39 = vadd.f32 %v1736_v4, %v832_v37 }
 0x1e8   :  { %1064 = vst.msk [vmem:[%s1902_s4 + $0x2c] sm:$0xf] %vm1052_vm1, %v1200_v38  ;;  %v1198_v40 = vpack.c.bf16 %v833_v39, %v833_v39 }
 0x1ea   :  { %1062 = vst.msk [vmem:[%s1902_s4 + $0x24] sm:$0xf] %vm1052_vm1, %v1198_v40 }
 0x1ef   :  { %v1372_v41 = vpop.f32.mrf.mxu1 }
 0x1f0   :  { %v854_v42 = vadd.f32 %v1372_v41, %v1736_v4 }
 0x1f1   :  { %v845_v43 = vpop.f32.mrf.mxu1 }
 0x1f2   :  { %v1203_v44 = vpack.c.bf16 %v854_v42, %v854_v42  ;;  %v846_v45 = vadd.f32 %v1736_v4, %v845_v43 }
 0x1f3   :  { %v1373_v46 = vpop.f32.mrf.mxu1 }
 0x1f4   :  { %1067 = vst.msk [vmem:[%s1902_s4 + $0x38] sm:$0xf] %vm1052_vm1, %v1203_v44  ;;  %v1201_v47 = vpack.c.bf16 %v846_v45, %v846_v45  ;;  %v857_v48 = vadd.f32 %v1373_v46, %v1736_v4 }
 0x1f5   :  { %v848_v49 = vpop.f32.mrf.mxu1 }
 0x1f6   :  { %1065 = vst.msk [vmem:[%s1902_s4 + $0x30] sm:$0xf] %vm1052_vm1, %v1201_v47  ;;  %v1204_v50 = vpack.c.bf16 %v857_v48, %v857_v48  ;;  %v849_v51 = vadd.f32 %v1736_v4, %v848_v49 }
 0x1f8   :  { %1068 = vst.msk [vmem:[%s1902_s4 + $0x3c] sm:$0xf] %vm1052_vm1, %v1204_v50  ;;  %v1202_v52 = vpack.c.bf16 %v849_v51, %v849_v51 }
 0x1fa   :  { %1066 = vst.msk [vmem:[%s1902_s4 + $0x34] sm:$0xf] %vm1052_vm1, %v1202_v52 }
 0x1ff   :  { %v1376_v53 = vpop.f32.mrf.mxu1 }
 0x200   :  { %v870_v54 = vadd.f32 %v1376_v53, %v1736_v4 }
 0x201   :  { %v861_v55 = vpop.f32.mrf.mxu1 }
 0x202   :  { %v1207_v56 = vpack.c.bf16 %v870_v54, %v870_v54  ;;  %v862_v57 = vadd.f32 %v1736_v4, %v861_v55 }
 0x203   :  { %v1377_v58 = vpop.f32.mrf.mxu1 }
 0x204   :  { %1071 = vst.msk [vmem:[%s1902_s4 + $0x48] sm:$0xf] %vm1052_vm1, %v1207_v56  ;;  %v1205_v59 = vpack.c.bf16 %v862_v57, %v862_v57  ;;  %v873_v60 = vadd.f32 %v1377_v58, %v1736_v4 }
 0x205   :  { %v864_v61 = vpop.f32.mrf.mxu1 }
 0x206   :  { %1069 = vst.msk [vmem:[%s1902_s4 + $0x40] sm:$0xf] %vm1052_vm1, %v1205_v59  ;;  %v1208_v62 = vpack.c.bf16 %v873_v60, %v873_v60  ;;  %v865_v63 = vadd.f32 %v1736_v4, %v864_v61 }
 0x208   :  { %1072 = vst.msk [vmem:[%s1902_s4 + $0x4c] sm:$0xf] %vm1052_vm1, %v1208_v62  ;;  %v1206_v0 = vpack.c.bf16 %v865_v63, %v865_v63 }
 0x20a   :  { %1070 = vst.msk [vmem:[%s1902_s4 + $0x44] sm:$0xf] %vm1052_vm1, %v1206_v0 }
 0x20f   :  { %v1380_v1 = vpop.f32.mrf.mxu1 }
 0x210   :  { %v886_v2 = vadd.f32 %v1380_v1, %v1736_v4 }
 0x211   :  { %v877_v3 = vpop.f32.mrf.mxu1 }
 0x212   :  { %v1211_v5 = vpack.c.bf16 %v886_v2, %v886_v2  ;;  %v878_v6 = vadd.f32 %v1736_v4, %v877_v3 }
 0x213   :  { %v1381_v7 = vpop.f32.mrf.mxu1 }
 0x214   :  { %1075 = vst.msk [vmem:[%s1902_s4 + $0x58] sm:$0xf] %vm1052_vm1, %v1211_v5  ;;  %v1209_v8 = vpack.c.bf16 %v878_v6, %v878_v6  ;;  %v889_v9 = vadd.f32 %v1381_v7, %v1736_v4 }
 0x215   :  { %v880_v10 = vpop.f32.mrf.mxu1 }
 0x216   :  { %1073 = vst.msk [vmem:[%s1902_s4 + $0x50] sm:$0xf] %vm1052_vm1, %v1209_v8  ;;  %v1212_v11 = vpack.c.bf16 %v889_v9, %v889_v9  ;;  %v881_v12 = vadd.f32 %v1736_v4, %v880_v10 }
 0x217   :  { %v1384_v13 = vpop.f32.mrf.mxu1 }
 0x218   :  { %1076 = vst.msk [vmem:[%s1902_s4 + $0x5c] sm:$0xf] %vm1052_vm1, %v1212_v11  ;;  %v1210_v14 = vpack.c.bf16 %v881_v12, %v881_v12  ;;  %v902_v15 = vadd.f32 %v1384_v13, %v1736_v4 }
 0x219   :  { %v893_v16 = vpop.f32.mrf.mxu1 }
 0x21a   :  { %1074 = vst.msk [vmem:[%s1902_s4 + $0x54] sm:$0xf] %vm1052_vm1, %v1210_v14  ;;  %v1215_v17 = vpack.c.bf16 %v902_v15, %v902_v15  ;;  %v894_v18 = vadd.f32 %v1736_v4, %v893_v16 }
 0x21b   :  { %v1385_v19 = vpop.f32.mrf.mxu1 }
 0x21c   :  { %1079 = vst.msk [vmem:[%s1902_s4 + $0x68] sm:$0xf] %vm1052_vm1, %v1215_v17  ;;  %v1213_v20 = vpack.c.bf16 %v894_v18, %v894_v18  ;;  %v905_v21 = vadd.f32 %v1385_v19, %v1736_v4 }
 0x21d   :  { %v896_v22 = vpop.f32.mrf.mxu1 }
 0x21e   :  { %1077 = vst.msk [vmem:[%s1902_s4 + $0x60] sm:$0xf] %vm1052_vm1, %v1213_v20  ;;  %v1216_v23 = vpack.c.bf16 %v905_v21, %v905_v21  ;;  %v897_v24 = vadd.f32 %v1736_v4, %v896_v22 }
 0x21f   :  { %v1388_v25 = vpop.f32.mrf.mxu1 }
 0x220   :  { %1080 = vst.msk [vmem:[%s1902_s4 + $0x6c] sm:$0xf] %vm1052_vm1, %v1216_v23  ;;  %v1214_v26 = vpack.c.bf16 %v897_v24, %v897_v24  ;;  %v918_v27 = vadd.f32 %v1388_v25, %v1736_v4 }
 0x221   :  { %v909_v28 = vpop.f32.mrf.mxu1 }
 0x222   :  { %1078 = vst.msk [vmem:[%s1902_s4 + $0x64] sm:$0xf] %vm1052_vm1, %v1214_v26  ;;  %v1219_v29 = vpack.c.bf16 %v918_v27, %v918_v27  ;;  %v910_v30 = vadd.f32 %v1736_v4, %v909_v28 }
 0x223   :  { %v1389_v31 = vpop.f32.mrf.mxu1 }
 0x224   :  { %1083 = vst.msk [vmem:[%s1902_s4 + $0x78] sm:$0xf] %vm1052_vm1, %v1219_v29  ;;  %v1217_v32 = vpack.c.bf16 %v910_v30, %v910_v30  ;;  %v921_v33 = vadd.f32 %v1389_v31, %v1736_v4 }
 0x225   :  { %v912_v34 = vpop.f32.mrf.mxu1 }
 0x226   :  { %1081 = vst.msk [vmem:[%s1902_s4 + $0x70] sm:$0xf] %vm1052_vm1, %v1217_v32  ;;  %v1220_v35 = vpack.c.bf16 %v921_v33, %v921_v33  ;;  %v913_v36 = vadd.f32 %v1736_v4, %v912_v34 }
 0x228   :  { %1084 = vst.msk [vmem:[%s1902_s4 + $0x7c] sm:$0xf] %vm1052_vm1, %v1220_v35  ;;  %v1218_v37 = vpack.c.bf16 %v913_v36, %v913_v36 }
 0x22a   :  { %1082 = vst.msk [vmem:[%s1902_s4 + $0x74] sm:$0xf] %vm1052_vm1, %v1218_v37 }

// kernel: gcn_forward.5
= control target key start
LH: loop header
LB: loop body
LE: loop exit
PB: predicated region body
PF: predicated region fallthrough
CT: control target
= control target key end

     0   :  { %vm22_vm0 = vcmask 261120   ;;  %v1493_v43 = vmov 0.0   ;;  %vm1076_vm1 = vcmask 388096   ;;  %s1914_s1 = inlined_call_operand.vmem [shape: bf16[256,32], index: 1, kind: input, shape index: {}]   ;;  %s1915_s0 = inlined_call_operand.vmem [shape: bf16[256,256], index: 0, kind: input, shape index: {}]   ;;  %s1916_s2 = inlined_call_operand.vmem [shape: bf16[32,48], index: 2, kind: input, shape index: {}]   ;;  %s1917_s3 = inlined_call_operand.vmem [shape: f32[1,48], index: 3, kind: input, shape index: {}]   ;;  %s1918_s4 = inlined_call_operand.vmem [shape: bf16[256,48], index: 4, kind: output, shape index: {}]  }
   0x1   :  { %v1427_v0 = vld [vmem:[%s1914_s1 + $0x78] sm:$0xff]   ;;  %v1429_v2 = vld [vmem:[%s1914_s1 + $0x70] sm:$0xff]   ;;  %v1431_v4 = vld [vmem:[%s1914_s1 + $0x68] sm:$0xff]   ;;  %23 = vst.msk [vmem:[#allocation2] sm:$0xff] %vm22_vm0, %v1493_v43 }
   0x2   :  { %v1428_v1 = vld [vmem:[%s1914_s1 + $0x38] sm:$0xff]   ;;  %1244 = vmatprep.subr.bf16.mxu0 %v1427_v0  ;;  %1410 = vmatprep.subr.bf16.mxu1 %v1427_v0  ;;  %v1430_v3 = vld [vmem:[%s1914_s1 + $0x30] sm:$0xff]   ;;  %v1432_v5 = vld [vmem:[%s1914_s1 + $0x28] sm:$0xff]   ;;  %24 = vst.msk [vmem:[#allocation2 + $0x8] sm:$0xff] %vm22_vm0, %v1493_v43 }
   0x3   :  { %1245 = vmatpush3.bf16.msra.mxu0 %v1428_v1  ;;  %1418 = vmatpush3.bf16.msra.mxu1 %v1428_v1  ;;  %v1433_v6 = vld [vmem:[%s1914_s1 + $0x60] sm:$0xff]   ;;  %v1435_v8 = vld [vmem:[%s1914_s1 + $0x58] sm:$0xff]   ;;  %v1437_v10 = vld [vmem:[%s1914_s1 + $0x50] sm:$0xff]   ;;  %25 = vst.msk [vmem:[#allocation2 + $0x10] sm:$0xff] %vm22_vm0, %v1493_v43 }
   0x4   :  { %1246 = vmatprep.subr.bf16.mxu0 %v1429_v2  ;;  %1411 = vmatprep.subr.bf16.mxu1 %v1429_v2  ;;  %v1434_v7 = vld [vmem:[%s1914_s1 + $0x20] sm:$0xff]   ;;  %v1436_v9 = vld [vmem:[%s1914_s1 + $0x18] sm:$0xff]   ;;  %v1438_v12 = vld [vmem:[%s1914_s1 + $0x10] sm:$0xff]   ;;  %26 = vst.msk [vmem:[#allocation2 + $0x18] sm:$0xff] %vm22_vm0, %v1493_v43 }
   0x5   :  { %v1445_v11 = vld [vmem:[%s1915_s0 + $0x4] ss:$8 sps:$4 sm:$0xff]   ;;  %v1443_v17 = vld [vmem:[%s1915_s0] ss:$8 sps:$4 sm:$0xff]   ;;  %v1446_v19 = vld [vmem:[%s1915_s0 + $0x14] ss:$8 sps:$4 sm:$0xff]  }
   0x6   :  { %439 = vmatprep.mubr.bf16.mxu0 %v1445_v11  ;;  %v1439_v13 = vld [vmem:[%s1914_s1 + $0x48] sm:$0xff]   ;;  %v1441_v15 = vld [vmem:[%s1914_s1 + $0x40] sm:$0xff]   ;;  %v1479_v21 = vld [vmem:[%s1915_s0 + $0xd4] ss:$8 sps:$4 sm:$0xff]   ;;  %27 = vst.msk [vmem:[#allocation2 + $0x20] sm:$0xff] %vm22_vm0, %v1493_v43 }
   0x7   :  { %1247 = vmatpush3.bf16.msra.mxu0 %v1430_v3  ;;  %1419 = vmatpush3.bf16.msra.mxu1 %v1430_v3  ;;  %v1440_v14 = vld [vmem:[%s1914_s1 + $0x8] sm:$0xff]   ;;  %v1442_v16 = vld [vmem:[%s1914_s1] sm:$0xff]   ;;  %v1448_v22 = vld [vmem:[%s1915_s0 + $0x10] ss:$8 sps:$4 sm:$0xff]   ;;  %28 = vst.msk [vmem:[#allocation2 + $0x28] sm:$0xff] %vm22_vm0, %v1493_v43 }
   0x8   :  { %1248 = vmatprep.subr.bf16.mxu0 %v1431_v4  ;;  %1412 = vmatprep.subr.bf16.mxu1 %v1431_v4  ;;  %v1475_v18 = vld [vmem:[%s1915_s0 + $0xc4] ss:$8 sps:$4 sm:$0xff]   ;;  %v1473_v20 = vld [vmem:[%s1915_s0 + $0xc0] ss:$8 sps:$4 sm:$0xff]   ;;  %v1481_v24 = vld [vmem:[%s1915_s0 + $0xd0] ss:$8 sps:$4 sm:$0xff]  }
   0x9   :  { %535 = vmatprep.mubr.bf16.mxu1 %v1475_v18  ;;  %v1449_v23 = vld [vmem:[%s1915_s0 + $0x24] ss:$8 sps:$4 sm:$0xff]   ;;  %v1451_v26 = vld [vmem:[%s1915_s0 + $0x20] ss:$8 sps:$4 sm:$0xff]   ;;  %v1452_v27 = vld [vmem:[%s1915_s0 + $0x34] ss:$8 sps:$4 sm:$0xff]  }
   0xa   :  { %v1485_v25 = vld [vmem:[%s1915_s0 + $0xe4] ss:$8 sps:$4 sm:$0xff]   ;;  %v1487_v28 = vld [vmem:[%s1915_s0 + $0xe0] ss:$8 sps:$4 sm:$0xff]   ;;  %v1488_v29 = vld [vmem:[%s1915_s0 + $0xf4] ss:$8 sps:$4 sm:$0xff]  }
   0xb   :  { %1249 = vmatpush3.bf16.msra.mxu0 %v1432_v5  ;;  %1420 = vmatpush3.bf16.msra.mxu1 %v1432_v5  ;;  %v1454_v30 = vld [vmem:[%s1915_s0 + $0x30] ss:$8 sps:$4 sm:$0xff]   ;;  %v1455_v31 = vld [vmem:[%s1915_s0 + $0x44] ss:$8 sps:$4 sm:$0xff]   ;;  %v1457_v33 = vld [vmem:[%s1915_s0 + $0x40] ss:$8 sps:$4 sm:$0xff]  }
   0xc   :  { %1250 = vmatprep.subr.bf16.mxu0 %v1433_v6  ;;  %1413 = vmatprep.subr.bf16.mxu1 %v1433_v6  ;;  %v1490_v32 = vld [vmem:[%s1915_s0 + $0xf0] ss:$8 sps:$4 sm:$0xff]   ;;  %v1458_v34 = vld [vmem:[%s1915_s0 + $0x54] ss:$8 sps:$4 sm:$0xff]   ;;  %v1461_v36 = vld [vmem:[%s1915_s0 + $0x64] ss:$8 sps:$4 sm:$0xff]  }
   0xd   :  { %v1460_v35 = vld [vmem:[%s1915_s0 + $0x50] ss:$8 sps:$4 sm:$0xff]   ;;  %v1463_v37 = vld [vmem:[%s1915_s0 + $0x60] ss:$8 sps:$4 sm:$0xff]   ;;  %v1464_v38 = vld [vmem:[%s1915_s0 + $0x74] ss:$8 sps:$4 sm:$0xff]  }
   0xe   :  { %v1466_v39 = vld [vmem:[%s1915_s0 + $0x70] ss:$8 sps:$4 sm:$0xff]   ;;  %v1467_v40 = vld [vmem:[%s1915_s0 + $0x84] ss:$8 sps:$4 sm:$0xff]   ;;  %v1469_v41 = vld [vmem:[%s1915_s0 + $0x80] ss:$8 sps:$4 sm:$0xff]  }
   0xf   :  { %1251 = vmatpush3.bf16.msra.mxu0 %v1434_v7  ;;  %1421 = vmatpush3.bf16.msra.mxu1 %v1434_v7  ;;  %v1470_v42 = vld [vmem:[%s1915_s0 + $0x94] ss:$8 sps:$4 sm:$0xff]   ;;  %29 = vst.msk [vmem:[#allocation2 + $0x30] sm:$0xff] %vm22_vm0, %v1493_v43  ;;  %30 = vst.msk [vmem:[#allocation2 + $0x38] sm:$0xff] %vm22_vm0, %v1493_v43  ;;  %v1472_v44 = vld [vmem:[%s1915_s0 + $0x90] ss:$8 sps:$4 sm:$0xff]  }
  0x10   :  { %1252 = vmatprep.subr.bf16.mxu0 %v1435_v8  ;;  %1414 = vmatprep.subr.bf16.mxu1 %v1435_v8  ;;  %31 = vst.msk [vmem:[#allocation2 + $0x40] sm:$0xff] %vm22_vm0, %v1493_v43  ;;  %32 = vst.msk [vmem:[#allocation2 + $0x48] sm:$0xff] %vm22_vm0, %v1493_v43  ;;  %v1476_v45 = vld [vmem:[%s1915_s0 + $0xa4] ss:$8 sps:$4 sm:$0xff]   ;;  %v1478_v46 = vld [vmem:[%s1915_s0 + $0xa0] ss:$8 sps:$4 sm:$0xff]  }
  0x11   :  { %33 = vst.msk [vmem:[#allocation2 + $0x50] sm:$0xff] %vm22_vm0, %v1493_v43  ;;  %34 = vst.msk [vmem:[#allocation2 + $0x58] sm:$0xff] %vm22_vm0, %v1493_v43  ;;  %v1482_v47 = vld [vmem:[%s1915_s0 + $0xb4] ss:$8 sps:$4 sm:$0xff]   ;;  %v1484_v48 = vld [vmem:[%s1915_s0 + $0xb0] ss:$8 sps:$4 sm:$0xff]  }
  0x12   :  { %35 = vst.msk [vmem:[#allocation2 + $0x60] sm:$0xff] %vm22_vm0, %v1493_v43  ;;  %36 = vst.msk [vmem:[#allocation2 + $0x68] sm:$0xff] %vm22_vm0, %v1493_v43  ;;  %v1491_v49 = vld [vmem:[%s1916_s2 + $0x8] sm:$0xff]   ;;  %v1492_v50 = vld [vmem:[%s1916_s2] sm:$0xff]  }
  0x13   :  { %1253 = vmatpush3.bf16.msra.mxu0 %v1436_v9  ;;  %1422 = vmatpush3.bf16.msra.mxu1 %v1436_v9  ;;  %37 = vst.msk [vmem:[#allocation2 + $0x70] sm:$0xff] %vm22_vm0, %v1493_v43  ;;  %38 = vst.msk [vmem:[#allocation2 + $0x78] sm:$0xff] %vm22_vm0, %v1493_v43  ;;  %v55_v53 = vld [vmem:[#allocation2] sm:$0xff]  ;;  %v56_v62 = vld [vmem:[#allocation2 + $0x8] sm:$0xff] }
  0x14   :  { %1254 = vmatprep.subr.bf16.mxu0 %v1437_v10  ;;  %1415 = vmatprep.subr.bf16.mxu1 %v1437_v10  ;;  %39 = vst.msk [vmem:[#allocation2 + $0x80] sm:$0xff] %vm22_vm0, %v1493_v43  ;;  %40 = vst.msk [vmem:[#allocation2 + $0x88] sm:$0xff] %vm22_vm0, %v1493_v43  ;;  %v57_v8 = vld [vmem:[#allocation2 + $0x10] sm:$0xff]  ;;  %v58_v18 = vld [vmem:[#allocation2 + $0x18] sm:$0xff] }
  0x15   :  { %41 = vst.msk [vmem:[#allocation2 + $0x90] sm:$0xff] %vm22_vm0, %v1493_v43  ;;  %42 = vst.msk [vmem:[#allocation2 + $0x98] sm:$0xff] %vm22_vm0, %v1493_v43 }
  0x16   :  { %43 = vst.msk [vmem:[#allocation2 + $0xa0] sm:$0xff] %vm22_vm0, %v1493_v43  ;;  %44 = vst.msk [vmem:[#allocation2 + $0xa8] sm:$0xff] %vm22_vm0, %v1493_v43 }
  0x17   :  { %1255 = vmatpush3.bf16.msra.mxu0 %v1438_v12  ;;  %1423 = vmatpush3.bf16.msra.mxu1 %v1438_v12  ;;  %45 = vst.msk [vmem:[#allocation2 + $0xb0] sm:$0xff] %vm22_vm0, %v1493_v43  ;;  %46 = vst.msk [vmem:[#allocation2 + $0xb8] sm:$0xff] %vm22_vm0, %v1493_v43 }
  0x18   :  { %1256 = vmatprep.subr.bf16.mxu0 %v1439_v13  ;;  %1416 = vmatprep.subr.bf16.mxu1 %v1439_v13  ;;  %47 = vst.msk [vmem:[#allocation2 + $0xc0] sm:$0xff] %vm22_vm0, %v1493_v43  ;;  %48 = vst.msk [vmem:[#allocation2 + $0xc8] sm:$0xff] %vm22_vm0, %v1493_v43 }
  0x19   :  { %49 = vst.msk [vmem:[#allocation2 + $0xd0] sm:$0xff] %vm22_vm0, %v1493_v43  ;;  %50 = vst.msk [vmem:[#allocation2 + $0xd8] sm:$0xff] %vm22_vm0, %v1493_v43 }
  0x1a   :  { %51 = vst.msk [vmem:[#allocation2 + $0xe0] sm:$0xff] %vm22_vm0, %v1493_v43  ;;  %52 = vst.msk [vmem:[#allocation2 + $0xe8] sm:$0xff] %vm22_vm0, %v1493_v43 }
  0x1b   :  { %1257 = vmatpush3.bf16.msra.mxu0 %v1440_v14  ;;  %1424 = vmatpush3.bf16.msra.mxu1 %v1440_v14  ;;  %53 = vst.msk [vmem:[#allocation2 + $0xf0] sm:$0xff] %vm22_vm0, %v1493_v43  ;;  %54 = vst.msk [vmem:[#allocation2 + $0xf8] sm:$0xff] %vm22_vm0, %v1493_v43 }
  0x1c   :  { %1258 = vmatprep.subr.bf16.mxu0 %v1441_v15  ;;  %1417 = vmatprep.subr.bf16.mxu1 %v1441_v15 }
  0x1f   :  { %1259 = vmatpush3.bf16.msra.mxu0 %v1442_v16  ;;  %1425 = vmatpush3.bf16.msra.mxu1 %v1442_v16  ;;  %v79_v56 = vld [vmem:[#allocation2 + $0xc0] sm:$0xff]  ;;  %v80_v2 = vld [vmem:[#allocation2 + $0xc8] sm:$0xff] }
  0x20   :  { %1374 = vmatprep.subr.bf16.mxu1 %v1491_v49  ;;  %v81_v12 = vld [vmem:[#allocation2 + $0xd0] sm:$0xff] }
  0x22   :  { %440 = vmatmul.mubr.bf16.vlgmr.msra.gmra.mxu0 %v1443_v17  ;;  %536 = vmatmul.mubr.bf16.vlgmr.msra.gmra.mxu1 %v1473_v20 }
  0x23   :  { %447 = vmatprep.mubr.bf16.mxu0 %v1446_v19  ;;  %543 = vmatprep.mubr.bf16.mxu1 %v1479_v21 }
  0x24   :  { %1375 = vmatpush3.bf16.msra.mxu1 %v1491_v49 }
  0x25   :  { %1376 = vmatprep.subr.bf16.mxu1 %v1492_v50 }
  0x28   :  { %1377 = vmatpush3.bf16.msra.mxu1 %v1492_v50 }
  0x2a   :  { %448 = vmatmul.mubr.bf16.gmra.mxu0 %v1448_v22  ;;  %544 = vmatmul.mubr.bf16.gmra.mxu1 %v1481_v24  ;;  %v82_v22 = vld [vmem:[#allocation2 + $0xd8] sm:$0xff] }
  0x2b   :  { %455 = vmatprep.mubr.bf16.mxu0 %v1449_v23  ;;  %551 = vmatprep.mubr.bf16.mxu1 %v1485_v25 }
  0x32   :  { %456 = vmatmul.mubr.bf16.gmra.mxu0 %v1451_v26  ;;  %552 = vmatmul.mubr.bf16.gmra.mxu1 %v1487_v28  ;;  %v59_v28 = vld [vmem:[#allocation2 + $0x20] sm:$0xff] }
  0x33   :  { %463 = vmatprep.mubr.bf16.mxu0 %v1452_v27  ;;  %559 = vmatprep.mubr.bf16.mxu1 %v1488_v29 }
  0x3a   :  { %464 = vmatmul.mubr.bf16.gmra.mxu0 %v1454_v30  ;;  %560 = vmatmul.mubr.bf16.gmra.mxu1 %v1490_v32 }
  0x3b   :  { %471 = vmatprep.mubr.bf16.mxu0 %v1455_v31 }
  0x42   :  { %472 = vmatmul.mubr.bf16.gmra.mxu0 %v1457_v33 }
  0x43   :  { %479 = vmatprep.mubr.bf16.mxu0 %v1458_v34 }
  0x4a   :  { %480 = vmatmul.mubr.bf16.gmra.mxu0 %v1460_v35  ;;  %v83_v35 = vld [vmem:[#allocation2 + $0xe0] sm:$0xff] }
  0x4b   :  { %487 = vmatprep.mubr.bf16.mxu0 %v1461_v36 }
  0x52   :  { %488 = vmatmul.mubr.bf16.gmra.mxu0 %v1463_v37 }
  0x53   :  { %495 = vmatprep.mubr.bf16.mxu0 %v1464_v38 }
  0x5a   :  { %496 = vmatmul.mubr.bf16.gmra.mxu0 %v1466_v39 }
  0x5b   :  { %503 = vmatprep.mubr.bf16.mxu0 %v1467_v40 }
  0x62   :  { %504 = vmatmul.mubr.bf16.gmra.mxu0 %v1469_v41  ;;  %v60_v41 = vld [vmem:[#allocation2 + $0x28] sm:$0xff] }
  0x63   :  { %511 = vmatprep.mubr.bf16.mxu0 %v1470_v42 }
  0x6a   :  { %512 = vmatmul.mubr.bf16.gmra.mxu0 %v1472_v44 }
  0x6b   :  { %519 = vmatprep.mubr.bf16.mxu0 %v1476_v45  ;;  %v84_v45 = vld [vmem:[#allocation2 + $0xe8] sm:$0xff] }
  0x72   :  { %520 = vmatmul.mubr.bf16.gmra.mxu0 %v1478_v46 }
  0x73   :  { %527 = vmatprep.mubr.bf16.mxu0 %v1482_v47 }
  0x7a   :  { %528 = vmatmul.mubr.bf16.gmra.mxu0 %v1484_v48 }
  0xe2   :  { %v1260_v51 = vpop.f32.mrf.mxu0  ;;  %v1332_v52 = vpop.f32.mrf.mxu1 }
  0xe4   :  { %v1261_v54 = vpop.f32.mrf.mxu0  ;;  %v1333_v57 = vpop.f32.mrf.mxu1 }
  0xe5   :  { %v1262_v55 = vadd.f32 %v1261_v54, %v1260_v51  ;;  %v1334_v59 = vadd.f32 %v1333_v57, %v1332_v52  ;;  %v61_v51 = vld [vmem:[#allocation2 + $0x30] sm:$0xff] }
  0xe6   :  { %v1263_v58 = vpop.f32.mrf.mxu0  ;;  %v1335_v61 = vpop.f32.mrf.mxu1 }
  0xe7   :  { %v568_v60 = vadd.f32 %v1262_v55, %v55_v53  ;;  %v592_v0 = vadd.f32 %v1334_v59, %v79_v56 }
  0xe8   :  { %v1264_v63 = vpop.f32.mrf.mxu0  ;;  %v1336_v3 = vpop.f32.mrf.mxu1 }
  0xe9   :  { %601 = vst.msk [vmem:[#allocation2] sm:$0xff] %vm22_vm0, %v568_v60  ;;  %v1265_v1 = vadd.f32 %v1264_v63, %v1263_v58  ;;  %625 = vst.msk [vmem:[#allocation2 + $0xc0] sm:$0xff] %vm22_vm0, %v592_v0  ;;  %v1337_v5 = vadd.f32 %v1336_v3, %v1335_v61  ;;  %v85_v58 = vld [vmem:[#allocation2 + $0xf0] sm:$0xff]  ;;  %v62_v0 = vld [vmem:[#allocation2 + $0x38] sm:$0xff] }
  0xea   :  { %v1266_v4 = vpop.f32.mrf.mxu0  ;;  %v1338_v7 = vpop.f32.mrf.mxu1 }
  0xeb   :  { %v569_v6 = vadd.f32 %v1265_v1, %v56_v62  ;;  %v593_v10 = vadd.f32 %v1337_v5, %v80_v2 }
  0xec   :  { %v1267_v9 = vpop.f32.mrf.mxu0  ;;  %v1339_v13 = vpop.f32.mrf.mxu1 }
  0xed   :  { %602 = vst.msk [vmem:[#allocation2 + $0x8] sm:$0xff] %vm22_vm0, %v569_v6  ;;  %v1268_v11 = vadd.f32 %v1267_v9, %v1266_v4  ;;  %626 = vst.msk [vmem:[#allocation2 + $0xc8] sm:$0xff] %vm22_vm0, %v593_v10  ;;  %v1340_v15 = vadd.f32 %v1339_v13, %v1338_v7  ;;  %v86_v4 = vld [vmem:[#allocation2 + $0xf8] sm:$0xff]  ;;  %v63_v9 = vld [vmem:[#allocation2 + $0x40] sm:$0xff] }
  0xee   :  { %v1269_v14 = vpop.f32.mrf.mxu0  ;;  %v1341_v17 = vpop.f32.mrf.mxu1 }
  0xef   :  { %v570_v16 = vadd.f32 %v1268_v11, %v57_v8  ;;  %v594_v20 = vadd.f32 %v1340_v15, %v81_v12 }
  0xf0   :  { %v1270_v19 = vpop.f32.mrf.mxu0  ;;  %v1342_v23 = vpop.f32.mrf.mxu1  ;;  %v636_v30 = vld [vmem:[#allocation2] sm:$0xff] }
  0xf1   :  { %603 = vst.msk [vmem:[#allocation2 + $0x10] sm:$0xff] %vm22_vm0, %v570_v16  ;;  %v1271_v21 = vadd.f32 %v1270_v19, %v1269_v14  ;;  %627 = vst.msk [vmem:[#allocation2 + $0xd0] sm:$0xff] %vm22_vm0, %v594_v20  ;;  %v1343_v25 = vadd.f32 %v1342_v23, %v1341_v17  ;;  %v65_v23 = vld [vmem:[#allocation2 + $0x50] sm:$0xff] }
  0xf2   :  { %v1272_v24 = vpop.f32.mrf.mxu0  ;;  %v1344_v27 = vpop.f32.mrf.mxu1 }
  0xf3   :  { %v571_v26 = vadd.f32 %v1271_v21, %v58_v18  ;;  %v595_v32 = vadd.f32 %v1343_v25, %v82_v22  ;;  %v64_v18 = vld [vmem:[#allocation2 + $0x48] sm:$0xff] }
  0xf4   :  { %v1273_v29 = vpop.f32.mrf.mxu0  ;;  %v637_v31 = vld [vmem:[#allocation2 + $0x8] sm:$0xff]  ;;  %v1345_v36 = vpop.f32.mrf.mxu1 }
  0xf5   :  { %604 = vst.msk [vmem:[#allocation2 + $0x18] sm:$0xff] %vm22_vm0, %v571_v26  ;;  %v1274_v33 = vadd.f32 %v1273_v29, %v1272_v24  ;;  %v668_v34 = vpack.c.bf16 %v637_v31, %v636_v30  ;;  %628 = vst.msk [vmem:[#allocation2 + $0xd8] sm:$0xff] %vm22_vm0, %v595_v32  ;;  %v1346_v38 = vadd.f32 %v1345_v36, %v1344_v27  ;;  %v66_v31 = vld [vmem:[#allocation2 + $0x58] sm:$0xff]  ;;  %v67_v36 = vld [vmem:[#allocation2 + $0x60] sm:$0xff] }
  0xf6   :  { %v1275_v37 = vpop.f32.mrf.mxu0  ;;  %v1347_v40 = vpop.f32.mrf.mxu1 }
  0xf7   :  { %v572_v39 = vadd.f32 %v1274_v33, %v59_v28  ;;  %1378 = vmatprep.mubr.msk.bf16.mxu1 %vm22_vm0, %v668_v34  ;;  %v596_v43 = vadd.f32 %v1346_v38, %v83_v35 }
  0xf8   :  { %v1276_v42 = vpop.f32.mrf.mxu0  ;;  %v1348_v46 = vpop.f32.mrf.mxu1  ;;  %v638_v53 = vld [vmem:[#allocation2 + $0x10] sm:$0xff] }
  0xf9   :  { %605 = vst.msk [vmem:[#allocation2 + $0x20] sm:$0xff] %vm22_vm0, %v572_v39  ;;  %v1277_v44 = vadd.f32 %v1276_v42, %v1275_v37  ;;  %629 = vst.msk [vmem:[#allocation2 + $0xe0] sm:$0xff] %vm22_vm0, %v596_v43  ;;  %v1349_v48 = vadd.f32 %v1348_v46, %v1347_v40 }
  0xfa   :  { %v1278_v47 = vpop.f32.mrf.mxu0  ;;  %v1350_v50 = vpop.f32.mrf.mxu1 }
  0xfb   :  { %v573_v49 = vadd.f32 %v1277_v44, %v60_v41  ;;  %v597_v55 = vadd.f32 %v1349_v48, %v84_v45  ;;  %v68_v44 = vld [vmem:[#allocation2 + $0x68] sm:$0xff] }
  0xfc   :  { %v1279_v52 = vpop.f32.mrf.mxu0  ;;  %v639_v54 = vld [vmem:[#allocation2 + $0x18] sm:$0xff]  ;;  %v1351_v59 = vpop.f32.mrf.mxu1 }
  0xfd   :  { %606 = vst.msk [vmem:[#allocation2 + $0x28] sm:$0xff] %vm22_vm0, %v573_v49  ;;  %v1280_v56 = vadd.f32 %v1279_v52, %v1278_v47  ;;  %v669_v57 = vpack.c.bf16 %v639_v54, %v638_v53  ;;  %630 = vst.msk [vmem:[#allocation2 + $0xe8] sm:$0xff] %vm22_vm0, %v597_v55  ;;  %v1352_v61 = vadd.f32 %v1351_v59, %v1350_v50  ;;  %v69_v49 = vld [vmem:[#allocation2 + $0x70] sm:$0xff] }
  0xfe   :  { %v1281_v60 = vpop.f32.mrf.mxu0  ;;  %v1353_v63 = vpop.f32.mrf.mxu1 }
  0xff   :  { %v574_v62 = vadd.f32 %v1280_v56, %v61_v51  ;;  %1379 = vmatmul.mubr.msk.bf16.vlgmr.msra.gmra.mxu1 %vm22_vm0, %v669_v57  ;;  %v598_v2 = vadd.f32 %v1352_v61, %v85_v58  ;;  %v70_v57 = vld [vmem:[#allocation2 + $0x78] sm:$0xff] }
 0x100   :  { %v1282_v1 = vpop.f32.mrf.mxu0  ;;  %v1354_v5 = vpop.f32.mrf.mxu1  ;;  %v640_v11 = vld [vmem:[#allocation2 + $0x20] sm:$0xff] }
 0x101   :  { %607 = vst.msk [vmem:[#allocation2 + $0x30] sm:$0xff] %vm22_vm0, %v574_v62  ;;  %v1283_v3 = vadd.f32 %v1282_v1, %v1281_v60  ;;  %631 = vst.msk [vmem:[#allocation2 + $0xf0] sm:$0xff] %vm22_vm0, %v598_v2  ;;  %v1355_v7 = vadd.f32 %v1354_v5, %v1353_v63  ;;  %v71_v62 = vld [vmem:[#allocation2 + $0x80] sm:$0xff] }
 0x102   :  { %v1284_v6 = vpop.f32.mrf.mxu0 }
 0x103   :  { %v575_v8 = vadd.f32 %v1283_v3, %v62_v0  ;;  %v599_v13 = vadd.f32 %v1355_v7, %v86_v4 }
 0x104   :  { %v1285_v10 = vpop.f32.mrf.mxu0  ;;  %v641_v12 = vld [vmem:[#allocation2 + $0x28] sm:$0xff] }
 0x105   :  { %608 = vst.msk [vmem:[#allocation2 + $0x38] sm:$0xff] %vm22_vm0, %v575_v8  ;;  %v1286_v14 = vadd.f32 %v1285_v10, %v1284_v6  ;;  %v670_v15 = vpack.c.bf16 %v641_v12, %v640_v11  ;;  %632 = vst.msk [vmem:[#allocation2 + $0xf8] sm:$0xff] %vm22_vm0, %v599_v13  ;;  %v72_v6 = vld [vmem:[#allocation2 + $0x88] sm:$0xff]  ;;  %v73_v11 = vld [vmem:[#allocation2 + $0x90] sm:$0xff] }
 0x106   :  { %v1287_v16 = vpop.f32.mrf.mxu0 }
 0x107   :  { %v576_v17 = vadd.f32 %v1286_v14, %v63_v9  ;;  %1382 = vmatprep.mubr.msk.bf16.mxu1 %vm22_vm0, %v670_v15 }
 0x108   :  { %v1288_v19 = vpop.f32.mrf.mxu0  ;;  %v642_v25 = vld [vmem:[#allocation2 + $0x30] sm:$0xff] }
 0x109   :  { %609 = vst.msk [vmem:[#allocation2 + $0x40] sm:$0xff] %vm22_vm0, %v576_v17  ;;  %v1289_v20 = vadd.f32 %v1288_v19, %v1287_v16  ;;  %v74_v19 = vld [vmem:[#allocation2 + $0x98] sm:$0xff] }
 0x10a   :  { %v1290_v21 = vpop.f32.mrf.mxu0 }
 0x10b   :  { %v577_v22 = vadd.f32 %v1289_v20, %v64_v18 }
 0x10c   :  { %v1291_v24 = vpop.f32.mrf.mxu0  ;;  %v643_v26 = vld [vmem:[#allocation2 + $0x38] sm:$0xff] }
 0x10d   :  { %610 = vst.msk [vmem:[#allocation2 + $0x48] sm:$0xff] %vm22_vm0, %v577_v22  ;;  %v1292_v27 = vadd.f32 %v1291_v24, %v1290_v21  ;;  %v671_v28 = vpack.c.bf16 %v643_v26, %v642_v25  ;;  %v75_v24 = vld [vmem:[#allocation2 + $0xa0] sm:$0xff] }
 0x10e   :  { %v1293_v29 = vpop.f32.mrf.mxu0 }
 0x10f   :  { %v578_v30 = vadd.f32 %v1292_v27, %v65_v23  ;;  %1383 = vmatmul.mubr.msk.bf16.gmra.mxu1 %vm22_vm0, %v671_v28 }
 0x110   :  { %v1294_v32 = vpop.f32.mrf.mxu0  ;;  %v644_v38 = vld [vmem:[#allocation2 + $0x40] sm:$0xff] }
 0x111   :  { %611 = vst.msk [vmem:[#allocation2 + $0x50] sm:$0xff] %vm22_vm0, %v578_v30  ;;  %v1295_v33 = vadd.f32 %v1294_v32, %v1293_v29  ;;  %v76_v32 = vld [vmem:[#allocation2 + $0xa8] sm:$0xff] }
 0x112   :  { %v1296_v34 = vpop.f32.mrf.mxu0 }
 0x113   :  { %v579_v35 = vadd.f32 %v1295_v33, %v66_v31 }
 0x114   :  { %v1297_v37 = vpop.f32.mrf.mxu0  ;;  %v645_v39 = vld [vmem:[#allocation2 + $0x48] sm:$0xff] }
 0x115   :  { %612 = vst.msk [vmem:[#allocation2 + $0x58] sm:$0xff] %vm22_vm0, %v579_v35  ;;  %v1298_v40 = vadd.f32 %v1297_v37, %v1296_v34  ;;  %v672_v41 = vpack.c.bf16 %v645_v39, %v644_v38  ;;  %v77_v37 = vld [vmem:[#allocation2 + $0xb0] sm:$0xff] }
 0x116   :  { %v1299_v42 = vpop.f32.mrf.mxu0 }
 0x117   :  { %v580_v43 = vadd.f32 %v1298_v40, %v67_v36  ;;  %1386 = vmatprep.mubr.msk.bf16.mxu1 %vm22_vm0, %v672_v41 }
 0x118   :  { %v1300_v45 = vpop.f32.mrf.mxu0  ;;  %v646_v51 = vld [vmem:[#allocation2 + $0x50] sm:$0xff] }
 0x119   :  { %613 = vst.msk [vmem:[#allocation2 + $0x60] sm:$0xff] %vm22_vm0, %v580_v43  ;;  %v1301_v46 = vadd.f32 %v1300_v45, %v1299_v42  ;;  %v78_v45 = vld [vmem:[#allocation2 + $0xb8] sm:$0xff] }
 0x11a   :  { %v1302_v47 = vpop.f32.mrf.mxu0 }
 0x11b   :  { %v581_v48 = vadd.f32 %v1301_v46, %v68_v44 }
 0x11c   :  { %v1303_v50 = vpop.f32.mrf.mxu0  ;;  %v647_v52 = vld [vmem:[#allocation2 + $0x58] sm:$0xff] }
 0x11d   :  { %614 = vst.msk [vmem:[#allocation2 + $0x68] sm:$0xff] %vm22_vm0, %v581_v48  ;;  %v1304_v53 = vadd.f32 %v1303_v50, %v1302_v47  ;;  %v673_v54 = vpack.c.bf16 %v647_v52, %v646_v51  ;;  %v660_v52 = vld [vmem:[#allocation2 + $0xc0] sm:$0xff] }
 0x11e   :  { %v1305_v55 = vpop.f32.mrf.mxu0 }
 0x11f   :  { %v582_v56 = vadd.f32 %v1304_v53, %v69_v49  ;;  %1387 = vmatmul.mubr.msk.bf16.gmra.mxu1 %vm22_vm0, %v673_v54  ;;  %v661_v53 = vld [vmem:[#allocation2 + $0xc8] sm:$0xff] }
 0x120   :  { %v1306_v58 = vpop.f32.mrf.mxu0  ;;  %v648_v0 = vld [vmem:[#allocation2 + $0x60] sm:$0xff] }
 0x121   :  { %615 = vst.msk [vmem:[#allocation2 + $0x70] sm:$0xff] %vm22_vm0, %v582_v56  ;;  %v1307_v59 = vadd.f32 %v1306_v58, %v1305_v55  ;;  %v662_v58 = vld [vmem:[#allocation2 + $0xd0] sm:$0xff] }
 0x122   :  { %v1308_v60 = vpop.f32.mrf.mxu0 }
 0x123   :  { %v583_v61 = vadd.f32 %v1307_v59, %v70_v57  ;;  %v680_v57 = vpack.c.bf16 %v661_v53, %v660_v52  ;;  %v663_v59 = vld [vmem:[#allocation2 + $0xd8] sm:$0xff] }
 0x124   :  { %v1309_v63 = vpop.f32.mrf.mxu0  ;;  %v649_v1 = vld [vmem:[#allocation2 + $0x68] sm:$0xff] }
 0x125   :  { %616 = vst.msk [vmem:[#allocation2 + $0x78] sm:$0xff] %vm22_vm0, %v583_v61  ;;  %v1310_v2 = vadd.f32 %v1309_v63, %v1308_v60  ;;  %v674_v3 = vpack.c.bf16 %v649_v1, %v648_v0  ;;  %v664_v60 = vld [vmem:[#allocation2 + $0xe0] sm:$0xff]  ;;  %v665_v61 = vld [vmem:[#allocation2 + $0xe8] sm:$0xff]  ;;  %v666_v0 = vld [vmem:[#allocation2 + $0xf0] sm:$0xff] }
 0x126   :  { %v1311_v4 = vpop.f32.mrf.mxu0  ;;  %v682_v63 = vpack.c.bf16 %v665_v61, %v664_v60  ;;  %v667_v1 = vld [vmem:[#allocation2 + $0xf8] sm:$0xff] }
 0x127   :  { %v584_v5 = vadd.f32 %v1310_v2, %v71_v62  ;;  %1390 = vmatprep.mubr.msk.bf16.mxu1 %vm22_vm0, %v674_v3  ;;  %v681_v62 = vpack.c.bf16 %v663_v59, %v662_v58  ;;  %v683_v2 = vpack.c.bf16 %v667_v1, %v666_v0  ;;  %v1752_v3 = vld [vmem:[%s1917_s3] ss:$0 sm:$0xff] }
 0x128   :  { %v1312_v7 = vpop.f32.mrf.mxu0  ;;  %v650_v13 = vld [vmem:[#allocation2 + $0x70] sm:$0xff] }
 0x129   :  { %617 = vst.msk [vmem:[#allocation2 + $0x80] sm:$0xff] %vm22_vm0, %v584_v5  ;;  %v1313_v8 = vadd.f32 %v1312_v7, %v1311_v4 }
 0x12a   :  { %v1314_v9 = vpop.f32.mrf.mxu0 }
 0x12b   :  { %v585_v10 = vadd.f32 %v1313_v8, %v72_v6 }
 0x12c   :  { %v1315_v12 = vpop.f32.mrf.mxu0  ;;  %v651_v14 = vld [vmem:[#allocation2 + $0x78] sm:$0xff] }
 0x12d   :  { %618 = vst.msk [vmem:[#allocation2 + $0x88] sm:$0xff] %vm22_vm0, %v585_v10  ;;  %v1316_v15 = vadd.f32 %v1315_v12, %v1314_v9  ;;  %v675_v16 = vpack.c.bf16 %v651_v14, %v650_v13 }
 0x12e   :  { %v1317_v17 = vpop.f32.mrf.mxu0 }
 0x12f   :  { %v586_v18 = vadd.f32 %v1316_v15, %v73_v11  ;;  %1391 = vmatmul.mubr.msk.bf16.gmra.mxu1 %vm22_vm0, %v675_v16 }
 0x130   :  { %v1318_v20 = vpop.f32.mrf.mxu0  ;;  %v652_v26 = vld [vmem:[#allocation2 + $0x80] sm:$0xff] }
 0x131   :  { %619 = vst.msk [vmem:[#allocation2 + $0x90] sm:$0xff] %vm22_vm0, %v586_v18  ;;  %v1319_v21 = vadd.f32 %v1318_v20, %v1317_v17 }
 0x132   :  { %v1320_v22 = vpop.f32.mrf.mxu0 }
 0x133   :  { %v587_v23 = vadd.f32 %v1319_v21, %v74_v19 }
 0x134   :  { %v1321_v25 = vpop.f32.mrf.mxu0  ;;  %v653_v27 = vld [vmem:[#allocation2 + $0x88] sm:$0xff] }
 0x135   :  { %620 = vst.msk [vmem:[#allocation2 + $0x98] sm:$0xff] %vm22_vm0, %v587_v23  ;;  %v1322_v28 = vadd.f32 %v1321_v25, %v1320_v22  ;;  %v676_v29 = vpack.c.bf16 %v653_v27, %v652_v26 }
 0x136   :  { %v1323_v30 = vpop.f32.mrf.mxu0 }
 0x137   :  { %v588_v31 = vadd.f32 %v1322_v28, %v75_v24  ;;  %1394 = vmatprep.mubr.msk.bf16.mxu1 %vm22_vm0, %v676_v29 }
 0x138   :  { %v1324_v33 = vpop.f32.mrf.mxu0  ;;  %v654_v39 = vld [vmem:[#allocation2 + $0x90] sm:$0xff] }
 0x139   :  { %621 = vst.msk [vmem:[#allocation2 + $0xa0] sm:$0xff] %vm22_vm0, %v588_v31  ;;  %v1325_v34 = vadd.f32 %v1324_v33, %v1323_v30 }
 0x13a   :  { %v1326_v35 = vpop.f32.mrf.mxu0 }
 0x13b   :  { %v589_v36 = vadd.f32 %v1325_v34, %v76_v32 }
 0x13c   :  { %v1327_v38 = vpop.f32.mrf.mxu0  ;;  %v655_v40 = vld [vmem:[#allocation2 + $0x98] sm:$0xff] }
 0x13d   :  { %622 = vst.msk [vmem:[#allocation2 + $0xa8] sm:$0xff] %vm22_vm0, %v589_v36  ;;  %v1328_v41 = vadd.f32 %v1327_v38, %v1326_v35  ;;  %v677_v42 = vpack.c.bf16 %v655_v40, %v654_v39 }
 0x13e   :  { %v1329_v43 = vpop.f32.mrf.mxu0 }
 0x13f   :  { %v590_v44 = vadd.f32 %v1328_v41, %v77_v37  ;;  %1395 = vmatmul.mubr.msk.bf16.gmra.mxu1 %vm22_vm0, %v677_v42 }
 0x140   :  { %v1330_v46 = vpop.f32.mrf.mxu0  ;;  %v656_v49 = vld [vmem:[#allocation2 + $0xa0] sm:$0xff] }
 0x141   :  { %623 = vst.msk [vmem:[#allocation2 + $0xb0] sm:$0xff] %vm22_vm0, %v590_v44  ;;  %v1331_v47 = vadd.f32 %v1330_v46, %v1329_v43 }
 0x143   :  { %v591_v48 = vadd.f32 %v1331_v47, %v78_v45 }
 0x144   :  { %v657_v50 = vld [vmem:[#allocation2 + $0xa8] sm:$0xff] }
 0x145   :  { %624 = vst.msk [vmem:[#allocation2 + $0xb8] sm:$0xff] %vm22_vm0, %v591_v48  ;;  %v678_v51 = vpack.c.bf16 %v657_v50, %v656_v49 }
 0x147   :  { %1398 = vmatprep.mubr.msk.bf16.mxu1 %vm22_vm0, %v678_v51 }
 0x148   :  { %v658_v54 = vld [vmem:[#allocation2 + $0xb0] sm:$0xff] }
 0x14c   :  { %v659_v55 = vld [vmem:[#allocation2 + $0xb8] sm:$0xff] }
 0x14d   :  { %v679_v56 = vpack.c.bf16 %v659_v55, %v658_v54 }
 0x14f   :  { %1399 = vmatmul.mubr.msk.bf16.gmra.mxu1 %vm22_vm0, %v679_v56 }
 0x150   :  { %1402 = vmatprep.mubr.msk.bf16.mxu1 %vm22_vm0, %v680_v57 }
 0x157   :  { %1403 = vmatmul.mubr.msk.bf16.gmra.mxu1 %vm22_vm0, %v681_v62 }
 0x158   :  { %1406 = vmatprep.mubr.msk.bf16.mxu1 %vm22_vm0, %v682_v63 }
 0x15f   :  { %1407 = vmatmul.mubr.msk.bf16.gmra.mxu1 %vm22_vm0, %v683_v2 }
 0x1bf   :  { %v1380_v4 = vpop.f32.mrf.mxu1 }
 0x1c0   :  { %v798_v5 = vadd.f32 %v1380_v4, %v1752_v3 }
 0x1c1   :  { %v789_v6 = vpop.f32.mrf.mxu1 }
 0x1c2   :  { %v918_v7 = vmax.f32 %v798_v5, 0.0  ;;  %v790_v8 = vadd.f32 %v1752_v3, %v789_v6 }
 0x1c3   :  { %v1381_v9 = vpop.f32.mrf.mxu1 }
 0x1c4   :  { %v1214_v10 = vpack.c.bf16 %v918_v7, %v918_v7  ;;  %v916_v11 = vmax.f32 %v790_v8, 0.0  ;;  %v801_v12 = vadd.f32 %v1381_v9, %v1752_v3 }
 0x1c5   :  { %v792_v13 = vpop.f32.mrf.mxu1 }
 0x1c6   :  { %1079 = vst.msk [vmem:[%s1918_s4 + $0x8] sm:$0xf] %vm1076_vm1, %v1214_v10  ;;  %v1212_v14 = vpack.c.bf16 %v916_v11, %v916_v11  ;;  %v919_v15 = vmax.f32 %v801_v12, 0.0  ;;  %v793_v16 = vadd.f32 %v1752_v3, %v792_v13 }
 0x1c8   :  { %1077 = vst.msk [vmem:[%s1918_s4] sm:$0xf] %vm1076_vm1, %v1212_v14  ;;  %v1215_v17 = vpack.c.bf16 %v919_v15, %v919_v15  ;;  %v917_v18 = vmax.f32 %v793_v16, 0.0 }
 0x1ca   :  { %1080 = vst.msk [vmem:[%s1918_s4 + $0xc] sm:$0xf] %vm1076_vm1, %v1215_v17  ;;  %v1213_v19 = vpack.c.bf16 %v917_v18, %v917_v18 }
 0x1cc   :  { %1078 = vst.msk [vmem:[%s1918_s4 + $0x4] sm:$0xf] %vm1076_vm1, %v1213_v19 }
 0x1cf   :  { %v1384_v20 = vpop.f32.mrf.mxu1 }
 0x1d0   :  { %v814_v21 = vadd.f32 %v1384_v20, %v1752_v3 }
 0x1d1   :  { %v805_v22 = vpop.f32.mrf.mxu1 }
 0x1d2   :  { %v922_v23 = vmax.f32 %v814_v21, 0.0  ;;  %v806_v24 = vadd.f32 %v1752_v3, %v805_v22 }
 0x1d3   :  { %v1385_v25 = vpop.f32.mrf.mxu1 }
 0x1d4   :  { %v1218_v26 = vpack.c.bf16 %v922_v23, %v922_v23  ;;  %v920_v27 = vmax.f32 %v806_v24, 0.0  ;;  %v817_v28 = vadd.f32 %v1385_v25, %v1752_v3 }
 0x1d5   :  { %v808_v29 = vpop.f32.mrf.mxu1 }
 0x1d6   :  { %1083 = vst.msk [vmem:[%s1918_s4 + $0x18] sm:$0xf] %vm1076_vm1, %v1218_v26  ;;  %v1216_v30 = vpack.c.bf16 %v920_v27, %v920_v27  ;;  %v923_v31 = vmax.f32 %v817_v28, 0.0  ;;  %v809_v32 = vadd.f32 %v1752_v3, %v808_v29 }
 0x1d8   :  { %1081 = vst.msk [vmem:[%s1918_s4 + $0x10] sm:$0xf] %vm1076_vm1, %v1216_v30  ;;  %v1219_v33 = vpack.c.bf16 %v923_v31, %v923_v31  ;;  %v921_v34 = vmax.f32 %v809_v32, 0.0 }
 0x1da   :  { %1084 = vst.msk [vmem:[%s1918_s4 + $0x1c] sm:$0xf] %vm1076_vm1, %v1219_v33  ;;  %v1217_v35 = vpack.c.bf16 %v921_v34, %v921_v34 }
 0x1dc   :  { %1082 = vst.msk [vmem:[%s1918_s4 + $0x14] sm:$0xf] %vm1076_vm1, %v1217_v35 }
 0x1df   :  { %v1388_v36 = vpop.f32.mrf.mxu1 }
 0x1e0   :  { %v830_v37 = vadd.f32 %v1388_v36, %v1752_v3 }
 0x1e1   :  { %v821_v38 = vpop.f32.mrf.mxu1 }
 0x1e2   :  { %v926_v39 = vmax.f32 %v830_v37, 0.0  ;;  %v822_v40 = vadd.f32 %v1752_v3, %v821_v38 }
 0x1e3   :  { %v1389_v41 = vpop.f32.mrf.mxu1 }
 0x1e4   :  { %v1222_v42 = vpack.c.bf16 %v926_v39, %v926_v39  ;;  %v924_v43 = vmax.f32 %v822_v40, 0.0  ;;  %v833_v44 = vadd.f32 %v1389_v41, %v1752_v3 }
 0x1e5   :  { %v824_v45 = vpop.f32.mrf.mxu1 }
 0x1e6   :  { %1087 = vst.msk [vmem:[%s1918_s4 + $0x28] sm:$0xf] %vm1076_vm1, %v1222_v42  ;;  %v1220_v46 = vpack.c.bf16 %v924_v43, %v924_v43  ;;  %v927_v47 = vmax.f32 %v833_v44, 0.0  ;;  %v825_v48 = vadd.f32 %v1752_v3, %v824_v45 }
 0x1e8   :  { %1085 = vst.msk [vmem:[%s1918_s4 + $0x20] sm:$0xf] %vm1076_vm1, %v1220_v46  ;;  %v1223_v49 = vpack.c.bf16 %v927_v47, %v927_v47  ;;  %v925_v50 = vmax.f32 %v825_v48, 0.0 }
 0x1ea   :  { %1088 = vst.msk [vmem:[%s1918_s4 + $0x2c] sm:$0xf] %vm1076_vm1, %v1223_v49  ;;  %v1221_v51 = vpack.c.bf16 %v925_v50, %v925_v50 }
 0x1ec   :  { %1086 = vst.msk [vmem:[%s1918_s4 + $0x24] sm:$0xf] %vm1076_vm1, %v1221_v51 }
 0x1ef   :  { %v1392_v52 = vpop.f32.mrf.mxu1 }
 0x1f0   :  { %v846_v53 = vadd.f32 %v1392_v52, %v1752_v3 }
 0x1f1   :  { %v837_v54 = vpop.f32.mrf.mxu1 }
 0x1f2   :  { %v930_v55 = vmax.f32 %v846_v53, 0.0  ;;  %v838_v56 = vadd.f32 %v1752_v3, %v837_v54 }
 0x1f3   :  { %v1393_v57 = vpop.f32.mrf.mxu1 }
 0x1f4   :  { %v1226_v58 = vpack.c.bf16 %v930_v55, %v930_v55  ;;  %v928_v59 = vmax.f32 %v838_v56, 0.0  ;;  %v849_v60 = vadd.f32 %v1393_v57, %v1752_v3 }
 0x1f5   :  { %v840_v61 = vpop.f32.mrf.mxu1 }
 0x1f6   :  { %1091 = vst.msk [vmem:[%s1918_s4 + $0x38] sm:$0xf] %vm1076_vm1, %v1226_v58  ;;  %v1224_v62 = vpack.c.bf16 %v928_v59, %v928_v59  ;;  %v931_v63 = vmax.f32 %v849_v60, 0.0  ;;  %v841_v0 = vadd.f32 %v1752_v3, %v840_v61 }
 0x1f8   :  { %1089 = vst.msk [vmem:[%s1918_s4 + $0x30] sm:$0xf] %vm1076_vm1, %v1224_v62  ;;  %v1227_v1 = vpack.c.bf16 %v931_v63, %v931_v63  ;;  %v929_v2 = vmax.f32 %v841_v0, 0.0 }
 0x1fa   :  { %1092 = vst.msk [vmem:[%s1918_s4 + $0x3c] sm:$0xf] %vm1076_vm1, %v1227_v1  ;;  %v1225_v4 = vpack.c.bf16 %v929_v2, %v929_v2 }
 0x1fc   :  { %1090 = vst.msk [vmem:[%s1918_s4 + $0x34] sm:$0xf] %vm1076_vm1, %v1225_v4 }
 0x1ff   :  { %v1396_v5 = vpop.f32.mrf.mxu1 }
 0x200   :  { %v862_v6 = vadd.f32 %v1396_v5, %v1752_v3 }
 0x201   :  { %v853_v7 = vpop.f32.mrf.mxu1 }
 0x202   :  { %v934_v8 = vmax.f32 %v862_v6, 0.0  ;;  %v854_v9 = vadd.f32 %v1752_v3, %v853_v7 }
 0x203   :  { %v1397_v10 = vpop.f32.mrf.mxu1 }
 0x204   :  { %v1230_v11 = vpack.c.bf16 %v934_v8, %v934_v8  ;;  %v932_v12 = vmax.f32 %v854_v9, 0.0  ;;  %v865_v13 = vadd.f32 %v1397_v10, %v1752_v3 }
 0x205   :  { %v856_v14 = vpop.f32.mrf.mxu1 }
 0x206   :  { %1095 = vst.msk [vmem:[%s1918_s4 + $0x48] sm:$0xf] %vm1076_vm1, %v1230_v11  ;;  %v1228_v15 = vpack.c.bf16 %v932_v12, %v932_v12  ;;  %v935_v16 = vmax.f32 %v865_v13, 0.0  ;;  %v857_v17 = vadd.f32 %v1752_v3, %v856_v14 }
 0x208   :  { %1093 = vst.msk [vmem:[%s1918_s4 + $0x40] sm:$0xf] %vm1076_vm1, %v1228_v15  ;;  %v1231_v18 = vpack.c.bf16 %v935_v16, %v935_v16  ;;  %v933_v19 = vmax.f32 %v857_v17, 0.0 }
 0x20a   :  { %1096 = vst.msk [vmem:[%s1918_s4 + $0x4c] sm:$0xf] %vm1076_vm1, %v1231_v18  ;;  %v1229_v20 = vpack.c.bf16 %v933_v19, %v933_v19 }
 0x20c   :  { %1094 = vst.msk [vmem:[%s1918_s4 + $0x44] sm:$0xf] %vm1076_vm1, %v1229_v20 }
 0x20f   :  { %v1400_v21 = vpop.f32.mrf.mxu1 }
 0x210   :  { %v878_v22 = vadd.f32 %v1400_v21, %v1752_v3 }
 0x211   :  { %v869_v23 = vpop.f32.mrf.mxu1 }
 0x212   :  { %v938_v24 = vmax.f32 %v878_v22, 0.0  ;;  %v870_v25 = vadd.f32 %v1752_v3, %v869_v23 }
 0x213   :  { %v1401_v26 = vpop.f32.mrf.mxu1 }
 0x214   :  { %v1234_v27 = vpack.c.bf16 %v938_v24, %v938_v24  ;;  %v936_v28 = vmax.f32 %v870_v25, 0.0  ;;  %v881_v29 = vadd.f32 %v1401_v26, %v1752_v3 }
 0x215   :  { %v872_v30 = vpop.f32.mrf.mxu1 }
 0x216   :  { %1099 = vst.msk [vmem:[%s1918_s4 + $0x58] sm:$0xf] %vm1076_vm1, %v1234_v27  ;;  %v1232_v31 = vpack.c.bf16 %v936_v28, %v936_v28  ;;  %v939_v32 = vmax.f32 %v881_v29, 0.0  ;;  %v873_v33 = vadd.f32 %v1752_v3, %v872_v30 }
 0x217   :  { %v1404_v34 = vpop.f32.mrf.mxu1 }
 0x218   :  { %1097 = vst.msk [vmem:[%s1918_s4 + $0x50] sm:$0xf] %vm1076_vm1, %v1232_v31  ;;  %v1235_v35 = vpack.c.bf16 %v939_v32, %v939_v32  ;;  %v937_v36 = vmax.f32 %v873_v33, 0.0  ;;  %v894_v37 = vadd.f32 %v1404_v34, %v1752_v3 }
 0x219   :  { %v885_v38 = vpop.f32.mrf.mxu1 }
 0x21a   :  { %1100 = vst.msk [vmem:[%s1918_s4 + $0x5c] sm:$0xf] %vm1076_vm1, %v1235_v35  ;;  %v1233_v39 = vpack.c.bf16 %v937_v36, %v937_v36  ;;  %v942_v40 = vmax.f32 %v894_v37, 0.0  ;;  %v886_v41 = vadd.f32 %v1752_v3, %v885_v38 }
 0x21b   :  { %v1405_v42 = vpop.f32.mrf.mxu1 }
 0x21c   :  { %1098 = vst.msk [vmem:[%s1918_s4 + $0x54] sm:$0xf] %vm1076_vm1, %v1233_v39  ;;  %v1238_v43 = vpack.c.bf16 %v942_v40, %v942_v40  ;;  %v940_v44 = vmax.f32 %v886_v41, 0.0  ;;  %v897_v45 = vadd.f32 %v1405_v42, %v1752_v3 }
 0x21d   :  { %v888_v46 = vpop.f32.mrf.mxu1 }
 0x21e   :  { %1103 = vst.msk [vmem:[%s1918_s4 + $0x68] sm:$0xf] %vm1076_vm1, %v1238_v43  ;;  %v1236_v47 = vpack.c.bf16 %v940_v44, %v940_v44  ;;  %v943_v48 = vmax.f32 %v897_v45, 0.0  ;;  %v889_v49 = vadd.f32 %v1752_v3, %v888_v46 }
 0x21f   :  { %v1408_v50 = vpop.f32.mrf.mxu1 }
 0x220   :  { %1101 = vst.msk [vmem:[%s1918_s4 + $0x60] sm:$0xf] %vm1076_vm1, %v1236_v47  ;;  %v1239_v51 = vpack.c.bf16 %v943_v48, %v943_v48  ;;  %v941_v52 = vmax.f32 %v889_v49, 0.0  ;;  %v910_v53 = vadd.f32 %v1408_v50, %v1752_v3 }
 0x221   :  { %v901_v54 = vpop.f32.mrf.mxu1 }
 0x222   :  { %1104 = vst.msk [vmem:[%s1918_s4 + $0x6c] sm:$0xf] %vm1076_vm1, %v1239_v51  ;;  %v1237_v55 = vpack.c.bf16 %v941_v52, %v941_v52  ;;  %v946_v56 = vmax.f32 %v910_v53, 0.0  ;;  %v902_v57 = vadd.f32 %v1752_v3, %v901_v54 }
 0x223   :  { %v1409_v58 = vpop.f32.mrf.mxu1 }
 0x224   :  { %1102 = vst.msk [vmem:[%s1918_s4 + $0x64] sm:$0xf] %vm1076_vm1, %v1237_v55  ;;  %v1242_v59 = vpack.c.bf16 %v946_v56, %v946_v56  ;;  %v944_v60 = vmax.f32 %v902_v57, 0.0  ;;  %v913_v61 = vadd.f32 %v1409_v58, %v1752_v3 }
 0x225   :  { %v904_v62 = vpop.f32.mrf.mxu1 }
 0x226   :  { %1107 = vst.msk [vmem:[%s1918_s4 + $0x78] sm:$0xf] %vm1076_vm1, %v1242_v59  ;;  %v1240_v63 = vpack.c.bf16 %v944_v60, %v944_v60  ;;  %v947_v0 = vmax.f32 %v913_v61, 0.0  ;;  %v905_v1 = vadd.f32 %v1752_v3, %v904_v62 }
 0x228   :  { %1105 = vst.msk [vmem:[%s1918_s4 + $0x70] sm:$0xf] %vm1076_vm1, %v1240_v63  ;;  %v1243_v2 = vpack.c.bf16 %v947_v0, %v947_v0  ;;  %v945_v4 = vmax.f32 %v905_v1, 0.0 }
 0x22a   :  { %1108 = vst.msk [vmem:[%s1918_s4 + $0x7c] sm:$0xf] %vm1076_vm1, %v1243_v2  ;;  %v1241_v5 = vpack.c.bf16 %v945_v4, %v945_v4 }
 0x22c   :  { %1106 = vst.msk [vmem:[%s1918_s4 + $0x74] sm:$0xf] %vm1076_vm1, %v1241_v5 }

</bundles_post_ra>
